<compile_context>
chip_gen: v6e
topology: v6e:2x2x1
jax: 0.10.0
libtpu: 0.0.40
codegen_flags: <defaults>
</compile_context>

<pallas_src>
import math
import numpy as np
import jax
import jax.numpy as jnp
from jax import lax
from jax.experimental import pallas as pl
from jax.experimental.pallas import tpu as pltpu

# ----------------------- hyper-parameters consistent with the module --------------------
NEURAL_DIM  = 16
N_CLASSES   = 10
D_MODEL     = 32
D_STATE     = 8
D_CONV      = 4
EXPAND      = 2
LAYER_DIM   = 2
N_DAYS      = 3
STRIDE_LEN  = 4
KERNEL_LEN  = 8
GAUSS_SIGMA = 2.0
GAUSS_K     = 20
BIDIR       = True

D_MAMBA = D_MODEL * 2 if BIDIR else D_MODEL            # 64
D_INNER = EXPAND * D_MAMBA                             # 128
DT_RANK = math.ceil(D_MAMBA / 16)                      # 4

B = 2
T = 40
SEQ_L = (T - KERNEL_LEN) // STRIDE_LEN + 1             # 9
BL = B * SEQ_L                                         # 18
KBLK = ((BL + 7) // 8) * 8                             # 24 (8-aligned row block per unfold tap)
BLS = BL * D_STATE                                     # 144 (stacked (step, state) rows)
OUT_PAD = 128                                          # lane-dense padded fc output width

PAD_L = (GAUSS_K - 1) // 2                             # 9   (torch 'same' padding split)
PAD_R = (GAUSS_K - 1) - PAD_L                          # 10


# ------------------------------------ in-kernel math helpers ----------------------------
def _silu(v):
    # v * sigmoid(v); the divide goes to the EUP via approximate reciprocal.
    return v * pl.reciprocal(1.0 + jnp.exp(-v), approx=True)


def _softplus(v):
    return jnp.maximum(v, 0.0) + jnp.log(1.0 + jnp.exp(-jnp.abs(v)))


# ------------------------------------ fused kernel --------------------------------------
def fused_decoder_kernel(x_ref, smbd_ref, sel_f_ref, sel_b_ref, dayw_ref, dayb_ref,
                         u1_ref, u2_ref, lib_ref, shift_ref,
                         win_ref, cw_ref, cb_ref, wdel_ref, dtb_ref,
                         wxbt_ref, wxc_ref, a_ref, dvec_ref, wout_ref,
                         expbd_ref, maskbd_ref, tsub_ref, tlane_ref,
                         fcw_ref, fcb_ref,
                         o_ref, hstk_ref):
    f32 = jnp.float32

    # ---- Phase 1: Gaussian smoothing + day transform + Softsign + unfold + linear_input
    x_all = x_ref[...]                                                    # [B*T, D]
    sm = jnp.dot(smbd_ref[...], x_all, preferred_element_type=f32)        # banded smoother

    row_t = lax.broadcasted_iota(jnp.int32, (B * T, 1), 0)
    td = jnp.zeros((B * T, NEURAL_DIM), f32)
    for b in range(B):                                                     # per-day weights
        pb = jnp.dot(sm, dayw_ref[b], preferred_element_type=f32) + dayb_ref[b]
        td = jnp.where((row_t >= b * T) & (row_t < (b + 1) * T), pb, td)
    tn = td * pl.reciprocal(1.0 + jnp.abs(td), approx=True)               # Softsign

    # unfold (fwd) + time-flipped copy (bwd) expressed as selection-matrix matmuls
    g = jnp.dot(sel_f_ref[...], tn, preferred_element_type=f32)           # [K*KBLK, D]
    gf = jnp.dot(sel_b_ref[...], tn, preferred_element_type=f32)          # [K*KBLK, D]

    acc = jnp.zeros((KBLK, D_MAMBA), f32)
    for k in range(KERNEL_LEN):
        acc = (acc
               + jnp.dot(g[KBLK * k:KBLK * (k + 1), :], u1_ref[k],
                         preferred_element_type=f32)
               + jnp.dot(gf[KBLK * k:KBLK * (k + 1), :], u2_ref[k],
                         preferred_element_type=f32))
    h = acc[:BL, :] + lib_ref[...]                                        # [B*L, d_mamba]

    # small constant selection matrices for the scan restructure
    expbd = expbd_ref[...]                                                # [BL*S, BL]
    maskbd = maskbd_ref[...]                                              # [BL, BL*S]
    tsub = tsub_ref[...]                                                  # [BL*S, S]
    tlane = tlane_ref[...]                                                # [S, BL*S]

    # ---- Phase 2: Mamba blocks (Dropout = identity in eval mode)
    for li in range(LAYER_DIM):
        xz = jnp.dot(h, win_ref[li], preferred_element_type=f32)          # [BL, 2*d_inner]
        xin = xz[:, :D_INNER]
        z = xz[:, D_INNER:]

        # causal depthwise conv via block-diagonal shift matrices (no scratch round-trip)
        cw = cw_ref[li]                                                   # [d_conv, d_inner]
        xc = cb_ref[li] + xin * cw[D_CONV - 1:D_CONV, :]                  # shift-0 tap
        for s in range(1, D_CONV):
            shifted = jnp.dot(shift_ref[s - 1], xin, preferred_element_type=f32)
            xc = xc + shifted * cw[D_CONV - 1 - s:D_CONV - s, :]
        xact = _silu(xc)

        # data-dependent SSM parameters (x_proj split + dt_proj folded in the wrapper)
        delta = _softplus(jnp.dot(xact, wdel_ref[li], preferred_element_type=f32)
                          + dtb_ref[li])                                  # [BL, d_inner]
        u = delta * xact                                                  # delta * x

        # ---- batch-precompute everything that is NOT the recurrence ----
        # dA for every (step, state) pair, one big EUP exp outside the serial chain
        delta_exp = jnp.dot(expbd, delta, preferred_element_type=f32)     # [BL*S, d_inner]
        a_tiled = jnp.dot(tsub, a_ref[li], preferred_element_type=f32)    # [BL*S, d_inner]
        dA_all = jnp.exp(a_tiled * delta_exp)

        # B_t[s, r] * u[r, d] for every (step, state) pair, via block-diagonal matmul
        bmat_t = lax.dot_general(wxbt_ref[li], xact, (((1,), (1,)), ((), ())),
                                 preferred_element_type=f32)              # [S, BL]
        bdiag = expbd * jnp.dot(tsub, bmat_t, preferred_element_type=f32) # [BL*S, BL]
        bu_all = jnp.dot(bdiag, u, preferred_element_type=f32)            # [BL*S, d_inner]

        # block-diagonal C (one row-block of width S per time step)
        c_full = jnp.dot(xact, wxc_ref[li], preferred_element_type=f32)   # [BL, S]
        cdiag = maskbd * jnp.dot(c_full, tlane, preferred_element_type=f32)  # [BL, BL*S]

        # ---- selective scan: only the irreducible recurrence stays in the loop ----
        # state = one [S, d_inner] f32 vreg; per step: one mul + one add + aligned store.
        hstate = jnp.zeros((D_STATE, D_INNER), f32)
        for r in range(BL):
            if r % SEQ_L == 0:                                            # new sequence
                hstate = jnp.zeros((D_STATE, D_INNER), f32)
            hstate = (dA_all[r * D_STATE:(r + 1) * D_STATE, :] * hstate
                      + bu_all[r * D_STATE:(r + 1) * D_STATE, :])
            hstk_ref[r * D_STATE:(r + 1) * D_STATE, :] = hstate

        # all per-step outputs in ONE matmul: y[r] = C[r] @ h_r  (+ D * x)
        y = (jnp.dot(cdiag, hstk_ref[...], preferred_element_type=f32)
             + xact * dvec_ref[li])
        y = y * _silu(z)                                                  # gate with SiLU(z)
        h = jnp.dot(y, wout_ref[li], preferred_element_type=f32)          # [BL, d_mamba]

    # ---- Phase 3: fc_decoder_out (padded to 128 lanes -> lane-dense store)
    o_ref[...] = jnp.dot(h, fcw_ref[...], preferred_element_type=f32) + fcb_ref[...]


# ------------------------------------ wrapper --------------------------------------------
def _full_spec(shape):
    zeros = (0,) * len(shape)
    return pl.BlockSpec(shape, lambda i: zeros)


@jax.jit
def mamba_decoder_forward(kp, neuralInput, dayIdx):
    x_all = neuralInput.astype(jnp.float32).reshape(B * T, NEURAL_DIM)
    dayw = kp['dayWeights'][dayIdx]                                       # [B, D, D]
    dayb = kp['dayBias'][dayIdx]                                          # [B, 1, D]

    inputs = (x_all, kp['smbd'], kp['sel_f'], kp['sel_b'], dayw, dayb,
              kp['u1'], kp['u2'], kp['li_b'], kp['shift'],
              kp['win'], kp['cw'], kp['cb'], kp['wdel'], kp['dtb'],
              kp['wxbt'], kp['wxc'], kp['A'], kp['Dv'], kp['wout'],
              kp['expand_bd'], kp['mask_bd'], kp['tile_sub'], kp['tile_lane'],
              kp['fcw'], kp['fcb'])

    out = pl.pallas_call(
        fused_decoder_kernel,
        out_shape=jax.ShapeDtypeStruct((BL, OUT_PAD), jnp.float32),
        grid=(1,),
        in_specs=[_full_spec(a.shape) for a in inputs],
        out_specs=pl.BlockSpec((BL, OUT_PAD), lambda i: (0, 0)),
        scratch_shapes=[pltpu.VMEM((BLS, D_INNER), jnp.float32)],
        compiler_params=pltpu.CompilerParams(dimension_semantics=("arbitrary",)),
    )(*inputs)

    return out[:, :N_CLASSES + 1].reshape(B, SEQ_L, N_CLASSES + 1)


# ------------------------------------ parameters -----------------------------------------
def init_params(key):
    keys = iter(jax.random.split(key, 64))

    def rnd(shape, scale=0.02):
        return scale * jax.random.normal(next(keys), shape, dtype=jnp.float32)

    params = {}
    # day transform params exactly as in __init__: identity weights, zero bias
    params['dayWeights'] = jnp.tile(jnp.eye(NEURAL_DIM, dtype=jnp.float32)[None],
                                    (N_DAYS, 1, 1))
    params['dayBias'] = jnp.zeros((N_DAYS, 1, NEURAL_DIM), jnp.float32)

    # Gaussian smoother kernel (size 20, sigma = gaussianSmoothWidth, normalized)
    t = jnp.arange(GAUSS_K, dtype=jnp.float32)
    g = jnp.exp(-0.5 * ((t - (GAUSS_K - 1) / 2.0) / GAUSS_SIGMA) ** 2)
    g = g / jnp.sum(g)
    params['gauss_w'] = jnp.tile(g[:, None], (1, NEURAL_DIM))             # [20, D]

    in_f = NEURAL_DIM * KERNEL_LEN * (2 if BIDIR else 1)
    params['li_wt'] = rnd((in_f, D_MAMBA))
    params['li_b'] = rnd((1, D_MAMBA))

    layers = []
    for _ in range(LAYER_DIM):
        layers.append({
            'in_proj_wt': rnd((D_MAMBA, 2 * D_INNER)),
            'conv_w': rnd((D_CONV, D_INNER), 0.1),
            'conv_b': rnd((1, D_INNER), 0.1),
            'x_proj_wt': rnd((D_INNER, DT_RANK + 2 * D_STATE)),
            'dt_proj_wt': rnd((DT_RANK, D_INNER), 0.1),
            'dt_proj_b': rnd((1, D_INNER), 0.1),
            # A = -exp(A_log), S4D-real init -> state n is -(n+1); stored transposed [S, di]
            'A_t': -jnp.tile(jnp.arange(1, D_STATE + 1, dtype=jnp.float32)[:, None],
                             (1, D_INNER)),
            'D': jnp.ones((1, D_INNER), jnp.float32),
            'out_proj_wt': rnd((D_INNER, D_MAMBA)),
        })
    params['layers'] = layers

    params['fc_wt'] = rnd((D_MAMBA, N_CLASSES + 1))
    params['fc_b'] = rnd((1, N_CLASSES + 1))
    return params


def prepare_kernel_params(params):
    """Reshape / fold the module parameters into the layout the fused kernel consumes."""
    kp = {}

    # banded Gaussian smoothing matrix (same per channel), block-diagonal over batch
    g = np.asarray(params['gauss_w'][:, 0], dtype=np.float32)             # [GAUSS_K]
    sm = np.zeros((T, T), np.float32)
    for t_out in range(T):
        for k in range(GAUSS_K):
            t_in = t_out + k - PAD_L
            if 0 <= t_in < T:
                sm[t_out, t_in] += g[k]
    kp['smbd'] = jnp.asarray(np.kron(np.eye(B, dtype=np.float32), sm))    # [B*T, B*T]

    # unfold selection matrices: row KBLK*k + b*L + l picks time sample b*T + 4l + k
    sel_f = np.zeros((KERNEL_LEN * KBLK, B * T), np.float32)
    sel_b = np.zeros((KERNEL_LEN * KBLK, B * T), np.float32)
    for k in range(KERNEL_LEN):
        for b in range(B):
            for l in range(SEQ_L):
                r = KBLK * k + b * SEQ_L + l
                sel_f[r, b * T + l * STRIDE_LEN + k] = 1.0
                sel_b[r, b * T + (SEQ_L - 1 - l) * STRIDE_LEN + k] = 1.0
    kp['sel_f'] = jnp.asarray(sel_f)
    kp['sel_b'] = jnp.asarray(sel_b)

    # block-diagonal causal shift matrices (no cross-sequence leakage)
    shift = np.zeros((D_CONV - 1, BL, BL), np.float32)
    for s in range(1, D_CONV):
        for r in range(BL):
            if (r % SEQ_L) >= s:
                shift[s - 1, r, r - s] = 1.0
    kp['shift'] = jnp.asarray(shift)

    kp['dayWeights'] = params['dayWeights']
    kp['dayBias'] = params['dayBias']

    # linear_input weights reorganised per unfold tap: u[k, d, m] = W[d*K + k, m]
    li_wt = params['li_wt']
    half = NEURAL_DIM * KERNEL_LEN
    kp['u1'] = jnp.transpose(li_wt[:half].reshape(NEURAL_DIM, KERNEL_LEN, D_MAMBA),
                             (1, 0, 2))
    kp['u2'] = jnp.transpose(li_wt[half:].reshape(NEURAL_DIM, KERNEL_LEN, D_MAMBA),
                             (1, 0, 2))
    kp['li_b'] = params['li_b']

    # Mamba layers stacked along a leading layer axis (indexed statically in-kernel)
    ls = params['layers']
    kp['win'] = jnp.stack([lp['in_proj_wt'] for lp in ls])
    kp['cw'] = jnp.stack([lp['conv_w'] for lp in ls])
    kp['cb'] = jnp.stack([lp['conv_b'] for lp in ls])
    # fold dt_proj into x_proj's dt columns -> one [d_inner, d_inner] delta weight
    kp['wdel'] = jnp.stack([lp['x_proj_wt'][:, :DT_RANK] @ lp['dt_proj_wt'] for lp in ls])
    kp['dtb'] = jnp.stack([lp['dt_proj_b'] for lp in ls])
    kp['wxbt'] = jnp.stack([lp['x_proj_wt'][:, DT_RANK:DT_RANK + D_STATE].T for lp in ls])
    kp['wxc'] = jnp.stack([lp['x_proj_wt'][:, DT_RANK + D_STATE:] for lp in ls])
    kp['A'] = jnp.stack([lp['A_t'] for lp in ls])
    kp['Dv'] = jnp.stack([lp['D'] for lp in ls])
    kp['wout'] = jnp.stack([lp['out_proj_wt'] for lp in ls])

    # constant block-diagonal expansion / masking matrices for the scan restructure
    #   expand_bd[r*S+s, r'] = (r' == r)   (expands per-step rows to per-(step,state) rows)
    #   tile_sub [r*S+s, s'] = (s' == s)   (tiles per-state rows across steps)
    ebd = np.zeros((BLS, BL), np.float32)
    tsub = np.zeros((BLS, D_STATE), np.float32)
    for r in range(BL):
        for s in range(D_STATE):
            ebd[r * D_STATE + s, r] = 1.0
            tsub[r * D_STATE + s, s] = 1.0
    kp['expand_bd'] = jnp.asarray(ebd)            # [BL*S, BL]
    kp['mask_bd'] = jnp.asarray(ebd.T)            # [BL, BL*S]
    kp['tile_sub'] = jnp.asarray(tsub)            # [BL*S, S]
    kp['tile_lane'] = jnp.asarray(tsub.T)         # [S, BL*S]

    # fc_decoder_out, zero-padded to 128 output lanes (lane-dense HBM store)
    kp['fcw'] = jnp.zeros((D_MAMBA, OUT_PAD), jnp.float32).at[:, :N_CLASSES + 1].set(
        params['fc_wt'])
    kp['fcb'] = jnp.zeros((1, OUT_PAD), jnp.float32).at[:, :N_CLASSES + 1].set(
        params['fc_b'])
    return kp


# ------------------------------------ main ------------------------------------------------
if __name__ == "__main__":
    key = jax.random.PRNGKey(0)
    k_param, k_x, k_d = jax.random.split(key, 3)

    params = init_params(k_param)
    kparams = prepare_kernel_params(params)

    neuralInput = jax.random.normal(k_x, (B, T, NEURAL_DIM), dtype=jnp.float32)
    dayIdx = jax.random.randint(k_d, (B,), 0, N_DAYS)

    out = mamba_decoder_forward(kparams, neuralInput, dayIdx)
    out = jax.block_until_ready(out)

    assert out.shape == (B, SEQ_L, N_CLASSES + 1), out.shape
    assert bool(jnp.all(jnp.isfinite(out)))
    print("KERNEL_OK")
</pallas_src>

<mosaic_0001>
module attributes {stable_mosaic.version = 11 : i64} {
  func.func @fused_decoder_kernel(%arg0: i32, %arg1: memref<80x16xf32, #tpu.memory_space<vmem>>, %arg2: memref<80x80xf32, #tpu.memory_space<vmem>>, %arg3: memref<192x80xf32, #tpu.memory_space<vmem>>, %arg4: memref<192x80xf32, #tpu.memory_space<vmem>>, %arg5: memref<2x16x16xf32, #tpu.memory_space<vmem>>, %arg6: memref<2x1x16xf32, #tpu.memory_space<vmem>>, %arg7: memref<8x16x64xf32, #tpu.memory_space<vmem>>, %arg8: memref<8x16x64xf32, #tpu.memory_space<vmem>>, %arg9: memref<1x64xf32, #tpu.memory_space<vmem>>, %arg10: memref<3x18x18xf32, #tpu.memory_space<vmem>>, %arg11: memref<2x64x256xf32, #tpu.memory_space<vmem>>, %arg12: memref<2x4x128xf32, #tpu.memory_space<vmem>>, %arg13: memref<2x1x128xf32, #tpu.memory_space<vmem>>, %arg14: memref<2x128x128xf32, #tpu.memory_space<vmem>>, %arg15: memref<2x1x128xf32, #tpu.memory_space<vmem>>, %arg16: memref<2x8x128xf32, #tpu.memory_space<vmem>>, %arg17: memref<2x128x8xf32, #tpu.memory_space<vmem>>, %arg18: memref<2x8x128xf32, #tpu.memory_space<vmem>>, %arg19: memref<2x1x128xf32, #tpu.memory_space<vmem>>, %arg20: memref<2x128x64xf32, #tpu.memory_space<vmem>>, %arg21: memref<144x18xf32, #tpu.memory_space<vmem>>, %arg22: memref<18x144xf32, #tpu.memory_space<vmem>>, %arg23: memref<144x8xf32, #tpu.memory_space<vmem>>, %arg24: memref<8x144xf32, #tpu.memory_space<vmem>>, %arg25: memref<64x128xf32, #tpu.memory_space<vmem>>, %arg26: memref<1x128xf32, #tpu.memory_space<vmem>>, %arg27: memref<18x128xf32, #tpu.memory_space<vmem>>, %arg28: memref<144x128xf32, #tpu.memory_space<vmem>>) attributes {dimension_semantics = [#tpu.dimension_semantics<arbitrary>], iteration_bounds = array<i64: 1>, scalar_prefetch = 0 : i64, scratch_operands = 1 : i64, tpu.core_type = #tpu.core_type<tc>, window_params = [{pipeline_mode = #tpu.pipeline_mode<synchronous>, transform_indices = @transform_0, window_bounds = array<i64: 80, 16>}, {pipeline_mode = #tpu.pipeline_mode<synchronous>, transform_indices = @transform_1, window_bounds = array<i64: 80, 80>}, {pipeline_mode = #tpu.pipeline_mode<synchronous>, transform_indices = @transform_2, window_bounds = array<i64: 192, 80>}, {pipeline_mode = #tpu.pipeline_mode<synchronous>, transform_indices = @transform_3, window_bounds = array<i64: 192, 80>}, {pipeline_mode = #tpu.pipeline_mode<synchronous>, transform_indices = @transform_4, window_bounds = array<i64: 2, 16, 16>}, {pipeline_mode = #tpu.pipeline_mode<synchronous>, transform_indices = @transform_5, window_bounds = array<i64: 2, 1, 16>}, {pipeline_mode = #tpu.pipeline_mode<synchronous>, transform_indices = @transform_6, window_bounds = array<i64: 8, 16, 64>}, {pipeline_mode = #tpu.pipeline_mode<synchronous>, transform_indices = @transform_7, window_bounds = array<i64: 8, 16, 64>}, {pipeline_mode = #tpu.pipeline_mode<synchronous>, transform_indices = @transform_8, window_bounds = array<i64: 1, 64>}, {pipeline_mode = #tpu.pipeline_mode<synchronous>, transform_indices = @transform_9, window_bounds = array<i64: 3, 18, 18>}, {pipeline_mode = #tpu.pipeline_mode<synchronous>, transform_indices = @transform_10, window_bounds = array<i64: 2, 64, 256>}, {pipeline_mode = #tpu.pipeline_mode<synchronous>, transform_indices = @transform_11, window_bounds = array<i64: 2, 4, 128>}, {pipeline_mode = #tpu.pipeline_mode<synchronous>, transform_indices = @transform_12, window_bounds = array<i64: 2, 1, 128>}, {pipeline_mode = #tpu.pipeline_mode<synchronous>, transform_indices = @transform_13, window_bounds = array<i64: 2, 128, 128>}, {pipeline_mode = #tpu.pipeline_mode<synchronous>, transform_indices = @transform_14, window_bounds = array<i64: 2, 1, 128>}, {pipeline_mode = #tpu.pipeline_mode<synchronous>, transform_indices = @transform_15, window_bounds = array<i64: 2, 8, 128>}, {pipeline_mode = #tpu.pipeline_mode<synchronous>, transform_indices = @transform_16, window_bounds = array<i64: 2, 128, 8>}, {pipeline_mode = #tpu.pipeline_mode<synchronous>, transform_indices = @transform_17, window_bounds = array<i64: 2, 8, 128>}, {pipeline_mode = #tpu.pipeline_mode<synchronous>, transform_indices = @transform_18, window_bounds = array<i64: 2, 1, 128>}, {pipeline_mode = #tpu.pipeline_mode<synchronous>, transform_indices = @transform_19, window_bounds = array<i64: 2, 128, 64>}, {pipeline_mode = #tpu.pipeline_mode<synchronous>, transform_indices = @transform_20, window_bounds = array<i64: 144, 18>}, {pipeline_mode = #tpu.pipeline_mode<synchronous>, transform_indices = @transform_21, window_bounds = array<i64: 18, 144>}, {pipeline_mode = #tpu.pipeline_mode<synchronous>, transform_indices = @transform_22, window_bounds = array<i64: 144, 8>}, {pipeline_mode = #tpu.pipeline_mode<synchronous>, transform_indices = @transform_23, window_bounds = array<i64: 8, 144>}, {pipeline_mode = #tpu.pipeline_mode<synchronous>, transform_indices = @transform_24, window_bounds = array<i64: 64, 128>}, {pipeline_mode = #tpu.pipeline_mode<synchronous>, transform_indices = @transform_25, window_bounds = array<i64: 1, 128>}, {pipeline_mode = #tpu.pipeline_mode<synchronous>, transform_indices = @transform_26, window_bounds = array<i64: 18, 128>}]} {
    %c0 = arith.constant 0 : index
    %c0_0 = arith.constant 0 : index
    %0 = vector.load %arg1[%c0, %c0_0] : memref<80x16xf32, #tpu.memory_space<vmem>>, vector<80x16xf32>
    %c0_1 = arith.constant 0 : index
    %c0_2 = arith.constant 0 : index
    %1 = vector.load %arg2[%c0_1, %c0_2] : memref<80x80xf32, #tpu.memory_space<vmem>>, vector<80x80xf32>
    %cst = arith.constant dense<0.000000e+00> : vector<80x16xf32>
    %2 = tpu.matmul %1, %0, %cst {dimension_numbers = #tpu.dot_dimension_numbers<[1], [0], [0], [1], [0, 0, 1, 1], [], []>} : vector<80x80xf32>, vector<80x16xf32>, vector<80x16xf32> -> vector<80x16xf32>
    %3 = tpu.iota {dimensions = array<i32: 0>} : vector<80x1xi32>
    %cst_3 = arith.constant 0.000000e+00 : f32
    %4 = vector.broadcast %cst_3 : f32 to vector<80x16xf32>
    %c0_4 = arith.constant 0 : index
    %c0_5 = arith.constant 0 : index
    %c0_6 = arith.constant 0 : index
    %5 = vector.load %arg5[%c0_4, %c0_5, %c0_6] : memref<2x16x16xf32, #tpu.memory_space<vmem>>, vector<1x16x16xf32>
    %6 = vector.shape_cast %5 : vector<1x16x16xf32> to vector<16x16xf32>
    %cst_7 = arith.constant dense<0.000000e+00> : vector<80x16xf32>
    %7 = tpu.matmul %2, %6, %cst_7 {dimension_numbers = #tpu.dot_dimension_numbers<[1], [0], [0], [1], [0, 0, 1, 1], [], []>} : vector<80x16xf32>, vector<16x16xf32>, vector<80x16xf32> -> vector<80x16xf32>
    %c0_8 = arith.constant 0 : index
    %c0_9 = arith.constant 0 : index
    %c0_10 = arith.constant 0 : index
    %8 = vector.load %arg6[%c0_8, %c0_9, %c0_10] : memref<2x1x16xf32, #tpu.memory_space<vmem>>, vector<1x1x16xf32>
    %9 = vector.shape_cast %8 : vector<1x1x16xf32> to vector<1x16xf32>
    %10 = vector.broadcast %9 : vector<1x16xf32> to vector<80x16xf32>
    %11 = arith.addf %7, %10 : vector<80x16xf32>
    %c0_i32 = arith.constant 0 : i32
    %12 = vector.broadcast %c0_i32 : i32 to vector<80x1xi32>
    %13 = arith.cmpi sge, %3, %12 : vector<80x1xi32>
    %c40_i32 = arith.constant 40 : i32
    %14 = vector.broadcast %c40_i32 : i32 to vector<80x1xi32>
    %15 = arith.cmpi slt, %3, %14 : vector<80x1xi32>
    %16 = arith.andi %13, %15 : vector<80x1xi1>
    %17 = vector.shape_cast %16 : vector<80x1xi1> to vector<80x1xi1>
    %18 = vector.broadcast %17 : vector<80x1xi1> to vector<80x16xi1>
    %19 = arith.select %18, %11, %4 : vector<80x16xi1>, vector<80x16xf32>
    %c1 = arith.constant 1 : index
    %c0_11 = arith.constant 0 : index
    %c0_12 = arith.constant 0 : index
    %20 = vector.load %arg5[%c1, %c0_11, %c0_12] : memref<2x16x16xf32, #tpu.memory_space<vmem>>, vector<1x16x16xf32>
    %21 = vector.shape_cast %20 : vector<1x16x16xf32> to vector<16x16xf32>
    %cst_13 = arith.constant dense<0.000000e+00> : vector<80x16xf32>
    %22 = tpu.matmul %2, %21, %cst_13 {dimension_numbers = #tpu.dot_dimension_numbers<[1], [0], [0], [1], [0, 0, 1, 1], [], []>} : vector<80x16xf32>, vector<16x16xf32>, vector<80x16xf32> -> vector<80x16xf32>
    %c1_14 = arith.constant 1 : index
    %c0_15 = arith.constant 0 : index
    %c0_16 = arith.constant 0 : index
    %23 = vector.load %arg6[%c1_14, %c0_15, %c0_16] : memref<2x1x16xf32, #tpu.memory_space<vmem>>, vector<1x1x16xf32>
    %24 = vector.shape_cast %23 : vector<1x1x16xf32> to vector<1x16xf32>
    %25 = vector.broadcast %24 : vector<1x16xf32> to vector<80x16xf32>
    %26 = arith.addf %22, %25 : vector<80x16xf32>
    %c40_i32_17 = arith.constant 40 : i32
    %27 = vector.broadcast %c40_i32_17 : i32 to vector<80x1xi32>
    %28 = arith.cmpi sge, %3, %27 : vector<80x1xi32>
    %c80_i32 = arith.constant 80 : i32
    %29 = vector.broadcast %c80_i32 : i32 to vector<80x1xi32>
    %30 = arith.cmpi slt, %3, %29 : vector<80x1xi32>
    %31 = arith.andi %28, %30 : vector<80x1xi1>
    %32 = vector.shape_cast %31 : vector<80x1xi1> to vector<80x1xi1>
    %33 = vector.broadcast %32 : vector<80x1xi1> to vector<80x16xi1>
    %34 = arith.select %33, %26, %19 : vector<80x16xi1>, vector<80x16xf32>
    %35 = math.absf %34 : vector<80x16xf32>
    %cst_18 = arith.constant 1.000000e+00 : f32
    %36 = vector.broadcast %cst_18 : f32 to vector<80x16xf32>
    %37 = arith.addf %36, %35 : vector<80x16xf32>
    %38 = tpu.reciprocal %37 {approx = true} : vector<80x16xf32> -> vector<80x16xf32>
    %39 = arith.mulf %34, %38 : vector<80x16xf32>
    %c0_19 = arith.constant 0 : index
    %c0_20 = arith.constant 0 : index
    %40 = vector.load %arg3[%c0_19, %c0_20] : memref<192x80xf32, #tpu.memory_space<vmem>>, vector<192x80xf32>
    %cst_21 = arith.constant dense<0.000000e+00> : vector<192x16xf32>
    %41 = tpu.matmul %40, %39, %cst_21 {dimension_numbers = #tpu.dot_dimension_numbers<[1], [0], [0], [1], [0, 0, 1, 1], [], []>} : vector<192x80xf32>, vector<80x16xf32>, vector<192x16xf32> -> vector<192x16xf32>
    %c0_22 = arith.constant 0 : index
    %c0_23 = arith.constant 0 : index
    %42 = vector.load %arg4[%c0_22, %c0_23] : memref<192x80xf32, #tpu.memory_space<vmem>>, vector<192x80xf32>
    %cst_24 = arith.constant dense<0.000000e+00> : vector<192x16xf32>
    %43 = tpu.matmul %42, %39, %cst_24 {dimension_numbers = #tpu.dot_dimension_numbers<[1], [0], [0], [1], [0, 0, 1, 1], [], []>} : vector<192x80xf32>, vector<80x16xf32>, vector<192x16xf32> -> vector<192x16xf32>
    %cst_25 = arith.constant 0.000000e+00 : f32
    %44 = vector.broadcast %cst_25 : f32 to vector<24x64xf32>
    %45 = vector.extract_strided_slice %41 {offsets = [0, 0], sizes = [24, 16], strides = [1, 1]} : vector<192x16xf32> to vector<24x16xf32>
    %c0_26 = arith.constant 0 : index
    %c0_27 = arith.constant 0 : index
    %c0_28 = arith.constant 0 : index
    %46 = vector.load %arg7[%c0_26, %c0_27, %c0_28] : memref<8x16x64xf32, #tpu.memory_space<vmem>>, vector<1x16x64xf32>
    %47 = vector.shape_cast %46 : vector<1x16x64xf32> to vector<16x64xf32>
    %cst_29 = arith.constant dense<0.000000e+00> : vector<24x64xf32>
    %48 = tpu.matmul %45, %47, %cst_29 {dimension_numbers = #tpu.dot_dimension_numbers<[1], [0], [0], [1], [0, 0, 1, 1], [], []>} : vector<24x16xf32>, vector<16x64xf32>, vector<24x64xf32> -> vector<24x64xf32>
    %49 = arith.addf %44, %48 : vector<24x64xf32>
    %50 = vector.extract_strided_slice %43 {offsets = [0, 0], sizes = [24, 16], strides = [1, 1]} : vector<192x16xf32> to vector<24x16xf32>
    %c0_30 = arith.constant 0 : index
    %c0_31 = arith.constant 0 : index
    %c0_32 = arith.constant 0 : index
    %51 = vector.load %arg8[%c0_30, %c0_31, %c0_32] : memref<8x16x64xf32, #tpu.memory_space<vmem>>, vector<1x16x64xf32>
    %52 = vector.shape_cast %51 : vector<1x16x64xf32> to vector<16x64xf32>
    %cst_33 = arith.constant dense<0.000000e+00> : vector<24x64xf32>
    %53 = tpu.matmul %50, %52, %cst_33 {dimension_numbers = #tpu.dot_dimension_numbers<[1], [0], [0], [1], [0, 0, 1, 1], [], []>} : vector<24x16xf32>, vector<16x64xf32>, vector<24x64xf32> -> vector<24x64xf32>
    %54 = arith.addf %49, %53 : vector<24x64xf32>
    %55 = vector.extract_strided_slice %41 {offsets = [24, 0], sizes = [24, 16], strides = [1, 1]} : vector<192x16xf32> to vector<24x16xf32>
    %c1_34 = arith.constant 1 : index
    %c0_35 = arith.constant 0 : index
    %c0_36 = arith.constant 0 : index
    %56 = vector.load %arg7[%c1_34, %c0_35, %c0_36] : memref<8x16x64xf32, #tpu.memory_space<vmem>>, vector<1x16x64xf32>
    %57 = vector.shape_cast %56 : vector<1x16x64xf32> to vector<16x64xf32>
    %cst_37 = arith.constant dense<0.000000e+00> : vector<24x64xf32>
    %58 = tpu.matmul %55, %57, %cst_37 {dimension_numbers = #tpu.dot_dimension_numbers<[1], [0], [0], [1], [0, 0, 1, 1], [], []>} : vector<24x16xf32>, vector<16x64xf32>, vector<24x64xf32> -> vector<24x64xf32>
    %59 = arith.addf %54, %58 : vector<24x64xf32>
    %60 = vector.extract_strided_slice %43 {offsets = [24, 0], sizes = [24, 16], strides = [1, 1]} : vector<192x16xf32> to vector<24x16xf32>
    %c1_38 = arith.constant 1 : index
    %c0_39 = arith.constant 0 : index
    %c0_40 = arith.constant 0 : index
    %61 = vector.load %arg8[%c1_38, %c0_39, %c0_40] : memref<8x16x64xf32, #tpu.memory_space<vmem>>, vector<1x16x64xf32>
    %62 = vector.shape_cast %61 : vector<1x16x64xf32> to vector<16x64xf32>
    %cst_41 = arith.constant dense<0.000000e+00> : vector<24x64xf32>
    %63 = tpu.matmul %60, %62, %cst_41 {dimension_numbers = #tpu.dot_dimension_numbers<[1], [0], [0], [1], [0, 0, 1, 1], [], []>} : vector<24x16xf32>, vector<16x64xf32>, vector<24x64xf32> -> vector<24x64xf32>
    %64 = arith.addf %59, %63 : vector<24x64xf32>
    %65 = vector.extract_strided_slice %41 {offsets = [48, 0], sizes = [24, 16], strides = [1, 1]} : vector<192x16xf32> to vector<24x16xf32>
    %c2 = arith.constant 2 : index
    %c0_42 = arith.constant 0 : index
    %c0_43 = arith.constant 0 : index
    %66 = vector.load %arg7[%c2, %c0_42, %c0_43] : memref<8x16x64xf32, #tpu.memory_space<vmem>>, vector<1x16x64xf32>
    %67 = vector.shape_cast %66 : vector<1x16x64xf32> to vector<16x64xf32>
    %cst_44 = arith.constant dense<0.000000e+00> : vector<24x64xf32>
    %68 = tpu.matmul %65, %67, %cst_44 {dimension_numbers = #tpu.dot_dimension_numbers<[1], [0], [0], [1], [0, 0, 1, 1], [], []>} : vector<24x16xf32>, vector<16x64xf32>, vector<24x64xf32> -> vector<24x64xf32>
    %69 = arith.addf %64, %68 : vector<24x64xf32>
    %70 = vector.extract_strided_slice %43 {offsets = [48, 0], sizes = [24, 16], strides = [1, 1]} : vector<192x16xf32> to vector<24x16xf32>
    %c2_45 = arith.constant 2 : index
    %c0_46 = arith.constant 0 : index
    %c0_47 = arith.constant 0 : index
    %71 = vector.load %arg8[%c2_45, %c0_46, %c0_47] : memref<8x16x64xf32, #tpu.memory_space<vmem>>, vector<1x16x64xf32>
    %72 = vector.shape_cast %71 : vector<1x16x64xf32> to vector<16x64xf32>
    %cst_48 = arith.constant dense<0.000000e+00> : vector<24x64xf32>
    %73 = tpu.matmul %70, %72, %cst_48 {dimension_numbers = #tpu.dot_dimension_numbers<[1], [0], [0], [1], [0, 0, 1, 1], [], []>} : vector<24x16xf32>, vector<16x64xf32>, vector<24x64xf32> -> vector<24x64xf32>
    %74 = arith.addf %69, %73 : vector<24x64xf32>
    %75 = vector.extract_strided_slice %41 {offsets = [72, 0], sizes = [24, 16], strides = [1, 1]} : vector<192x16xf32> to vector<24x16xf32>
    %c3 = arith.constant 3 : index
    %c0_49 = arith.constant 0 : index
    %c0_50 = arith.constant 0 : index
    %76 = vector.load %arg7[%c3, %c0_49, %c0_50] : memref<8x16x64xf32, #tpu.memory_space<vmem>>, vector<1x16x64xf32>
    %77 = vector.shape_cast %76 : vector<1x16x64xf32> to vector<16x64xf32>
    %cst_51 = arith.constant dense<0.000000e+00> : vector<24x64xf32>
    %78 = tpu.matmul %75, %77, %cst_51 {dimension_numbers = #tpu.dot_dimension_numbers<[1], [0], [0], [1], [0, 0, 1, 1], [], []>} : vector<24x16xf32>, vector<16x64xf32>, vector<24x64xf32> -> vector<24x64xf32>
    %79 = arith.addf %74, %78 : vector<24x64xf32>
    %80 = vector.extract_strided_slice %43 {offsets = [72, 0], sizes = [24, 16], strides = [1, 1]} : vector<192x16xf32> to vector<24x16xf32>
    %c3_52 = arith.constant 3 : index
    %c0_53 = arith.constant 0 : index
    %c0_54 = arith.constant 0 : index
    %81 = vector.load %arg8[%c3_52, %c0_53, %c0_54] : memref<8x16x64xf32, #tpu.memory_space<vmem>>, vector<1x16x64xf32>
    %82 = vector.shape_cast %81 : vector<1x16x64xf32> to vector<16x64xf32>
    %cst_55 = arith.constant dense<0.000000e+00> : vector<24x64xf32>
    %83 = tpu.matmul %80, %82, %cst_55 {dimension_numbers = #tpu.dot_dimension_numbers<[1], [0], [0], [1], [0, 0, 1, 1], [], []>} : vector<24x16xf32>, vector<16x64xf32>, vector<24x64xf32> -> vector<24x64xf32>
    %84 = arith.addf %79, %83 : vector<24x64xf32>
    %85 = vector.extract_strided_slice %41 {offsets = [96, 0], sizes = [24, 16], strides = [1, 1]} : vector<192x16xf32> to vector<24x16xf32>
    %c4 = arith.constant 4 : index
    %c0_56 = arith.constant 0 : index
    %c0_57 = arith.constant 0 : index
    %86 = vector.load %arg7[%c4, %c0_56, %c0_57] : memref<8x16x64xf32, #tpu.memory_space<vmem>>, vector<1x16x64xf32>
    %87 = vector.shape_cast %86 : vector<1x16x64xf32> to vector<16x64xf32>
    %cst_58 = arith.constant dense<0.000000e+00> : vector<24x64xf32>
    %88 = tpu.matmul %85, %87, %cst_58 {dimension_numbers = #tpu.dot_dimension_numbers<[1], [0], [0], [1], [0, 0, 1, 1], [], []>} : vector<24x16xf32>, vector<16x64xf32>, vector<24x64xf32> -> vector<24x64xf32>
    %89 = arith.addf %84, %88 : vector<24x64xf32>
    %90 = vector.extract_strided_slice %43 {offsets = [96, 0], sizes = [24, 16], strides = [1, 1]} : vector<192x16xf32> to vector<24x16xf32>
    %c4_59 = arith.constant 4 : index
    %c0_60 = arith.constant 0 : index
    %c0_61 = arith.constant 0 : index
    %91 = vector.load %arg8[%c4_59, %c0_60, %c0_61] : memref<8x16x64xf32, #tpu.memory_space<vmem>>, vector<1x16x64xf32>
    %92 = vector.shape_cast %91 : vector<1x16x64xf32> to vector<16x64xf32>
    %cst_62 = arith.constant dense<0.000000e+00> : vector<24x64xf32>
    %93 = tpu.matmul %90, %92, %cst_62 {dimension_numbers = #tpu.dot_dimension_numbers<[1], [0], [0], [1], [0, 0, 1, 1], [], []>} : vector<24x16xf32>, vector<16x64xf32>, vector<24x64xf32> -> vector<24x64xf32>
    %94 = arith.addf %89, %93 : vector<24x64xf32>
    %95 = vector.extract_strided_slice %41 {offsets = [120, 0], sizes = [24, 16], strides = [1, 1]} : vector<192x16xf32> to vector<24x16xf32>
    %c5 = arith.constant 5 : index
    %c0_63 = arith.constant 0 : index
    %c0_64 = arith.constant 0 : index
    %96 = vector.load %arg7[%c5, %c0_63, %c0_64] : memref<8x16x64xf32, #tpu.memory_space<vmem>>, vector<1x16x64xf32>
    %97 = vector.shape_cast %96 : vector<1x16x64xf32> to vector<16x64xf32>
    %cst_65 = arith.constant dense<0.000000e+00> : vector<24x64xf32>
    %98 = tpu.matmul %95, %97, %cst_65 {dimension_numbers = #tpu.dot_dimension_numbers<[1], [0], [0], [1], [0, 0, 1, 1], [], []>} : vector<24x16xf32>, vector<16x64xf32>, vector<24x64xf32> -> vector<24x64xf32>
    %99 = arith.addf %94, %98 : vector<24x64xf32>
    %100 = vector.extract_strided_slice %43 {offsets = [120, 0], sizes = [24, 16], strides = [1, 1]} : vector<192x16xf32> to vector<24x16xf32>
    %c5_66 = arith.constant 5 : index
    %c0_67 = arith.constant 0 : index
    %c0_68 = arith.constant 0 : index
    %101 = vector.load %arg8[%c5_66, %c0_67, %c0_68] : memref<8x16x64xf32, #tpu.memory_space<vmem>>, vector<1x16x64xf32>
    %102 = vector.shape_cast %101 : vector<1x16x64xf32> to vector<16x64xf32>
    %cst_69 = arith.constant dense<0.000000e+00> : vector<24x64xf32>
    %103 = tpu.matmul %100, %102, %cst_69 {dimension_numbers = #tpu.dot_dimension_numbers<[1], [0], [0], [1], [0, 0, 1, 1], [], []>} : vector<24x16xf32>, vector<16x64xf32>, vector<24x64xf32> -> vector<24x64xf32>
    %104 = arith.addf %99, %103 : vector<24x64xf32>
    %105 = vector.extract_strided_slice %41 {offsets = [144, 0], sizes = [24, 16], strides = [1, 1]} : vector<192x16xf32> to vector<24x16xf32>
    %c6 = arith.constant 6 : index
    %c0_70 = arith.constant 0 : index
    %c0_71 = arith.constant 0 : index
    %106 = vector.load %arg7[%c6, %c0_70, %c0_71] : memref<8x16x64xf32, #tpu.memory_space<vmem>>, vector<1x16x64xf32>
    %107 = vector.shape_cast %106 : vector<1x16x64xf32> to vector<16x64xf32>
    %cst_72 = arith.constant dense<0.000000e+00> : vector<24x64xf32>
    %108 = tpu.matmul %105, %107, %cst_72 {dimension_numbers = #tpu.dot_dimension_numbers<[1], [0], [0], [1], [0, 0, 1, 1], [], []>} : vector<24x16xf32>, vector<16x64xf32>, vector<24x64xf32> -> vector<24x64xf32>
    %109 = arith.addf %104, %108 : vector<24x64xf32>
    %110 = vector.extract_strided_slice %43 {offsets = [144, 0], sizes = [24, 16], strides = [1, 1]} : vector<192x16xf32> to vector<24x16xf32>
    %c6_73 = arith.constant 6 : index
    %c0_74 = arith.constant 0 : index
    %c0_75 = arith.constant 0 : index
    %111 = vector.load %arg8[%c6_73, %c0_74, %c0_75] : memref<8x16x64xf32, #tpu.memory_space<vmem>>, vector<1x16x64xf32>
    %112 = vector.shape_cast %111 : vector<1x16x64xf32> to vector<16x64xf32>
    %cst_76 = arith.constant dense<0.000000e+00> : vector<24x64xf32>
    %113 = tpu.matmul %110, %112, %cst_76 {dimension_numbers = #tpu.dot_dimension_numbers<[1], [0], [0], [1], [0, 0, 1, 1], [], []>} : vector<24x16xf32>, vector<16x64xf32>, vector<24x64xf32> -> vector<24x64xf32>
    %114 = arith.addf %109, %113 : vector<24x64xf32>
    %115 = vector.extract_strided_slice %41 {offsets = [168, 0], sizes = [24, 16], strides = [1, 1]} : vector<192x16xf32> to vector<24x16xf32>
    %c7 = arith.constant 7 : index
    %c0_77 = arith.constant 0 : index
    %c0_78 = arith.constant 0 : index
    %116 = vector.load %arg7[%c7, %c0_77, %c0_78] : memref<8x16x64xf32, #tpu.memory_space<vmem>>, vector<1x16x64xf32>
    %117 = vector.shape_cast %116 : vector<1x16x64xf32> to vector<16x64xf32>
    %cst_79 = arith.constant dense<0.000000e+00> : vector<24x64xf32>
    %118 = tpu.matmul %115, %117, %cst_79 {dimension_numbers = #tpu.dot_dimension_numbers<[1], [0], [0], [1], [0, 0, 1, 1], [], []>} : vector<24x16xf32>, vector<16x64xf32>, vector<24x64xf32> -> vector<24x64xf32>
    %119 = arith.addf %114, %118 : vector<24x64xf32>
    %120 = vector.extract_strided_slice %43 {offsets = [168, 0], sizes = [24, 16], strides = [1, 1]} : vector<192x16xf32> to vector<24x16xf32>
    %c7_80 = arith.constant 7 : index
    %c0_81 = arith.constant 0 : index
    %c0_82 = arith.constant 0 : index
    %121 = vector.load %arg8[%c7_80, %c0_81, %c0_82] : memref<8x16x64xf32, #tpu.memory_space<vmem>>, vector<1x16x64xf32>
    %122 = vector.shape_cast %121 : vector<1x16x64xf32> to vector<16x64xf32>
    %cst_83 = arith.constant dense<0.000000e+00> : vector<24x64xf32>
    %123 = tpu.matmul %120, %122, %cst_83 {dimension_numbers = #tpu.dot_dimension_numbers<[1], [0], [0], [1], [0, 0, 1, 1], [], []>} : vector<24x16xf32>, vector<16x64xf32>, vector<24x64xf32> -> vector<24x64xf32>
    %124 = arith.addf %119, %123 : vector<24x64xf32>
    %125 = vector.extract_strided_slice %124 {offsets = [0, 0], sizes = [18, 64], strides = [1, 1]} : vector<24x64xf32> to vector<18x64xf32>
    %c0_84 = arith.constant 0 : index
    %c0_85 = arith.constant 0 : index
    %126 = vector.load %arg9[%c0_84, %c0_85] : memref<1x64xf32, #tpu.memory_space<vmem>>, vector<1x64xf32>
    %127 = vector.broadcast %126 : vector<1x64xf32> to vector<18x64xf32>
    %128 = arith.addf %125, %127 : vector<18x64xf32>
    %c0_86 = arith.constant 0 : index
    %c0_87 = arith.constant 0 : index
    %129 = vector.load %arg21[%c0_86, %c0_87] : memref<144x18xf32, #tpu.memory_space<vmem>>, vector<144x18xf32>
    %c0_88 = arith.constant 0 : index
    %c0_89 = arith.constant 0 : index
    %130 = vector.load %arg22[%c0_88, %c0_89] : memref<18x144xf32, #tpu.memory_space<vmem>>, vector<18x144xf32>
    %c0_90 = arith.constant 0 : index
    %c0_91 = arith.constant 0 : index
    %131 = vector.load %arg23[%c0_90, %c0_91] : memref<144x8xf32, #tpu.memory_space<vmem>>, vector<144x8xf32>
    %c0_92 = arith.constant 0 : index
    %c0_93 = arith.constant 0 : index
    %132 = vector.load %arg24[%c0_92, %c0_93] : memref<8x144xf32, #tpu.memory_space<vmem>>, vector<8x144xf32>
    %c0_94 = arith.constant 0 : index
    %c0_95 = arith.constant 0 : index
    %c0_96 = arith.constant 0 : index
    %133 = vector.load %arg11[%c0_94, %c0_95, %c0_96] : memref<2x64x256xf32, #tpu.memory_space<vmem>>, vector<1x64x256xf32>
    %134 = vector.shape_cast %133 : vector<1x64x256xf32> to vector<64x256xf32>
    %cst_97 = arith.constant dense<0.000000e+00> : vector<18x256xf32>
    %135 = tpu.matmul %128, %134, %cst_97 {dimension_numbers = #tpu.dot_dimension_numbers<[1], [0], [0], [1], [0, 0, 1, 1], [], []>} : vector<18x64xf32>, vector<64x256xf32>, vector<18x256xf32> -> vector<18x256xf32>
    %136 = vector.extract_strided_slice %135 {offsets = [0, 0], sizes = [18, 128], strides = [1, 1]} : vector<18x256xf32> to vector<18x128xf32>
    %137 = vector.extract_strided_slice %135 {offsets = [0, 128], sizes = [18, 128], strides = [1, 1]} : vector<18x256xf32> to vector<18x128xf32>
    %c0_98 = arith.constant 0 : index
    %c0_99 = arith.constant 0 : index
    %c0_100 = arith.constant 0 : index
    %138 = vector.load %arg12[%c0_98, %c0_99, %c0_100] : memref<2x4x128xf32, #tpu.memory_space<vmem>>, vector<1x4x128xf32>
    %139 = vector.shape_cast %138 : vector<1x4x128xf32> to vector<4x128xf32>
    %c0_101 = arith.constant 0 : index
    %c0_102 = arith.constant 0 : index
    %c0_103 = arith.constant 0 : index
    %140 = vector.load %arg13[%c0_101, %c0_102, %c0_103] : memref<2x1x128xf32, #tpu.memory_space<vmem>>, vector<1x1x128xf32>
    %141 = vector.shape_cast %140 : vector<1x1x128xf32> to vector<1x128xf32>
    %142 = vector.extract_strided_slice %139 {offsets = [3, 0], sizes = [1, 128], strides = [1, 1]} : vector<4x128xf32> to vector<1x128xf32>
    %143 = vector.broadcast %142 : vector<1x128xf32> to vector<18x128xf32>
    %144 = arith.mulf %136, %143 : vector<18x128xf32>
    %145 = vector.broadcast %141 : vector<1x128xf32> to vector<18x128xf32>
    %146 = arith.addf %145, %144 : vector<18x128xf32>
    %c0_104 = arith.constant 0 : index
    %c0_105 = arith.constant 0 : index
    %c0_106 = arith.constant 0 : index
    %147 = vector.load %arg10[%c0_104, %c0_105, %c0_106] : memref<3x18x18xf32, #tpu.memory_space<vmem>>, vector<1x18x18xf32>
    %148 = vector.shape_cast %147 : vector<1x18x18xf32> to vector<18x18xf32>
    %cst_107 = arith.constant dense<0.000000e+00> : vector<18x128xf32>
    %149 = tpu.matmul %148, %136, %cst_107 {dimension_numbers = #tpu.dot_dimension_numbers<[1], [0], [0], [1], [0, 0, 1, 1], [], []>} : vector<18x18xf32>, vector<18x128xf32>, vector<18x128xf32> -> vector<18x128xf32>
    %150 = vector.extract_strided_slice %139 {offsets = [2, 0], sizes = [1, 128], strides = [1, 1]} : vector<4x128xf32> to vector<1x128xf32>
    %151 = vector.broadcast %150 : vector<1x128xf32> to vector<18x128xf32>
    %152 = arith.mulf %149, %151 : vector<18x128xf32>
    %153 = arith.addf %146, %152 : vector<18x128xf32>
    %c1_108 = arith.constant 1 : index
    %c0_109 = arith.constant 0 : index
    %c0_110 = arith.constant 0 : index
    %154 = vector.load %arg10[%c1_108, %c0_109, %c0_110] : memref<3x18x18xf32, #tpu.memory_space<vmem>>, vector<1x18x18xf32>
    %155 = vector.shape_cast %154 : vector<1x18x18xf32> to vector<18x18xf32>
    %cst_111 = arith.constant dense<0.000000e+00> : vector<18x128xf32>
    %156 = tpu.matmul %155, %136, %cst_111 {dimension_numbers = #tpu.dot_dimension_numbers<[1], [0], [0], [1], [0, 0, 1, 1], [], []>} : vector<18x18xf32>, vector<18x128xf32>, vector<18x128xf32> -> vector<18x128xf32>
    %157 = vector.extract_strided_slice %139 {offsets = [1, 0], sizes = [1, 128], strides = [1, 1]} : vector<4x128xf32> to vector<1x128xf32>
    %158 = vector.broadcast %157 : vector<1x128xf32> to vector<18x128xf32>
    %159 = arith.mulf %156, %158 : vector<18x128xf32>
    %160 = arith.addf %153, %159 : vector<18x128xf32>
    %c2_112 = arith.constant 2 : index
    %c0_113 = arith.constant 0 : index
    %c0_114 = arith.constant 0 : index
    %161 = vector.load %arg10[%c2_112, %c0_113, %c0_114] : memref<3x18x18xf32, #tpu.memory_space<vmem>>, vector<1x18x18xf32>
    %162 = vector.shape_cast %161 : vector<1x18x18xf32> to vector<18x18xf32>
    %cst_115 = arith.constant dense<0.000000e+00> : vector<18x128xf32>
    %163 = tpu.matmul %162, %136, %cst_115 {dimension_numbers = #tpu.dot_dimension_numbers<[1], [0], [0], [1], [0, 0, 1, 1], [], []>} : vector<18x18xf32>, vector<18x128xf32>, vector<18x128xf32> -> vector<18x128xf32>
    %164 = vector.extract_strided_slice %139 {offsets = [0, 0], sizes = [1, 128], strides = [1, 1]} : vector<4x128xf32> to vector<1x128xf32>
    %165 = vector.broadcast %164 : vector<1x128xf32> to vector<18x128xf32>
    %166 = arith.mulf %163, %165 : vector<18x128xf32>
    %167 = arith.addf %160, %166 : vector<18x128xf32>
    %cst_116 = arith.constant 0.000000e+00 : f32
    %168 = vector.broadcast %cst_116 : f32 to vector<18x128xf32>
    %169 = arith.subf %168, %167 : vector<18x128xf32>
    %170 = math.exp %169 : vector<18x128xf32>
    %cst_117 = arith.constant 1.000000e+00 : f32
    %171 = vector.broadcast %cst_117 : f32 to vector<18x128xf32>
    %172 = arith.addf %171, %170 : vector<18x128xf32>
    %173 = tpu.reciprocal %172 {approx = true} : vector<18x128xf32> -> vector<18x128xf32>
    %174 = arith.mulf %167, %173 : vector<18x128xf32>
    %c0_118 = arith.constant 0 : index
    %c0_119 = arith.constant 0 : index
    %c0_120 = arith.constant 0 : index
    %175 = vector.load %arg14[%c0_118, %c0_119, %c0_120] : memref<2x128x128xf32, #tpu.memory_space<vmem>>, vector<1x128x128xf32>
    %176 = vector.shape_cast %175 : vector<1x128x128xf32> to vector<128x128xf32>
    %cst_121 = arith.constant dense<0.000000e+00> : vector<18x128xf32>
    %177 = tpu.matmul %174, %176, %cst_121 {dimension_numbers = #tpu.dot_dimension_numbers<[1], [0], [0], [1], [0, 0, 1, 1], [], []>} : vector<18x128xf32>, vector<128x128xf32>, vector<18x128xf32> -> vector<18x128xf32>
    %c0_122 = arith.constant 0 : index
    %c0_123 = arith.constant 0 : index
    %c0_124 = arith.constant 0 : index
    %178 = vector.load %arg15[%c0_122, %c0_123, %c0_124] : memref<2x1x128xf32, #tpu.memory_space<vmem>>, vector<1x1x128xf32>
    %179 = vector.shape_cast %178 : vector<1x1x128xf32> to vector<1x128xf32>
    %180 = vector.broadcast %179 : vector<1x128xf32> to vector<18x128xf32>
    %181 = arith.addf %177, %180 : vector<18x128xf32>
    %cst_125 = arith.constant 0.000000e+00 : f32
    %182 = vector.broadcast %cst_125 : f32 to vector<18x128xf32>
    %183 = arith.maximumf %181, %182 : vector<18x128xf32>
    %184 = math.absf %181 : vector<18x128xf32>
    %cst_126 = arith.constant 0.000000e+00 : f32
    %185 = vector.broadcast %cst_126 : f32 to vector<18x128xf32>
    %186 = arith.subf %185, %184 : vector<18x128xf32>
    %187 = math.exp %186 : vector<18x128xf32>
    %cst_127 = arith.constant 1.000000e+00 : f32
    %188 = vector.broadcast %cst_127 : f32 to vector<18x128xf32>
    %189 = arith.addf %188, %187 : vector<18x128xf32>
    %190 = math.log %189 : vector<18x128xf32>
    %191 = arith.addf %183, %190 : vector<18x128xf32>
    %192 = arith.mulf %191, %174 : vector<18x128xf32>
    %cst_128 = arith.constant dense<0.000000e+00> : vector<144x128xf32>
    %193 = tpu.matmul %129, %191, %cst_128 {dimension_numbers = #tpu.dot_dimension_numbers<[1], [0], [0], [1], [0, 0, 1, 1], [], []>} : vector<144x18xf32>, vector<18x128xf32>, vector<144x128xf32> -> vector<144x128xf32>
    %c0_129 = arith.constant 0 : index
    %c0_130 = arith.constant 0 : index
    %c0_131 = arith.constant 0 : index
    %194 = vector.load %arg18[%c0_129, %c0_130, %c0_131] : memref<2x8x128xf32, #tpu.memory_space<vmem>>, vector<1x8x128xf32>
    %195 = vector.shape_cast %194 : vector<1x8x128xf32> to vector<8x128xf32>
    %cst_132 = arith.constant dense<0.000000e+00> : vector<144x128xf32>
    %196 = tpu.matmul %131, %195, %cst_132 {dimension_numbers = #tpu.dot_dimension_numbers<[1], [0], [0], [1], [0, 0, 1, 1], [], []>} : vector<144x8xf32>, vector<8x128xf32>, vector<144x128xf32> -> vector<144x128xf32>
    %197 = arith.mulf %196, %193 : vector<144x128xf32>
    %198 = math.exp %197 : vector<144x128xf32>
    %c0_133 = arith.constant 0 : index
    %c0_134 = arith.constant 0 : index
    %c0_135 = arith.constant 0 : index
    %199 = vector.load %arg16[%c0_133, %c0_134, %c0_135] : memref<2x8x128xf32, #tpu.memory_space<vmem>>, vector<1x8x128xf32>
    %200 = vector.shape_cast %199 : vector<1x8x128xf32> to vector<8x128xf32>
    %cst_136 = arith.constant dense<0.000000e+00> : vector<8x18xf32>
    %201 = tpu.matmul %200, %174, %cst_136 {dimension_numbers = #tpu.dot_dimension_numbers<[1], [1], [0], [0], [0, 0, 1, 0], [], []>} : vector<8x128xf32>, vector<18x128xf32>, vector<8x18xf32> -> vector<8x18xf32>
    %cst_137 = arith.constant dense<0.000000e+00> : vector<144x18xf32>
    %202 = tpu.matmul %131, %201, %cst_137 {dimension_numbers = #tpu.dot_dimension_numbers<[1], [0], [0], [1], [0, 0, 1, 1], [], []>} : vector<144x8xf32>, vector<8x18xf32>, vector<144x18xf32> -> vector<144x18xf32>
    %203 = arith.mulf %129, %202 : vector<144x18xf32>
    %cst_138 = arith.constant dense<0.000000e+00> : vector<144x128xf32>
    %204 = tpu.matmul %203, %192, %cst_138 {dimension_numbers = #tpu.dot_dimension_numbers<[1], [0], [0], [1], [0, 0, 1, 1], [], []>} : vector<144x18xf32>, vector<18x128xf32>, vector<144x128xf32> -> vector<144x128xf32>
    %c0_139 = arith.constant 0 : index
    %c0_140 = arith.constant 0 : index
    %c0_141 = arith.constant 0 : index
    %205 = vector.load %arg17[%c0_139, %c0_140, %c0_141] : memref<2x128x8xf32, #tpu.memory_space<vmem>>, vector<1x128x8xf32>
    %206 = vector.shape_cast %205 : vector<1x128x8xf32> to vector<128x8xf32>
    %cst_142 = arith.constant dense<0.000000e+00> : vector<18x8xf32>
    %207 = tpu.matmul %174, %206, %cst_142 {dimension_numbers = #tpu.dot_dimension_numbers<[1], [0], [0], [1], [0, 0, 1, 1], [], []>} : vector<18x128xf32>, vector<128x8xf32>, vector<18x8xf32> -> vector<18x8xf32>
    %cst_143 = arith.constant dense<0.000000e+00> : vector<18x144xf32>
    %208 = tpu.matmul %207, %132, %cst_143 {dimension_numbers = #tpu.dot_dimension_numbers<[1], [0], [0], [1], [0, 0, 1, 1], [], []>} : vector<18x8xf32>, vector<8x144xf32>, vector<18x144xf32> -> vector<18x144xf32>
    %209 = arith.mulf %130, %208 : vector<18x144xf32>
    %cst_144 = arith.constant 0.000000e+00 : f32
    %210 = vector.broadcast %cst_144 : f32 to vector<8x128xf32>
    %211 = vector.extract_strided_slice %198 {offsets = [0, 0], sizes = [8, 128], strides = [1, 1]} : vector<144x128xf32> to vector<8x128xf32>
    %212 = arith.mulf %211, %210 : vector<8x128xf32>
    %213 = vector.extract_strided_slice %204 {offsets = [0, 0], sizes = [8, 128], strides = [1, 1]} : vector<144x128xf32> to vector<8x128xf32>
    %214 = arith.addf %212, %213 : vector<8x128xf32>
    %c0_145 = arith.constant 0 : index
    %c0_146 = arith.constant 0 : index
    %215 = vector.load %arg28[%c0_145, %c0_146] : memref<144x128xf32, #tpu.memory_space<vmem>>, vector<8x128xf32>
    tpu.vector_store %arg28[%c0_145, %c0_146], %214 {strides = array<i32>} : memref<144x128xf32, #tpu.memory_space<vmem>>, vector<8x128xf32>,
    %216 = vector.extract_strided_slice %198 {offsets = [8, 0], sizes = [8, 128], strides = [1, 1]} : vector<144x128xf32> to vector<8x128xf32>
    %217 = arith.mulf %216, %214 : vector<8x128xf32>
    %218 = vector.extract_strided_slice %204 {offsets = [8, 0], sizes = [8, 128], strides = [1, 1]} : vector<144x128xf32> to vector<8x128xf32>
    %219 = arith.addf %217, %218 : vector<8x128xf32>
    %c8 = arith.constant 8 : index
    %c0_147 = arith.constant 0 : index
    %220 = vector.load %arg28[%c8, %c0_147] : memref<144x128xf32, #tpu.memory_space<vmem>>, vector<8x128xf32>
    tpu.vector_store %arg28[%c8, %c0_147], %219 {strides = array<i32>} : memref<144x128xf32, #tpu.memory_space<vmem>>, vector<8x128xf32>,
    %221 = vector.extract_strided_slice %198 {offsets = [16, 0], sizes = [8, 128], strides = [1, 1]} : vector<144x128xf32> to vector<8x128xf32>
    %222 = arith.mulf %221, %219 : vector<8x128xf32>
    %223 = vector.extract_strided_slice %204 {offsets = [16, 0], sizes = [8, 128], strides = [1, 1]} : vector<144x128xf32> to vector<8x128xf32>
    %224 = arith.addf %222, %223 : vector<8x128xf32>
    %c16 = arith.constant 16 : index
    %c0_148 = arith.constant 0 : index
    %225 = vector.load %arg28[%c16, %c0_148] : memref<144x128xf32, #tpu.memory_space<vmem>>, vector<8x128xf32>
    tpu.vector_store %arg28[%c16, %c0_148], %224 {strides = array<i32>} : memref<144x128xf32, #tpu.memory_space<vmem>>, vector<8x128xf32>,
    %226 = vector.extract_strided_slice %198 {offsets = [24, 0], sizes = [8, 128], strides = [1, 1]} : vector<144x128xf32> to vector<8x128xf32>
    %227 = arith.mulf %226, %224 : vector<8x128xf32>
    %228 = vector.extract_strided_slice %204 {offsets = [24, 0], sizes = [8, 128], strides = [1, 1]} : vector<144x128xf32> to vector<8x128xf32>
    %229 = arith.addf %227, %228 : vector<8x128xf32>
    %c24 = arith.constant 24 : index
    %c0_149 = arith.constant 0 : index
    %230 = vector.load %arg28[%c24, %c0_149] : memref<144x128xf32, #tpu.memory_space<vmem>>, vector<8x128xf32>
    tpu.vector_store %arg28[%c24, %c0_149], %229 {strides = array<i32>} : memref<144x128xf32, #tpu.memory_space<vmem>>, vector<8x128xf32>,
    %231 = vector.extract_strided_slice %198 {offsets = [32, 0], sizes = [8, 128], strides = [1, 1]} : vector<144x128xf32> to vector<8x128xf32>
    %232 = arith.mulf %231, %229 : vector<8x128xf32>
    %233 = vector.extract_strided_slice %204 {offsets = [32, 0], sizes = [8, 128], strides = [1, 1]} : vector<144x128xf32> to vector<8x128xf32>
    %234 = arith.addf %232, %233 : vector<8x128xf32>
    %c32 = arith.constant 32 : index
    %c0_150 = arith.constant 0 : index
    %235 = vector.load %arg28[%c32, %c0_150] : memref<144x128xf32, #tpu.memory_space<vmem>>, vector<8x128xf32>
    tpu.vector_store %arg28[%c32, %c0_150], %234 {strides = array<i32>} : memref<144x128xf32, #tpu.memory_space<vmem>>, vector<8x128xf32>,
    %236 = vector.extract_strided_slice %198 {offsets = [40, 0], sizes = [8, 128], strides = [1, 1]} : vector<144x128xf32> to vector<8x128xf32>
    %237 = arith.mulf %236, %234 : vector<8x128xf32>
    %238 = vector.extract_strided_slice %204 {offsets = [40, 0], sizes = [8, 128], strides = [1, 1]} : vector<144x128xf32> to vector<8x128xf32>
    %239 = arith.addf %237, %238 : vector<8x128xf32>
    %c40 = arith.constant 40 : index
    %c0_151 = arith.constant 0 : index
    %240 = vector.load %arg28[%c40, %c0_151] : memref<144x128xf32, #tpu.memory_space<vmem>>, vector<8x128xf32>
    tpu.vector_store %arg28[%c40, %c0_151], %239 {strides = array<i32>} : memref<144x128xf32, #tpu.memory_space<vmem>>, vector<8x128xf32>,
    %241 = vector.extract_strided_slice %198 {offsets = [48, 0], sizes = [8, 128], strides = [1, 1]} : vector<144x128xf32> to vector<8x128xf32>
    %242 = arith.mulf %241, %239 : vector<8x128xf32>
    %243 = vector.extract_strided_slice %204 {offsets = [48, 0], sizes = [8, 128], strides = [1, 1]} : vector<144x128xf32> to vector<8x128xf32>
    %244 = arith.addf %242, %243 : vector<8x128xf32>
    %c48 = arith.constant 48 : index
    %c0_152 = arith.constant 0 : index
    %245 = vector.load %arg28[%c48, %c0_152] : memref<144x128xf32, #tpu.memory_space<vmem>>, vector<8x128xf32>
    tpu.vector_store %arg28[%c48, %c0_152], %244 {strides = array<i32>} : memref<144x128xf32, #tpu.memory_space<vmem>>, vector<8x128xf32>,
    %246 = vector.extract_strided_slice %198 {offsets = [56, 0], sizes = [8, 128], strides = [1, 1]} : vector<144x128xf32> to vector<8x128xf32>
    %247 = arith.mulf %246, %244 : vector<8x128xf32>
    %248 = vector.extract_strided_slice %204 {offsets = [56, 0], sizes = [8, 128], strides = [1, 1]} : vector<144x128xf32> to vector<8x128xf32>
    %249 = arith.addf %247, %248 : vector<8x128xf32>
    %c56 = arith.constant 56 : index
    %c0_153 = arith.constant 0 : index
    %250 = vector.load %arg28[%c56, %c0_153] : memref<144x128xf32, #tpu.memory_space<vmem>>, vector<8x128xf32>
    tpu.vector_store %arg28[%c56, %c0_153], %249 {strides = array<i32>} : memref<144x128xf32, #tpu.memory_space<vmem>>, vector<8x128xf32>,
    %251 = vector.extract_strided_slice %198 {offsets = [64, 0], sizes = [8, 128], strides = [1, 1]} : vector<144x128xf32> to vector<8x128xf32>
    %252 = arith.mulf %251, %249 : vector<8x128xf32>
    %253 = vector.extract_strided_slice %204 {offsets = [64, 0], sizes = [8, 128], strides = [1, 1]} : vector<144x128xf32> to vector<8x128xf32>
    %254 = arith.addf %252, %253 : vector<8x128xf32>
    %c64 = arith.constant 64 : index
    %c0_154 = arith.constant 0 : index
    %255 = vector.load %arg28[%c64, %c0_154] : memref<144x128xf32, #tpu.memory_space<vmem>>, vector<8x128xf32>
    tpu.vector_store %arg28[%c64, %c0_154], %254 {strides = array<i32>} : memref<144x128xf32, #tpu.memory_space<vmem>>, vector<8x128xf32>,
    %cst_155 = arith.constant 0.000000e+00 : f32
    %256 = vector.broadcast %cst_155 : f32 to vector<8x128xf32>
    %257 = vector.extract_strided_slice %198 {offsets = [72, 0], sizes = [8, 128], strides = [1, 1]} : vector<144x128xf32> to vector<8x128xf32>
    %258 = arith.mulf %257, %256 : vector<8x128xf32>
    %259 = vector.extract_strided_slice %204 {offsets = [72, 0], sizes = [8, 128], strides = [1, 1]} : vector<144x128xf32> to vector<8x128xf32>
    %260 = arith.addf %258, %259 : vector<8x128xf32>
    %c72 = arith.constant 72 : index
    %c0_156 = arith.constant 0 : index
    %261 = vector.load %arg28[%c72, %c0_156] : memref<144x128xf32, #tpu.memory_space<vmem>>, vector<8x128xf32>
    tpu.vector_store %arg28[%c72, %c0_156], %260 {strides = array<i32>} : memref<144x128xf32, #tpu.memory_space<vmem>>, vector<8x128xf32>,
    %262 = vector.extract_strided_slice %198 {offsets = [80, 0], sizes = [8, 128], strides = [1, 1]} : vector<144x128xf32> to vector<8x128xf32>
    %263 = arith.mulf %262, %260 : vector<8x128xf32>
    %264 = vector.extract_strided_slice %204 {offsets = [80, 0], sizes = [8, 128], strides = [1, 1]} : vector<144x128xf32> to vector<8x128xf32>
    %265 = arith.addf %263, %264 : vector<8x128xf32>
    %c80 = arith.constant 80 : index
    %c0_157 = arith.constant 0 : index
    %266 = vector.load %arg28[%c80, %c0_157] : memref<144x128xf32, #tpu.memory_space<vmem>>, vector<8x128xf32>
    tpu.vector_store %arg28[%c80, %c0_157], %265 {strides = array<i32>} : memref<144x128xf32, #tpu.memory_space<vmem>>, vector<8x128xf32>,
    %267 = vector.extract_strided_slice %198 {offsets = [88, 0], sizes = [8, 128], strides = [1, 1]} : vector<144x128xf32> to vector<8x128xf32>
    %268 = arith.mulf %267, %265 : vector<8x128xf32>
    %269 = vector.extract_strided_slice %204 {offsets = [88, 0], sizes = [8, 128], strides = [1, 1]} : vector<144x128xf32> to vector<8x128xf32>
    %270 = arith.addf %268, %269 : vector<8x128xf32>
    %c88 = arith.constant 88 : index
    %c0_158 = arith.constant 0 : index
    %271 = vector.load %arg28[%c88, %c0_158] : memref<144x128xf32, #tpu.memory_space<vmem>>, vector<8x128xf32>
    tpu.vector_store %arg28[%c88, %c0_158], %270 {strides = array<i32>} : memref<144x128xf32, #tpu.memory_space<vmem>>, vector<8x128xf32>,
    %272 = vector.extract_strided_slice %198 {offsets = [96, 0], sizes = [8, 128], strides = [1, 1]} : vector<144x128xf32> to vector<8x128xf32>
    %273 = arith.mulf %272, %270 : vector<8x128xf32>
    %274 = vector.extract_strided_slice %204 {offsets = [96, 0], sizes = [8, 128], strides = [1, 1]} : vector<144x128xf32> to vector<8x128xf32>
    %275 = arith.addf %273, %274 : vector<8x128xf32>
    %c96 = arith.constant 96 : index
    %c0_159 = arith.constant 0 : index
    %276 = vector.load %arg28[%c96, %c0_159] : memref<144x128xf32, #tpu.memory_space<vmem>>, vector<8x128xf32>
    tpu.vector_store %arg28[%c96, %c0_159], %275 {strides = array<i32>} : memref<144x128xf32, #tpu.memory_space<vmem>>, vector<8x128xf32>,
    %277 = vector.extract_strided_slice %198 {offsets = [104, 0], sizes = [8, 128], strides = [1, 1]} : vector<144x128xf32> to vector<8x128xf32>
    %278 = arith.mulf %277, %275 : vector<8x128xf32>
    %279 = vector.extract_strided_slice %204 {offsets = [104, 0], sizes = [8, 128], strides = [1, 1]} : vector<144x128xf32> to vector<8x128xf32>
    %280 = arith.addf %278, %279 : vector<8x128xf32>
    %c104 = arith.constant 104 : index
    %c0_160 = arith.constant 0 : index
    %281 = vector.load %arg28[%c104, %c0_160] : memref<144x128xf32, #tpu.memory_space<vmem>>, vector<8x128xf32>
    tpu.vector_store %arg28[%c104, %c0_160], %280 {strides = array<i32>} : memref<144x128xf32, #tpu.memory_space<vmem>>, vector<8x128xf32>,
    %282 = vector.extract_strided_slice %198 {offsets = [112, 0], sizes = [8, 128], strides = [1, 1]} : vector<144x128xf32> to vector<8x128xf32>
    %283 = arith.mulf %282, %280 : vector<8x128xf32>
    %284 = vector.extract_strided_slice %204 {offsets = [112, 0], sizes = [8, 128], strides = [1, 1]} : vector<144x128xf32> to vector<8x128xf32>
    %285 = arith.addf %283, %284 : vector<8x128xf32>
    %c112 = arith.constant 112 : index
    %c0_161 = arith.constant 0 : index
    %286 = vector.load %arg28[%c112, %c0_161] : memref<144x128xf32, #tpu.memory_space<vmem>>, vector<8x128xf32>
    tpu.vector_store %arg28[%c112, %c0_161], %285 {strides = array<i32>} : memref<144x128xf32, #tpu.memory_space<vmem>>, vector<8x128xf32>,
    %287 = vector.extract_strided_slice %198 {offsets = [120, 0], sizes = [8, 128], strides = [1, 1]} : vector<144x128xf32> to vector<8x128xf32>
    %288 = arith.mulf %287, %285 : vector<8x128xf32>
    %289 = vector.extract_strided_slice %204 {offsets = [120, 0], sizes = [8, 128], strides = [1, 1]} : vector<144x128xf32> to vector<8x128xf32>
    %290 = arith.addf %288, %289 : vector<8x128xf32>
    %c120 = arith.constant 120 : index
    %c0_162 = arith.constant 0 : index
    %291 = vector.load %arg28[%c120, %c0_162] : memref<144x128xf32, #tpu.memory_space<vmem>>, vector<8x128xf32>
    tpu.vector_store %arg28[%c120, %c0_162], %290 {strides = array<i32>} : memref<144x128xf32, #tpu.memory_space<vmem>>, vector<8x128xf32>,
    %292 = vector.extract_strided_slice %198 {offsets = [128, 0], sizes = [8, 128], strides = [1, 1]} : vector<144x128xf32> to vector<8x128xf32>
    %293 = arith.mulf %292, %290 : vector<8x128xf32>
    %294 = vector.extract_strided_slice %204 {offsets = [128, 0], sizes = [8, 128], strides = [1, 1]} : vector<144x128xf32> to vector<8x128xf32>
    %295 = arith.addf %293, %294 : vector<8x128xf32>
    %c128 = arith.constant 128 : index
    %c0_163 = arith.constant 0 : index
    %296 = vector.load %arg28[%c128, %c0_163] : memref<144x128xf32, #tpu.memory_space<vmem>>, vector<8x128xf32>
    tpu.vector_store %arg28[%c128, %c0_163], %295 {strides = array<i32>} : memref<144x128xf32, #tpu.memory_space<vmem>>, vector<8x128xf32>,
    %297 = vector.extract_strided_slice %198 {offsets = [136, 0], sizes = [8, 128], strides = [1, 1]} : vector<144x128xf32> to vector<8x128xf32>
    %298 = arith.mulf %297, %295 : vector<8x128xf32>
    %299 = vector.extract_strided_slice %204 {offsets = [136, 0], sizes = [8, 128], strides = [1, 1]} : vector<144x128xf32> to vector<8x128xf32>
    %300 = arith.addf %298, %299 : vector<8x128xf32>
    %c136 = arith.constant 136 : index
    %c0_164 = arith.constant 0 : index
    %301 = vector.load %arg28[%c136, %c0_164] : memref<144x128xf32, #tpu.memory_space<vmem>>, vector<8x128xf32>
    tpu.vector_store %arg28[%c136, %c0_164], %300 {strides = array<i32>} : memref<144x128xf32, #tpu.memory_space<vmem>>, vector<8x128xf32>,
    %c0_165 = arith.constant 0 : index
    %c0_166 = arith.constant 0 : index
    %302 = vector.load %arg28[%c0_165, %c0_166] : memref<144x128xf32, #tpu.memory_space<vmem>>, vector<144x128xf32>
    %cst_167 = arith.constant dense<0.000000e+00> : vector<18x128xf32>
    %303 = tpu.matmul %209, %302, %cst_167 {dimension_numbers = #tpu.dot_dimension_numbers<[1], [0], [0], [1], [0, 0, 1, 1], [], []>} : vector<18x144xf32>, vector<144x128xf32>, vector<18x128xf32> -> vector<18x128xf32>
    %c0_168 = arith.constant 0 : index
    %c0_169 = arith.constant 0 : index
    %c0_170 = arith.constant 0 : index
    %304 = vector.load %arg19[%c0_168, %c0_169, %c0_170] : memref<2x1x128xf32, #tpu.memory_space<vmem>>, vector<1x1x128xf32>
    %305 = vector.shape_cast %304 : vector<1x1x128xf32> to vector<1x128xf32>
    %306 = vector.broadcast %305 : vector<1x128xf32> to vector<18x128xf32>
    %307 = arith.mulf %174, %306 : vector<18x128xf32>
    %308 = arith.addf %303, %307 : vector<18x128xf32>
    %cst_171 = arith.constant 0.000000e+00 : f32
    %309 = vector.broadcast %cst_171 : f32 to vector<18x128xf32>
    %310 = arith.subf %309, %137 : vector<18x128xf32>
    %311 = math.exp %310 : vector<18x128xf32>
    %cst_172 = arith.constant 1.000000e+00 : f32
    %312 = vector.broadcast %cst_172 : f32 to vector<18x128xf32>
    %313 = arith.addf %312, %311 : vector<18x128xf32>
    %314 = tpu.reciprocal %313 {approx = true} : vector<18x128xf32> -> vector<18x128xf32>
    %315 = arith.mulf %137, %314 : vector<18x128xf32>
    %316 = arith.mulf %308, %315 : vector<18x128xf32>
    %c0_173 = arith.constant 0 : index
    %c0_174 = arith.constant 0 : index
    %c0_175 = arith.constant 0 : index
    %317 = vector.load %arg20[%c0_173, %c0_174, %c0_175] : memref<2x128x64xf32, #tpu.memory_space<vmem>>, vector<1x128x64xf32>
    %318 = vector.shape_cast %317 : vector<1x128x64xf32> to vector<128x64xf32>
    %cst_176 = arith.constant dense<0.000000e+00> : vector<18x64xf32>
    %319 = tpu.matmul %316, %318, %cst_176 {dimension_numbers = #tpu.dot_dimension_numbers<[1], [0], [0], [1], [0, 0, 1, 1], [], []>} : vector<18x128xf32>, vector<128x64xf32>, vector<18x64xf32> -> vector<18x64xf32>
    %c1_177 = arith.constant 1 : index
    %c0_178 = arith.constant 0 : index
    %c0_179 = arith.constant 0 : index
    %320 = vector.load %arg11[%c1_177, %c0_178, %c0_179] : memref<2x64x256xf32, #tpu.memory_space<vmem>>, vector<1x64x256xf32>
    %321 = vector.shape_cast %320 : vector<1x64x256xf32> to vector<64x256xf32>
    %cst_180 = arith.constant dense<0.000000e+00> : vector<18x256xf32>
    %322 = tpu.matmul %319, %321, %cst_180 {dimension_numbers = #tpu.dot_dimension_numbers<[1], [0], [0], [1], [0, 0, 1, 1], [], []>} : vector<18x64xf32>, vector<64x256xf32>, vector<18x256xf32> -> vector<18x256xf32>
    %323 = vector.extract_strided_slice %322 {offsets = [0, 0], sizes = [18, 128], strides = [1, 1]} : vector<18x256xf32> to vector<18x128xf32>
    %324 = vector.extract_strided_slice %322 {offsets = [0, 128], sizes = [18, 128], strides = [1, 1]} : vector<18x256xf32> to vector<18x128xf32>
    %c1_181 = arith.constant 1 : index
    %c0_182 = arith.constant 0 : index
    %c0_183 = arith.constant 0 : index
    %325 = vector.load %arg12[%c1_181, %c0_182, %c0_183] : memref<2x4x128xf32, #tpu.memory_space<vmem>>, vector<1x4x128xf32>
    %326 = vector.shape_cast %325 : vector<1x4x128xf32> to vector<4x128xf32>
    %c1_184 = arith.constant 1 : index
    %c0_185 = arith.constant 0 : index
    %c0_186 = arith.constant 0 : index
    %327 = vector.load %arg13[%c1_184, %c0_185, %c0_186] : memref<2x1x128xf32, #tpu.memory_space<vmem>>, vector<1x1x128xf32>
    %328 = vector.shape_cast %327 : vector<1x1x128xf32> to vector<1x128xf32>
    %329 = vector.extract_strided_slice %326 {offsets = [3, 0], sizes = [1, 128], strides = [1, 1]} : vector<4x128xf32> to vector<1x128xf32>
    %330 = vector.broadcast %329 : vector<1x128xf32> to vector<18x128xf32>
    %331 = arith.mulf %323, %330 : vector<18x128xf32>
    %332 = vector.broadcast %328 : vector<1x128xf32> to vector<18x128xf32>
    %333 = arith.addf %332, %331 : vector<18x128xf32>
    %c0_187 = arith.constant 0 : index
    %c0_188 = arith.constant 0 : index
    %c0_189 = arith.constant 0 : index
    %334 = vector.load %arg10[%c0_187, %c0_188, %c0_189] : memref<3x18x18xf32, #tpu.memory_space<vmem>>, vector<1x18x18xf32>
    %335 = vector.shape_cast %334 : vector<1x18x18xf32> to vector<18x18xf32>
    %cst_190 = arith.constant dense<0.000000e+00> : vector<18x128xf32>
    %336 = tpu.matmul %335, %323, %cst_190 {dimension_numbers = #tpu.dot_dimension_numbers<[1], [0], [0], [1], [0, 0, 1, 1], [], []>} : vector<18x18xf32>, vector<18x128xf32>, vector<18x128xf32> -> vector<18x128xf32>
    %337 = vector.extract_strided_slice %326 {offsets = [2, 0], sizes = [1, 128], strides = [1, 1]} : vector<4x128xf32> to vector<1x128xf32>
    %338 = vector.broadcast %337 : vector<1x128xf32> to vector<18x128xf32>
    %339 = arith.mulf %336, %338 : vector<18x128xf32>
    %340 = arith.addf %333, %339 : vector<18x128xf32>
    %c1_191 = arith.constant 1 : index
    %c0_192 = arith.constant 0 : index
    %c0_193 = arith.constant 0 : index
    %341 = vector.load %arg10[%c1_191, %c0_192, %c0_193] : memref<3x18x18xf32, #tpu.memory_space<vmem>>, vector<1x18x18xf32>
    %342 = vector.shape_cast %341 : vector<1x18x18xf32> to vector<18x18xf32>
    %cst_194 = arith.constant dense<0.000000e+00> : vector<18x128xf32>
    %343 = tpu.matmul %342, %323, %cst_194 {dimension_numbers = #tpu.dot_dimension_numbers<[1], [0], [0], [1], [0, 0, 1, 1], [], []>} : vector<18x18xf32>, vector<18x128xf32>, vector<18x128xf32> -> vector<18x128xf32>
    %344 = vector.extract_strided_slice %326 {offsets = [1, 0], sizes = [1, 128], strides = [1, 1]} : vector<4x128xf32> to vector<1x128xf32>
    %345 = vector.broadcast %344 : vector<1x128xf32> to vector<18x128xf32>
    %346 = arith.mulf %343, %345 : vector<18x128xf32>
    %347 = arith.addf %340, %346 : vector<18x128xf32>
    %c2_195 = arith.constant 2 : index
    %c0_196 = arith.constant 0 : index
    %c0_197 = arith.constant 0 : index
    %348 = vector.load %arg10[%c2_195, %c0_196, %c0_197] : memref<3x18x18xf32, #tpu.memory_space<vmem>>, vector<1x18x18xf32>
    %349 = vector.shape_cast %348 : vector<1x18x18xf32> to vector<18x18xf32>
    %cst_198 = arith.constant dense<0.000000e+00> : vector<18x128xf32>
    %350 = tpu.matmul %349, %323, %cst_198 {dimension_numbers = #tpu.dot_dimension_numbers<[1], [0], [0], [1], [0, 0, 1, 1], [], []>} : vector<18x18xf32>, vector<18x128xf32>, vector<18x128xf32> -> vector<18x128xf32>
    %351 = vector.extract_strided_slice %326 {offsets = [0, 0], sizes = [1, 128], strides = [1, 1]} : vector<4x128xf32> to vector<1x128xf32>
    %352 = vector.broadcast %351 : vector<1x128xf32> to vector<18x128xf32>
    %353 = arith.mulf %350, %352 : vector<18x128xf32>
    %354 = arith.addf %347, %353 : vector<18x128xf32>
    %cst_199 = arith.constant 0.000000e+00 : f32
    %355 = vector.broadcast %cst_199 : f32 to vector<18x128xf32>
    %356 = arith.subf %355, %354 : vector<18x128xf32>
    %357 = math.exp %356 : vector<18x128xf32>
    %cst_200 = arith.constant 1.000000e+00 : f32
    %358 = vector.broadcast %cst_200 : f32 to vector<18x128xf32>
    %359 = arith.addf %358, %357 : vector<18x128xf32>
    %360 = tpu.reciprocal %359 {approx = true} : vector<18x128xf32> -> vector<18x128xf32>
    %361 = arith.mulf %354, %360 : vector<18x128xf32>
    %c1_201 = arith.constant 1 : index
    %c0_202 = arith.constant 0 : index
    %c0_203 = arith.constant 0 : index
    %362 = vector.load %arg14[%c1_201, %c0_202, %c0_203] : memref<2x128x128xf32, #tpu.memory_space<vmem>>, vector<1x128x128xf32>
    %363 = vector.shape_cast %362 : vector<1x128x128xf32> to vector<128x128xf32>
    %cst_204 = arith.constant dense<0.000000e+00> : vector<18x128xf32>
    %364 = tpu.matmul %361, %363, %cst_204 {dimension_numbers = #tpu.dot_dimension_numbers<[1], [0], [0], [1], [0, 0, 1, 1], [], []>} : vector<18x128xf32>, vector<128x128xf32>, vector<18x128xf32> -> vector<18x128xf32>
    %c1_205 = arith.constant 1 : index
    %c0_206 = arith.constant 0 : index
    %c0_207 = arith.constant 0 : index
    %365 = vector.load %arg15[%c1_205, %c0_206, %c0_207] : memref<2x1x128xf32, #tpu.memory_space<vmem>>, vector<1x1x128xf32>
    %366 = vector.shape_cast %365 : vector<1x1x128xf32> to vector<1x128xf32>
    %367 = vector.broadcast %366 : vector<1x128xf32> to vector<18x128xf32>
    %368 = arith.addf %364, %367 : vector<18x128xf32>
    %cst_208 = arith.constant 0.000000e+00 : f32
    %369 = vector.broadcast %cst_208 : f32 to vector<18x128xf32>
    %370 = arith.maximumf %368, %369 : vector<18x128xf32>
    %371 = math.absf %368 : vector<18x128xf32>
    %cst_209 = arith.constant 0.000000e+00 : f32
    %372 = vector.broadcast %cst_209 : f32 to vector<18x128xf32>
    %373 = arith.subf %372, %371 : vector<18x128xf32>
    %374 = math.exp %373 : vector<18x128xf32>
    %cst_210 = arith.constant 1.000000e+00 : f32
    %375 = vector.broadcast %cst_210 : f32 to vector<18x128xf32>
    %376 = arith.addf %375, %374 : vector<18x128xf32>
    %377 = math.log %376 : vector<18x128xf32>
    %378 = arith.addf %370, %377 : vector<18x128xf32>
    %379 = arith.mulf %378, %361 : vector<18x128xf32>
    %cst_211 = arith.constant dense<0.000000e+00> : vector<144x128xf32>
    %380 = tpu.matmul %129, %378, %cst_211 {dimension_numbers = #tpu.dot_dimension_numbers<[1], [0], [0], [1], [0, 0, 1, 1], [], []>} : vector<144x18xf32>, vector<18x128xf32>, vector<144x128xf32> -> vector<144x128xf32>
    %c1_212 = arith.constant 1 : index
    %c0_213 = arith.constant 0 : index
    %c0_214 = arith.constant 0 : index
    %381 = vector.load %arg18[%c1_212, %c0_213, %c0_214] : memref<2x8x128xf32, #tpu.memory_space<vmem>>, vector<1x8x128xf32>
    %382 = vector.shape_cast %381 : vector<1x8x128xf32> to vector<8x128xf32>
    %cst_215 = arith.constant dense<0.000000e+00> : vector<144x128xf32>
    %383 = tpu.matmul %131, %382, %cst_215 {dimension_numbers = #tpu.dot_dimension_numbers<[1], [0], [0], [1], [0, 0, 1, 1], [], []>} : vector<144x8xf32>, vector<8x128xf32>, vector<144x128xf32> -> vector<144x128xf32>
    %384 = arith.mulf %383, %380 : vector<144x128xf32>
    %385 = math.exp %384 : vector<144x128xf32>
    %c1_216 = arith.constant 1 : index
    %c0_217 = arith.constant 0 : index
    %c0_218 = arith.constant 0 : index
    %386 = vector.load %arg16[%c1_216, %c0_217, %c0_218] : memref<2x8x128xf32, #tpu.memory_space<vmem>>, vector<1x8x128xf32>
    %387 = vector.shape_cast %386 : vector<1x8x128xf32> to vector<8x128xf32>
    %cst_219 = arith.constant dense<0.000000e+00> : vector<8x18xf32>
    %388 = tpu.matmul %387, %361, %cst_219 {dimension_numbers = #tpu.dot_dimension_numbers<[1], [1], [0], [0], [0, 0, 1, 0], [], []>} : vector<8x128xf32>, vector<18x128xf32>, vector<8x18xf32> -> vector<8x18xf32>
    %cst_220 = arith.constant dense<0.000000e+00> : vector<144x18xf32>
    %389 = tpu.matmul %131, %388, %cst_220 {dimension_numbers = #tpu.dot_dimension_numbers<[1], [0], [0], [1], [0, 0, 1, 1], [], []>} : vector<144x8xf32>, vector<8x18xf32>, vector<144x18xf32> -> vector<144x18xf32>
    %390 = arith.mulf %129, %389 : vector<144x18xf32>
    %cst_221 = arith.constant dense<0.000000e+00> : vector<144x128xf32>
    %391 = tpu.matmul %390, %379, %cst_221 {dimension_numbers = #tpu.dot_dimension_numbers<[1], [0], [0], [1], [0, 0, 1, 1], [], []>} : vector<144x18xf32>, vector<18x128xf32>, vector<144x128xf32> -> vector<144x128xf32>
    %c1_222 = arith.constant 1 : index
    %c0_223 = arith.constant 0 : index
    %c0_224 = arith.constant 0 : index
    %392 = vector.load %arg17[%c1_222, %c0_223, %c0_224] : memref<2x128x8xf32, #tpu.memory_space<vmem>>, vector<1x128x8xf32>
    %393 = vector.shape_cast %392 : vector<1x128x8xf32> to vector<128x8xf32>
    %cst_225 = arith.constant dense<0.000000e+00> : vector<18x8xf32>
    %394 = tpu.matmul %361, %393, %cst_225 {dimension_numbers = #tpu.dot_dimension_numbers<[1], [0], [0], [1], [0, 0, 1, 1], [], []>} : vector<18x128xf32>, vector<128x8xf32>, vector<18x8xf32> -> vector<18x8xf32>
    %cst_226 = arith.constant dense<0.000000e+00> : vector<18x144xf32>
    %395 = tpu.matmul %394, %132, %cst_226 {dimension_numbers = #tpu.dot_dimension_numbers<[1], [0], [0], [1], [0, 0, 1, 1], [], []>} : vector<18x8xf32>, vector<8x144xf32>, vector<18x144xf32> -> vector<18x144xf32>
    %396 = arith.mulf %130, %395 : vector<18x144xf32>
    %cst_227 = arith.constant 0.000000e+00 : f32
    %397 = vector.broadcast %cst_227 : f32 to vector<8x128xf32>
    %398 = vector.extract_strided_slice %385 {offsets = [0, 0], sizes = [8, 128], strides = [1, 1]} : vector<144x128xf32> to vector<8x128xf32>
    %399 = arith.mulf %398, %397 : vector<8x128xf32>
    %400 = vector.extract_strided_slice %391 {offsets = [0, 0], sizes = [8, 128], strides = [1, 1]} : vector<144x128xf32> to vector<8x128xf32>
    %401 = arith.addf %399, %400 : vector<8x128xf32>
    %c0_228 = arith.constant 0 : index
    %c0_229 = arith.constant 0 : index
    %402 = vector.load %arg28[%c0_228, %c0_229] : memref<144x128xf32, #tpu.memory_space<vmem>>, vector<8x128xf32>
    tpu.vector_store %arg28[%c0_228, %c0_229], %401 {strides = array<i32>} : memref<144x128xf32, #tpu.memory_space<vmem>>, vector<8x128xf32>,
    %403 = vector.extract_strided_slice %385 {offsets = [8, 0], sizes = [8, 128], strides = [1, 1]} : vector<144x128xf32> to vector<8x128xf32>
    %404 = arith.mulf %403, %401 : vector<8x128xf32>
    %405 = vector.extract_strided_slice %391 {offsets = [8, 0], sizes = [8, 128], strides = [1, 1]} : vector<144x128xf32> to vector<8x128xf32>
    %406 = arith.addf %404, %405 : vector<8x128xf32>
    %c8_230 = arith.constant 8 : index
    %c0_231 = arith.constant 0 : index
    %407 = vector.load %arg28[%c8_230, %c0_231] : memref<144x128xf32, #tpu.memory_space<vmem>>, vector<8x128xf32>
    tpu.vector_store %arg28[%c8_230, %c0_231], %406 {strides = array<i32>} : memref<144x128xf32, #tpu.memory_space<vmem>>, vector<8x128xf32>,
    %408 = vector.extract_strided_slice %385 {offsets = [16, 0], sizes = [8, 128], strides = [1, 1]} : vector<144x128xf32> to vector<8x128xf32>
    %409 = arith.mulf %408, %406 : vector<8x128xf32>
    %410 = vector.extract_strided_slice %391 {offsets = [16, 0], sizes = [8, 128], strides = [1, 1]} : vector<144x128xf32> to vector<8x128xf32>
    %411 = arith.addf %409, %410 : vector<8x128xf32>
    %c16_232 = arith.constant 16 : index
    %c0_233 = arith.constant 0 : index
    %412 = vector.load %arg28[%c16_232, %c0_233] : memref<144x128xf32, #tpu.memory_space<vmem>>, vector<8x128xf32>
    tpu.vector_store %arg28[%c16_232, %c0_233], %411 {strides = array<i32>} : memref<144x128xf32, #tpu.memory_space<vmem>>, vector<8x128xf32>,
    %413 = vector.extract_strided_slice %385 {offsets = [24, 0], sizes = [8, 128], strides = [1, 1]} : vector<144x128xf32> to vector<8x128xf32>
    %414 = arith.mulf %413, %411 : vector<8x128xf32>
    %415 = vector.extract_strided_slice %391 {offsets = [24, 0], sizes = [8, 128], strides = [1, 1]} : vector<144x128xf32> to vector<8x128xf32>
    %416 = arith.addf %414, %415 : vector<8x128xf32>
    %c24_234 = arith.constant 24 : index
    %c0_235 = arith.constant 0 : index
    %417 = vector.load %arg28[%c24_234, %c0_235] : memref<144x128xf32, #tpu.memory_space<vmem>>, vector<8x128xf32>
    tpu.vector_store %arg28[%c24_234, %c0_235], %416 {strides = array<i32>} : memref<144x128xf32, #tpu.memory_space<vmem>>, vector<8x128xf32>,
    %418 = vector.extract_strided_slice %385 {offsets = [32, 0], sizes = [8, 128], strides = [1, 1]} : vector<144x128xf32> to vector<8x128xf32>
    %419 = arith.mulf %418, %416 : vector<8x128xf32>
    %420 = vector.extract_strided_slice %391 {offsets = [32, 0], sizes = [8, 128], strides = [1, 1]} : vector<144x128xf32> to vector<8x128xf32>
    %421 = arith.addf %419, %420 : vector<8x128xf32>
    %c32_236 = arith.constant 32 : index
    %c0_237 = arith.constant 0 : index
    %422 = vector.load %arg28[%c32_236, %c0_237] : memref<144x128xf32, #tpu.memory_space<vmem>>, vector<8x128xf32>
    tpu.vector_store %arg28[%c32_236, %c0_237], %421 {strides = array<i32>} : memref<144x128xf32, #tpu.memory_space<vmem>>, vector<8x128xf32>,
    %423 = vector.extract_strided_slice %385 {offsets = [40, 0], sizes = [8, 128], strides = [1, 1]} : vector<144x128xf32> to vector<8x128xf32>
    %424 = arith.mulf %423, %421 : vector<8x128xf32>
    %425 = vector.extract_strided_slice %391 {offsets = [40, 0], sizes = [8, 128], strides = [1, 1]} : vector<144x128xf32> to vector<8x128xf32>
    %426 = arith.addf %424, %425 : vector<8x128xf32>
    %c40_238 = arith.constant 40 : index
    %c0_239 = arith.constant 0 : index
    %427 = vector.load %arg28[%c40_238, %c0_239] : memref<144x128xf32, #tpu.memory_space<vmem>>, vector<8x128xf32>
    tpu.vector_store %arg28[%c40_238, %c0_239], %426 {strides = array<i32>} : memref<144x128xf32, #tpu.memory_space<vmem>>, vector<8x128xf32>,
    %428 = vector.extract_strided_slice %385 {offsets = [48, 0], sizes = [8, 128], strides = [1, 1]} : vector<144x128xf32> to vector<8x128xf32>
    %429 = arith.mulf %428, %426 : vector<8x128xf32>
    %430 = vector.extract_strided_slice %391 {offsets = [48, 0], sizes = [8, 128], strides = [1, 1]} : vector<144x128xf32> to vector<8x128xf32>
    %431 = arith.addf %429, %430 : vector<8x128xf32>
    %c48_240 = arith.constant 48 : index
    %c0_241 = arith.constant 0 : index
    %432 = vector.load %arg28[%c48_240, %c0_241] : memref<144x128xf32, #tpu.memory_space<vmem>>, vector<8x128xf32>
    tpu.vector_store %arg28[%c48_240, %c0_241], %431 {strides = array<i32>} : memref<144x128xf32, #tpu.memory_space<vmem>>, vector<8x128xf32>,
    %433 = vector.extract_strided_slice %385 {offsets = [56, 0], sizes = [8, 128], strides = [1, 1]} : vector<144x128xf32> to vector<8x128xf32>
    %434 = arith.mulf %433, %431 : vector<8x128xf32>
    %435 = vector.extract_strided_slice %391 {offsets = [56, 0], sizes = [8, 128], strides = [1, 1]} : vector<144x128xf32> to vector<8x128xf32>
    %436 = arith.addf %434, %435 : vector<8x128xf32>
    %c56_242 = arith.constant 56 : index
    %c0_243 = arith.constant 0 : index
    %437 = vector.load %arg28[%c56_242, %c0_243] : memref<144x128xf32, #tpu.memory_space<vmem>>, vector<8x128xf32>
    tpu.vector_store %arg28[%c56_242, %c0_243], %436 {strides = array<i32>} : memref<144x128xf32, #tpu.memory_space<vmem>>, vector<8x128xf32>,
    %438 = vector.extract_strided_slice %385 {offsets = [64, 0], sizes = [8, 128], strides = [1, 1]} : vector<144x128xf32> to vector<8x128xf32>
    %439 = arith.mulf %438, %436 : vector<8x128xf32>
    %440 = vector.extract_strided_slice %391 {offsets = [64, 0], sizes = [8, 128], strides = [1, 1]} : vector<144x128xf32> to vector<8x128xf32>
    %441 = arith.addf %439, %440 : vector<8x128xf32>
    %c64_244 = arith.constant 64 : index
    %c0_245 = arith.constant 0 : index
    %442 = vector.load %arg28[%c64_244, %c0_245] : memref<144x128xf32, #tpu.memory_space<vmem>>, vector<8x128xf32>
    tpu.vector_store %arg28[%c64_244, %c0_245], %441 {strides = array<i32>} : memref<144x128xf32, #tpu.memory_space<vmem>>, vector<8x128xf32>,
    %cst_246 = arith.constant 0.000000e+00 : f32
    %443 = vector.broadcast %cst_246 : f32 to vector<8x128xf32>
    %444 = vector.extract_strided_slice %385 {offsets = [72, 0], sizes = [8, 128], strides = [1, 1]} : vector<144x128xf32> to vector<8x128xf32>
    %445 = arith.mulf %444, %443 : vector<8x128xf32>
    %446 = vector.extract_strided_slice %391 {offsets = [72, 0], sizes = [8, 128], strides = [1, 1]} : vector<144x128xf32> to vector<8x128xf32>
    %447 = arith.addf %445, %446 : vector<8x128xf32>
    %c72_247 = arith.constant 72 : index
    %c0_248 = arith.constant 0 : index
    %448 = vector.load %arg28[%c72_247, %c0_248] : memref<144x128xf32, #tpu.memory_space<vmem>>, vector<8x128xf32>
    tpu.vector_store %arg28[%c72_247, %c0_248], %447 {strides = array<i32>} : memref<144x128xf32, #tpu.memory_space<vmem>>, vector<8x128xf32>,
    %449 = vector.extract_strided_slice %385 {offsets = [80, 0], sizes = [8, 128], strides = [1, 1]} : vector<144x128xf32> to vector<8x128xf32>
    %450 = arith.mulf %449, %447 : vector<8x128xf32>
    %451 = vector.extract_strided_slice %391 {offsets = [80, 0], sizes = [8, 128], strides = [1, 1]} : vector<144x128xf32> to vector<8x128xf32>
    %452 = arith.addf %450, %451 : vector<8x128xf32>
    %c80_249 = arith.constant 80 : index
    %c0_250 = arith.constant 0 : index
    %453 = vector.load %arg28[%c80_249, %c0_250] : memref<144x128xf32, #tpu.memory_space<vmem>>, vector<8x128xf32>
    tpu.vector_store %arg28[%c80_249, %c0_250], %452 {strides = array<i32>} : memref<144x128xf32, #tpu.memory_space<vmem>>, vector<8x128xf32>,
    %454 = vector.extract_strided_slice %385 {offsets = [88, 0], sizes = [8, 128], strides = [1, 1]} : vector<144x128xf32> to vector<8x128xf32>
    %455 = arith.mulf %454, %452 : vector<8x128xf32>
    %456 = vector.extract_strided_slice %391 {offsets = [88, 0], sizes = [8, 128], strides = [1, 1]} : vector<144x128xf32> to vector<8x128xf32>
    %457 = arith.addf %455, %456 : vector<8x128xf32>
    %c88_251 = arith.constant 88 : index
    %c0_252 = arith.constant 0 : index
    %458 = vector.load %arg28[%c88_251, %c0_252] : memref<144x128xf32, #tpu.memory_space<vmem>>, vector<8x128xf32>
    tpu.vector_store %arg28[%c88_251, %c0_252], %457 {strides = array<i32>} : memref<144x128xf32, #tpu.memory_space<vmem>>, vector<8x128xf32>,
    %459 = vector.extract_strided_slice %385 {offsets = [96, 0], sizes = [8, 128], strides = [1, 1]} : vector<144x128xf32> to vector<8x128xf32>
    %460 = arith.mulf %459, %457 : vector<8x128xf32>
    %461 = vector.extract_strided_slice %391 {offsets = [96, 0], sizes = [8, 128], strides = [1, 1]} : vector<144x128xf32> to vector<8x128xf32>
    %462 = arith.addf %460, %461 : vector<8x128xf32>
    %c96_253 = arith.constant 96 : index
    %c0_254 = arith.constant 0 : index
    %463 = vector.load %arg28[%c96_253, %c0_254] : memref<144x128xf32, #tpu.memory_space<vmem>>, vector<8x128xf32>
    tpu.vector_store %arg28[%c96_253, %c0_254], %462 {strides = array<i32>} : memref<144x128xf32, #tpu.memory_space<vmem>>, vector<8x128xf32>,
    %464 = vector.extract_strided_slice %385 {offsets = [104, 0], sizes = [8, 128], strides = [1, 1]} : vector<144x128xf32> to vector<8x128xf32>
    %465 = arith.mulf %464, %462 : vector<8x128xf32>
    %466 = vector.extract_strided_slice %391 {offsets = [104, 0], sizes = [8, 128], strides = [1, 1]} : vector<144x128xf32> to vector<8x128xf32>
    %467 = arith.addf %465, %466 : vector<8x128xf32>
    %c104_255 = arith.constant 104 : index
    %c0_256 = arith.constant 0 : index
    %468 = vector.load %arg28[%c104_255, %c0_256] : memref<144x128xf32, #tpu.memory_space<vmem>>, vector<8x128xf32>
    tpu.vector_store %arg28[%c104_255, %c0_256], %467 {strides = array<i32>} : memref<144x128xf32, #tpu.memory_space<vmem>>, vector<8x128xf32>,
    %469 = vector.extract_strided_slice %385 {offsets = [112, 0], sizes = [8, 128], strides = [1, 1]} : vector<144x128xf32> to vector<8x128xf32>
    %470 = arith.mulf %469, %467 : vector<8x128xf32>
    %471 = vector.extract_strided_slice %391 {offsets = [112, 0], sizes = [8, 128], strides = [1, 1]} : vector<144x128xf32> to vector<8x128xf32>
    %472 = arith.addf %470, %471 : vector<8x128xf32>
    %c112_257 = arith.constant 112 : index
    %c0_258 = arith.constant 0 : index
    %473 = vector.load %arg28[%c112_257, %c0_258] : memref<144x128xf32, #tpu.memory_space<vmem>>, vector<8x128xf32>
    tpu.vector_store %arg28[%c112_257, %c0_258], %472 {strides = array<i32>} : memref<144x128xf32, #tpu.memory_space<vmem>>, vector<8x128xf32>,
    %474 = vector.extract_strided_slice %385 {offsets = [120, 0], sizes = [8, 128], strides = [1, 1]} : vector<144x128xf32> to vector<8x128xf32>
    %475 = arith.mulf %474, %472 : vector<8x128xf32>
    %476 = vector.extract_strided_slice %391 {offsets = [120, 0], sizes = [8, 128], strides = [1, 1]} : vector<144x128xf32> to vector<8x128xf32>
    %477 = arith.addf %475, %476 : vector<8x128xf32>
    %c120_259 = arith.constant 120 : index
    %c0_260 = arith.constant 0 : index
    %478 = vector.load %arg28[%c120_259, %c0_260] : memref<144x128xf32, #tpu.memory_space<vmem>>, vector<8x128xf32>
    tpu.vector_store %arg28[%c120_259, %c0_260], %477 {strides = array<i32>} : memref<144x128xf32, #tpu.memory_space<vmem>>, vector<8x128xf32>,
    %479 = vector.extract_strided_slice %385 {offsets = [128, 0], sizes = [8, 128], strides = [1, 1]} : vector<144x128xf32> to vector<8x128xf32>
    %480 = arith.mulf %479, %477 : vector<8x128xf32>
    %481 = vector.extract_strided_slice %391 {offsets = [128, 0], sizes = [8, 128], strides = [1, 1]} : vector<144x128xf32> to vector<8x128xf32>
    %482 = arith.addf %480, %481 : vector<8x128xf32>
    %c128_261 = arith.constant 128 : index
    %c0_262 = arith.constant 0 : index
    %483 = vector.load %arg28[%c128_261, %c0_262] : memref<144x128xf32, #tpu.memory_space<vmem>>, vector<8x128xf32>
    tpu.vector_store %arg28[%c128_261, %c0_262], %482 {strides = array<i32>} : memref<144x128xf32, #tpu.memory_space<vmem>>, vector<8x128xf32>,
    %484 = vector.extract_strided_slice %385 {offsets = [136, 0], sizes = [8, 128], strides = [1, 1]} : vector<144x128xf32> to vector<8x128xf32>
    %485 = arith.mulf %484, %482 : vector<8x128xf32>
    %486 = vector.extract_strided_slice %391 {offsets = [136, 0], sizes = [8, 128], strides = [1, 1]} : vector<144x128xf32> to vector<8x128xf32>
    %487 = arith.addf %485, %486 : vector<8x128xf32>
    %c136_263 = arith.constant 136 : index
    %c0_264 = arith.constant 0 : index
    %488 = vector.load %arg28[%c136_263, %c0_264] : memref<144x128xf32, #tpu.memory_space<vmem>>, vector<8x128xf32>
    tpu.vector_store %arg28[%c136_263, %c0_264], %487 {strides = array<i32>} : memref<144x128xf32, #tpu.memory_space<vmem>>, vector<8x128xf32>,
    %c0_265 = arith.constant 0 : index
    %c0_266 = arith.constant 0 : index
    %489 = vector.load %arg28[%c0_265, %c0_266] : memref<144x128xf32, #tpu.memory_space<vmem>>, vector<144x128xf32>
    %cst_267 = arith.constant dense<0.000000e+00> : vector<18x128xf32>
    %490 = tpu.matmul %396, %489, %cst_267 {dimension_numbers = #tpu.dot_dimension_numbers<[1], [0], [0], [1], [0, 0, 1, 1], [], []>} : vector<18x144xf32>, vector<144x128xf32>, vector<18x128xf32> -> vector<18x128xf32>
    %c1_268 = arith.constant 1 : index
    %c0_269 = arith.constant 0 : index
    %c0_270 = arith.constant 0 : index
    %491 = vector.load %arg19[%c1_268, %c0_269, %c0_270] : memref<2x1x128xf32, #tpu.memory_space<vmem>>, vector<1x1x128xf32>
    %492 = vector.shape_cast %491 : vector<1x1x128xf32> to vector<1x128xf32>
    %493 = vector.broadcast %492 : vector<1x128xf32> to vector<18x128xf32>
    %494 = arith.mulf %361, %493 : vector<18x128xf32>
    %495 = arith.addf %490, %494 : vector<18x128xf32>
    %cst_271 = arith.constant 0.000000e+00 : f32
    %496 = vector.broadcast %cst_271 : f32 to vector<18x128xf32>
    %497 = arith.subf %496, %324 : vector<18x128xf32>
    %498 = math.exp %497 : vector<18x128xf32>
    %cst_272 = arith.constant 1.000000e+00 : f32
    %499 = vector.broadcast %cst_272 : f32 to vector<18x128xf32>
    %500 = arith.addf %499, %498 : vector<18x128xf32>
    %501 = tpu.reciprocal %500 {approx = true} : vector<18x128xf32> -> vector<18x128xf32>
    %502 = arith.mulf %324, %501 : vector<18x128xf32>
    %503 = arith.mulf %495, %502 : vector<18x128xf32>
    %c1_273 = arith.constant 1 : index
    %c0_274 = arith.constant 0 : index
    %c0_275 = arith.constant 0 : index
    %504 = vector.load %arg20[%c1_273, %c0_274, %c0_275] : memref<2x128x64xf32, #tpu.memory_space<vmem>>, vector<1x128x64xf32>
    %505 = vector.shape_cast %504 : vector<1x128x64xf32> to vector<128x64xf32>
    %cst_276 = arith.constant dense<0.000000e+00> : vector<18x64xf32>
    %506 = tpu.matmul %503, %505, %cst_276 {dimension_numbers = #tpu.dot_dimension_numbers<[1], [0], [0], [1], [0, 0, 1, 1], [], []>} : vector<18x128xf32>, vector<128x64xf32>, vector<18x64xf32> -> vector<18x64xf32>
    %c0_277 = arith.constant 0 : index
    %c0_278 = arith.constant 0 : index
    %507 = vector.load %arg25[%c0_277, %c0_278] : memref<64x128xf32, #tpu.memory_space<vmem>>, vector<64x128xf32>
    %cst_279 = arith.constant dense<0.000000e+00> : vector<18x128xf32>
    %508 = tpu.matmul %506, %507, %cst_279 {dimension_numbers = #tpu.dot_dimension_numbers<[1], [0], [0], [1], [0, 0, 1, 1], [], []>} : vector<18x64xf32>, vector<64x128xf32>, vector<18x128xf32> -> vector<18x128xf32>
    %c0_280 = arith.constant 0 : index
    %c0_281 = arith.constant 0 : index
    %509 = vector.load %arg26[%c0_280, %c0_281] : memref<1x128xf32, #tpu.memory_space<vmem>>, vector<1x128xf32>
    %510 = vector.broadcast %509 : vector<1x128xf32> to vector<18x128xf32>
    %511 = arith.addf %508, %510 : vector<18x128xf32>
    %c0_282 = arith.constant 0 : index
    %c0_283 = arith.constant 0 : index
    %512 = vector.load %arg27[%c0_282, %c0_283] : memref<18x128xf32, #tpu.memory_space<vmem>>, vector<18x128xf32>
    tpu.vector_store %arg27[%c0_282, %c0_283], %511 {strides = array<i32>} : memref<18x128xf32, #tpu.memory_space<vmem>>, vector<18x128xf32>,
    return
  }
  func.func @transform_0(%arg0: i32) -> (i32, i32) {
    %c0_i32 = arith.constant 0 : i32
    %c0_i32_0 = arith.constant 0 : i32
    %c0_i32_1 = arith.constant 0 : i32
    return %c0_i32, %c0_i32_0 : i32, i32
  }
  func.func @transform_1(%arg0: i32) -> (i32, i32) {
    %c0_i32 = arith.constant 0 : i32
    %c0_i32_0 = arith.constant 0 : i32
    %c0_i32_1 = arith.constant 0 : i32
    return %c0_i32, %c0_i32_0 : i32, i32
  }
  func.func @transform_2(%arg0: i32) -> (i32, i32) {
    %c0_i32 = arith.constant 0 : i32
    %c0_i32_0 = arith.constant 0 : i32
    %c0_i32_1 = arith.constant 0 : i32
    return %c0_i32, %c0_i32_0 : i32, i32
  }
  func.func @transform_3(%arg0: i32) -> (i32, i32) {
    %c0_i32 = arith.constant 0 : i32
    %c0_i32_0 = arith.constant 0 : i32
    %c0_i32_1 = arith.constant 0 : i32
    return %c0_i32, %c0_i32_0 : i32, i32
  }
  func.func @transform_4(%arg0: i32) -> (i32, i32, i32) {
    %c0_i32 = arith.constant 0 : i32
    %c0_i32_0 = arith.constant 0 : i32
    %c0_i32_1 = arith.constant 0 : i32
    %c0_i32_2 = arith.constant 0 : i32
    return %c0_i32, %c0_i32_0, %c0_i32_1 : i32, i32, i32
  }
  func.func @transform_5(%arg0: i32) -> (i32, i32, i32) {
    %c0_i32 = arith.constant 0 : i32
    %c0_i32_0 = arith.constant 0 : i32
    %c0_i32_1 = arith.constant 0 : i32
    %c0_i32_2 = arith.constant 0 : i32
    return %c0_i32, %c0_i32_0, %c0_i32_1 : i32, i32, i32
  }
  func.func @transform_6(%arg0: i32) -> (i32, i32, i32) {
    %c0_i32 = arith.constant 0 : i32
    %c0_i32_0 = arith.constant 0 : i32
    %c0_i32_1 = arith.constant 0 : i32
    %c0_i32_2 = arith.constant 0 : i32
    return %c0_i32, %c0_i32_0, %c0_i32_1 : i32, i32, i32
  }
  func.func @transform_7(%arg0: i32) -> (i32, i32, i32) {
    %c0_i32 = arith.constant 0 : i32
    %c0_i32_0 = arith.constant 0 : i32
    %c0_i32_1 = arith.constant 0 : i32
    %c0_i32_2 = arith.constant 0 : i32
    return %c0_i32, %c0_i32_0, %c0_i32_1 : i32, i32, i32
  }
  func.func @transform_8(%arg0: i32) -> (i32, i32) {
    %c0_i32 = arith.constant 0 : i32
    %c0_i32_0 = arith.constant 0 : i32
    %c0_i32_1 = arith.constant 0 : i32
    return %c0_i32, %c0_i32_0 : i32, i32
  }
  func.func @transform_9(%arg0: i32) -> (i32, i32, i32) {
    %c0_i32 = arith.constant 0 : i32
    %c0_i32_0 = arith.constant 0 : i32
    %c0_i32_1 = arith.constant 0 : i32
    %c0_i32_2 = arith.constant 0 : i32
    return %c0_i32, %c0_i32_0, %c0_i32_1 : i32, i32, i32
  }
  func.func @transform_10(%arg0: i32) -> (i32, i32, i32) {
    %c0_i32 = arith.constant 0 : i32
    %c0_i32_0 = arith.constant 0 : i32
    %c0_i32_1 = arith.constant 0 : i32
    %c0_i32_2 = arith.constant 0 : i32
    return %c0_i32, %c0_i32_0, %c0_i32_1 : i32, i32, i32
  }
  func.func @transform_11(%arg0: i32) -> (i32, i32, i32) {
    %c0_i32 = arith.constant 0 : i32
    %c0_i32_0 = arith.constant 0 : i32
    %c0_i32_1 = arith.constant 0 : i32
    %c0_i32_2 = arith.constant 0 : i32
    return %c0_i32, %c0_i32_0, %c0_i32_1 : i32, i32, i32
  }
  func.func @transform_12(%arg0: i32) -> (i32, i32, i32) {
    %c0_i32 = arith.constant 0 : i32
    %c0_i32_0 = arith.constant 0 : i32
    %c0_i32_1 = arith.constant 0 : i32
    %c0_i32_2 = arith.constant 0 : i32
    return %c0_i32, %c0_i32_0, %c0_i32_1 : i32, i32, i32
  }
  func.func @transform_13(%arg0: i32) -> (i32, i32, i32) {
    %c0_i32 = arith.constant 0 : i32
    %c0_i32_0 = arith.constant 0 : i32
    %c0_i32_1 = arith.constant 0 : i32
    %c0_i32_2 = arith.constant 0 : i32
    return %c0_i32, %c0_i32_0, %c0_i32_1 : i32, i32, i32
  }
  func.func @transform_14(%arg0: i32) -> (i32, i32, i32) {
    %c0_i32 = arith.constant 0 : i32
    %c0_i32_0 = arith.constant 0 : i32
    %c0_i32_1 = arith.constant 0 : i32
    %c0_i32_2 = arith.constant 0 : i32
    return %c0_i32, %c0_i32_0, %c0_i32_1 : i32, i32, i32
  }
  func.func @transform_15(%arg0: i32) -> (i32, i32, i32) {
    %c0_i32 = arith.constant 0 : i32
    %c0_i32_0 = arith.constant 0 : i32
    %c0_i32_1 = arith.constant 0 : i32
    %c0_i32_2 = arith.constant 0 : i32
    return %c0_i32, %c0_i32_0, %c0_i32_1 : i32, i32, i32
  }
  func.func @transform_16(%arg0: i32) -> (i32, i32, i32) {
    %c0_i32 = arith.constant 0 : i32
    %c0_i32_0 = arith.constant 0 : i32
    %c0_i32_1 = arith.constant 0 : i32
    %c0_i32_2 = arith.constant 0 : i32
    return %c0_i32, %c0_i32_0, %c0_i32_1 : i32, i32, i32
  }
  func.func @transform_17(%arg0: i32) -> (i32, i32, i32) {
    %c0_i32 = arith.constant 0 : i32
    %c0_i32_0 = arith.constant 0 : i32
    %c0_i32_1 = arith.constant 0 : i32
    %c0_i32_2 = arith.constant 0 : i32
    return %c0_i32, %c0_i32_0, %c0_i32_1 : i32, i32, i32
  }
  func.func @transform_18(%arg0: i32) -> (i32, i32, i32) {
    %c0_i32 = arith.constant 0 : i32
    %c0_i32_0 = arith.constant 0 : i32
    %c0_i32_1 = arith.constant 0 : i32
    %c0_i32_2 = arith.constant 0 : i32
    return %c0_i32, %c0_i32_0, %c0_i32_1 : i32, i32, i32
  }
  func.func @transform_19(%arg0: i32) -> (i32, i32, i32) {
    %c0_i32 = arith.constant 0 : i32
    %c0_i32_0 = arith.constant 0 : i32
    %c0_i32_1 = arith.constant 0 : i32
    %c0_i32_2 = arith.constant 0 : i32
    return %c0_i32, %c0_i32_0, %c0_i32_1 : i32, i32, i32
  }
  func.func @transform_20(%arg0: i32) -> (i32, i32) {
    %c0_i32 = arith.constant 0 : i32
    %c0_i32_0 = arith.constant 0 : i32
    %c0_i32_1 = arith.constant 0 : i32
    return %c0_i32, %c0_i32_0 : i32, i32
  }
  func.func @transform_21(%arg0: i32) -> (i32, i32) {
    %c0_i32 = arith.constant 0 : i32
    %c0_i32_0 = arith.constant 0 : i32
    %c0_i32_1 = arith.constant 0 : i32
    return %c0_i32, %c0_i32_0 : i32, i32
  }
  func.func @transform_22(%arg0: i32) -> (i32, i32) {
    %c0_i32 = arith.constant 0 : i32
    %c0_i32_0 = arith.constant 0 : i32
    %c0_i32_1 = arith.constant 0 : i32
    return %c0_i32, %c0_i32_0 : i32, i32
  }
  func.func @transform_23(%arg0: i32) -> (i32, i32) {
    %c0_i32 = arith.constant 0 : i32
    %c0_i32_0 = arith.constant 0 : i32
    %c0_i32_1 = arith.constant 0 : i32
    return %c0_i32, %c0_i32_0 : i32, i32
  }
  func.func @transform_24(%arg0: i32) -> (i32, i32) {
    %c0_i32 = arith.constant 0 : i32
    %c0_i32_0 = arith.constant 0 : i32
    %c0_i32_1 = arith.constant 0 : i32
    return %c0_i32, %c0_i32_0 : i32, i32
  }
  func.func @transform_25(%arg0: i32) -> (i32, i32) {
    %c0_i32 = arith.constant 0 : i32
    %c0_i32_0 = arith.constant 0 : i32
    %c0_i32_1 = arith.constant 0 : i32
    return %c0_i32, %c0_i32_0 : i32, i32
  }
  func.func @transform_26(%arg0: i32) -> (i32, i32) {
    %c0_i32 = arith.constant 0 : i32
    %c0_i32_0 = arith.constant 0 : i32
    %c0_i32_1 = arith.constant 0 : i32
    return %c0_i32, %c0_i32_0 : i32, i32
  }
}

</mosaic_0001>

<bundles_post_ra>
// kernel: mamba_decoder_forward.1
= control target key start
LH: loop header
LB: loop body
LE: loop exit
PB: predicated region body
PF: predicated region fallthrough
CT: control target
= control target key end

     0   :  { %vm103_vm0 = vcmask 654336   ;;  %vm269_vm1 = vcmask 130048   ;;  %vm9046_vm2 = vmmov 0   ;;  %vm2845_vm3 = vcmask 523264   ;;  %s11650_s0 = inlined_call_operand.vmem [shape: f32[80,16], index: 0, kind: input, shape index: {}]   ;;  %s11651_s1 = inlined_call_operand.vmem [shape: f32[80,80], index: 1, kind: input, shape index: {}]   ;;  %s11652_s4 = inlined_call_operand.vmem [shape: f32[2,16,16], index: 4, kind: input, shape index: {}]   ;;  %s11653_s3 = inlined_call_operand.vmem [shape: f32[192,80], index: 3, kind: input, shape index: {}]   ;;  %s11654_s2 = inlined_call_operand.vmem [shape: f32[192,80], index: 2, kind: input, shape index: {}]   ;;  %s11655_s5 = inlined_call_operand.vmem [shape: f32[2,1,16], index: 5, kind: input, shape index: {}]   ;;  %s11656_s7 = inlined_call_operand.vmem [shape: f32[8,16,64], index: 7, kind: input, shape index: {}]   ;;  %s11657_s6 = inlined_call_operand.vmem [shape: f32[8,16,64], index: 6, kind: input, shape index: {}]   ;;  %s11658_s10 = inlined_call_operand.vmem [shape: f32[2,64,256], index: 10, kind: input, shape index: {}]   ;;  %s11659_s8 = inlined_call_operand.vmem [shape: f32[1,64], index: 8, kind: input, shape index: {}]   ;;  %s11660_s9 = inlined_call_operand.vmem [shape: f32[3,18,18], index: 9, kind: input, shape index: {}]   ;;  %s11661_s13 = inlined_call_operand.vmem [shape: f32[2,128,128], index: 13, kind: input, shape index: {}]   ;;  %s11662_s11 = inlined_call_operand.vmem [shape: f32[2,4,128], index: 11, kind: input, shape index: {}]   ;;  %s11663_s12 = inlined_call_operand.vmem [shape: f32[2,1,128], index: 12, kind: input, shape index: {}]   ;;  %s11664_s17 = inlined_call_operand.vmem [shape: f32[2,8,128], index: 17, kind: input, shape index: {}]   ;;  %s11665_s22 = inlined_call_operand.vmem [shape: f32[144,8], index: 22, kind: input, shape index: {}]   ;;  %s11666_s20 = inlined_call_operand.vmem [shape: f32[144,18], index: 20, kind: input, shape index: {}]   ;;  %s11667_s14 = inlined_call_operand.vmem [shape: f32[2,1,128], index: 14, kind: input, shape index: {}]   ;;  %s11668_s15 = inlined_call_operand.vmem [shape: f32[2,8,128], index: 15, kind: input, shape index: {}]   ;;  %s11669_s16 = inlined_call_operand.vmem [shape: f32[2,128,8], index: 16, kind: input, shape index: {}]   ;;  %s11670_s23 = inlined_call_operand.vmem [shape: f32[8,144], index: 23, kind: input, shape index: {}]   ;;  %s11671_s19 = inlined_call_operand.vmem [shape: f32[2,128,64], index: 19, kind: input, shape index: {}]   ;;  %s11672_s21 = inlined_call_operand.vmem [shape: f32[18,144], index: 21, kind: input, shape index: {}]   ;;  %s11673_s18 = inlined_call_operand.vmem [shape: f32[2,1,128], index: 18, kind: input, shape index: {}]   ;;  %s11674_s24 = inlined_call_operand.vmem [shape: f32[64,128], index: 24, kind: input, shape index: {}]   ;;  %s11675_s25 = inlined_call_operand.vmem [shape: f32[1,128], index: 25, kind: input, shape index: {}]   ;;  %s11676_s26 = inlined_call_operand.vmem [shape: f32[18,128], index: 26, kind: output, shape index: {}]  }
   0x1   :  { %11693 = sst [smem:[#allocation4_spill]] %s11650_s0  ;;  %vm2969_vm4 = vcmask 1041408   ;;  %vm2959_vm5 = vcmask 146432   ;;  %vm3633_vm6 = vcmask 64512  }
   0x2   :  { %11694 = sst [smem:[#allocation5_spill]] %s11651_s1 }
   0x3   :  { %11695 = sst [smem:[#allocation6_spill]] %s11652_s4 }
   0x4   :  { %11696 = sst [smem:[#allocation7_spill]] %s11653_s3 }
   0x5   :  { %11697 = sst [smem:[#allocation8_spill]] %s11654_s2 }
   0x6   :  { %11698 = sst [smem:[#allocation9_spill]] %s11655_s5 }
   0x7   :  { %11699 = sst [smem:[#allocation10_spill]] %s11656_s7 }
   0x8   :  { %11700 = sst [smem:[#allocation11_spill]] %s11657_s6 }
   0x9   :  { %11701 = sst [smem:[#allocation12_spill]] %s11658_s10 }
   0xa   :  { %11702 = sst [smem:[#allocation13_spill]] %s11659_s8 }
   0xb   :  { %11703 = sst [smem:[#allocation14_spill]] %s11660_s9 }
   0xc   :  { %s11704_s6 = sld [smem:[#allocation4_spill]] }
   0xd   :  { %s11705_s30 = sld [smem:[#allocation5_spill]] }
   0xe   :  { %s11707_s5 = sld [smem:[#allocation7_spill]] }
   0xf   :  { %s11708_s1 = sld [smem:[#allocation8_spill]] }
  0x10   :  { %s11712_s7 = sld [smem:[#allocation12_spill]] }
  0x11   :  { %s11713_s2 = sld [smem:[#allocation13_spill]] }
  0x12   :  { %v92_v0 = vld [vmem:[%s11704_s6 + $0x48] sm:$0xff]  ;;  %v91_v1 = vld [vmem:[%s11704_s6 + $0x40] sm:$0xff]  ;;  %v90_v2 = vld [vmem:[%s11704_s6 + $0x38] sm:$0xff] }
  0x13   :  { %7811 = vmatprep.subr.mxu0 %v92_v0  ;;  %v93_v3 = vld [vmem:[%s11705_s30] sm:$0xff]  ;;  %v89_v4 = vld [vmem:[%s11704_s6 + $0x30] sm:$0xff]  ;;  %v88_v5 = vld [vmem:[%s11704_s6 + $0x28] sm:$0xff] }
  0x14   :  { %7812 = vmatpush3.msra.mxu0 %v92_v0  ;;  %7831 = vmatprep.mubr.msk.f32.mxu0 %vm103_vm0, %v93_v3  ;;  %v87_v6 = vld [vmem:[%s11704_s6 + $0x20] sm:$0xff]  ;;  %v86_v7 = vld [vmem:[%s11704_s6 + $0x18] sm:$0xff]  ;;  %v85_v8 = vld [vmem:[%s11704_s6 + $0x10] sm:$0xff] }
  0x15   :  { %7813 = vmatprep.subr.mxu0 %v91_v1  ;;  %v84_v9 = vld [vmem:[%s11704_s6 + $0x8] sm:$0xff]  ;;  %v83_v10 = vld [vmem:[%s11704_s6] sm:$0xff]  ;;  %v95_v12 = vld [vmem:[%s11705_s30 + $0x10] sm:$0xff]  ;;  %s11706_s6 = sld [smem:[#allocation6_spill]] }
  0x16   :  { %7814 = vmatpush3.msra.mxu0 %v91_v1  ;;  %v94_v11 = vld [vmem:[%s11705_s30 + $0x8] sm:$0xff]  ;;  %v96_v13 = vld [vmem:[%s11705_s30 + $0x18] sm:$0xff]  ;;  %v97_v14 = vld [vmem:[%s11705_s30 + $0x20] sm:$0xff] }
  0x17   :  { %7815 = vmatprep.subr.mxu0 %v90_v2  ;;  %v98_v15 = vld [vmem:[%s11705_s30 + $0x28] sm:$0xff]  ;;  %v99_v16 = vld [vmem:[%s11705_s30 + $0x30] sm:$0xff]  ;;  %v100_v17 = vld [vmem:[%s11705_s30 + $0x38] sm:$0xff] }
  0x18   :  { %7816 = vmatpush3.msra.mxu0 %v90_v2  ;;  %v101_v18 = vld [vmem:[%s11705_s30 + $0x40] sm:$0xff]  ;;  %v102_v19 = vld [vmem:[%s11705_s30 + $0x48] sm:$0xff]  ;;  %s11714_s30 = sld [smem:[#allocation14_spill]] }
  0x19   :  { %7817 = vmatprep.subr.mxu0 %v89_v4  ;;  %v982_v34 = vld [vmem:[%s11707_s5] sm:$0xff] }
  0x1a   :  { %7818 = vmatpush3.msra.mxu0 %v89_v4  ;;  %v701_v35 = vld [vmem:[%s11708_s1] sm:$0xff] }
  0x1b   :  { %7819 = vmatprep.subr.mxu0 %v88_v5  ;;  %v261_v20 = vld [vmem:[%s11706_s6 + $0x8] sm:$0xff]  ;;  %v260_v21 = vld [vmem:[%s11706_s6] sm:$0xff]  ;;  %v6870_v22 = vld [vmem:[%s11706_s6 + $0x18] sm:$0xff] }
  0x1c   :  { %7820 = vmatpush3.msra.mxu0 %v88_v5  ;;  %7846 = vmatprep.subr.mxu1 %v261_v20  ;;  %v6869_v25 = vld [vmem:[%s11706_s6 + $0x10] sm:$0xff]  ;;  %s11709_s6 = sld [smem:[#allocation9_spill]] }
  0x1d   :  { %7821 = vmatprep.subr.mxu0 %v87_v6  ;;  %7847 = vmatpush3.msra.mxu1 %v261_v20 }
  0x1e   :  { %7822 = vmatpush3.msra.mxu0 %v87_v6  ;;  %7848 = vmatprep.subr.mxu1 %v260_v21 }
  0x1f   :  { %7823 = vmatprep.subr.mxu0 %v86_v7  ;;  %7849 = vmatpush3.msra.mxu1 %v260_v21 }
  0x20   :  { %7824 = vmatpush3.msra.mxu0 %v86_v7  ;;  %7865 = vmatprep.subr.mxu1 %v6870_v22 }
  0x21   :  { %7825 = vmatprep.subr.mxu0 %v85_v8 }
  0x22   :  { %7826 = vmatpush3.msra.mxu0 %v85_v8  ;;  %v6872_v52 = vld [vmem:[%s11709_s6 + $0x1] ss:$0 sm:$0xff]  ;;  %v6858_v61 = vld [vmem:[%s11709_s6] ss:$0 sm:$0xff]  ;;  %s11710_s6 = sld [smem:[#allocation10_spill]] }
  0x23   :  { %7827 = vmatprep.subr.mxu0 %v84_v9 }
  0x24   :  { %7828 = vmatpush3.msra.mxu0 %v84_v9 }
  0x25   :  { %7829 = vmatprep.subr.mxu0 %v83_v10 }
  0x26   :  { %7830 = vmatpush3.msra.mxu0 %v83_v10 }
  0x27   :  { %7832 = vmatmul.mubr.msk.f32.vlgmr.msra.gmra.mxu0 %vm103_vm0, %v94_v11 }
  0x28   :  { %7834 = vmatprep.mubr.msk.f32.mxu0 %vm103_vm0, %v95_v12 }
  0x2b   :  { %7835 = vmatmul.mubr.msk.f32.gmra.mxu0 %vm103_vm0, %v96_v13 }
  0x2c   :  { %7837 = vmatprep.mubr.msk.f32.mxu0 %vm103_vm0, %v97_v14 }
  0x2f   :  { %7838 = vmatmul.mubr.msk.f32.gmra.mxu0 %vm103_vm0, %v98_v15 }
  0x30   :  { %7840 = vmatprep.mubr.msk.f32.mxu0 %vm103_vm0, %v99_v16 }
  0x33   :  { %7841 = vmatmul.mubr.msk.f32.gmra.mxu0 %vm103_vm0, %v100_v17 }
  0x34   :  { %7843 = vmatprep.mubr.msk.f32.mxu0 %vm103_vm0, %v101_v18 }
  0x37   :  { %7844 = vmatmul.mubr.msk.f32.gmra.mxu0 %vm103_vm0, %v102_v19 }
  0x38   :  { %7904 = vmatprep.mubr.msk.f32.mxu0 %vm103_vm0, %v701_v35 }
  0xe7   :  { %v7833_v23 = vpop.f32.mrf.mxu0 }
  0xe9   :  { %v200_v24 = vpop.f32.mrf.mxu0 }
  0xea   :  { %7850 = vmatprep.mubr.msk.f32.mxu1 %vm269_vm1, %v200_v24 }
  0xeb   :  { %v7836_v26 = vpop.f32.mrf.mxu0  ;;  %7851 = vmatmul.mubr.msk.f32.vlgmr.msra.gmra.mxu1 %vm269_vm1, %v7833_v23 }
  0xec   :  { %7866 = vmatpush3.msra.mxu1 %v6870_v22 }
  0xed   :  { %v210_v27 = vpop.f32.mrf.mxu0  ;;  %7867 = vmatprep.subr.mxu1 %v6869_v25 }
  0xee   :  { %7853 = vmatprep.mubr.msk.f32.mxu1 %vm269_vm1, %v210_v27  ;;  %7868 = vmatpush3.msra.mxu1 %v6869_v25 }
  0xef   :  { %v7839_v28 = vpop.f32.mrf.mxu0  ;;  %7854 = vmatmul.mubr.msk.f32.gmra.mxu1 %vm269_vm1, %v7836_v26 }
  0xf1   :  { %v220_v29 = vpop.f32.mrf.mxu0 }
  0xf2   :  { %7856 = vmatprep.mubr.msk.f32.mxu1 %vm269_vm1, %v220_v29 }
  0xf3   :  { %v7842_v30 = vpop.f32.mrf.mxu0  ;;  %7857 = vmatmul.mubr.msk.f32.gmra.mxu1 %vm269_vm1, %v7839_v28 }
  0xf5   :  { %v230_v31 = vpop.f32.mrf.mxu0 }
  0xf6   :  { %7859 = vmatprep.mubr.msk.f32.mxu1 %vm269_vm1, %v230_v31 }
  0xf7   :  { %v7845_v32 = vpop.f32.mrf.mxu0  ;;  %7860 = vmatmul.mubr.msk.f32.gmra.mxu1 %vm269_vm1, %v7842_v30 }
  0xf9   :  { %v240_v33 = vpop.f32.mrf.mxu0 }
  0xfa   :  { %7862 = vmatprep.mubr.msk.f32.mxu1 %vm269_vm1, %v240_v33 }
  0xfb   :  { %7863 = vmatmul.mubr.msk.f32.gmra.mxu1 %vm269_vm1, %v7845_v32 }
  0xfc   :  { %7869 = vmatprep.mubr.msk.f32.mxu1 %vm269_vm1, %v200_v24 }
  0xff   :  { %7870 = vmatmul.mubr.msk.f32.vlgmr.msra.gmra.mxu1 %vm269_vm1, %v7833_v23 }
 0x100   :  { %7872 = vmatprep.mubr.msk.f32.mxu1 %vm269_vm1, %v210_v27 }
 0x103   :  { %7873 = vmatmul.mubr.msk.f32.gmra.mxu1 %vm269_vm1, %v7836_v26 }
 0x104   :  { %7875 = vmatprep.mubr.msk.f32.mxu1 %vm269_vm1, %v220_v29 }
 0x107   :  { %7876 = vmatmul.mubr.msk.f32.gmra.mxu1 %vm269_vm1, %v7839_v28 }
 0x108   :  { %7878 = vmatprep.mubr.msk.f32.mxu1 %vm269_vm1, %v230_v31 }
 0x10b   :  { %7879 = vmatmul.mubr.msk.f32.gmra.mxu1 %vm269_vm1, %v7842_v30 }
 0x10c   :  { %7881 = vmatprep.mubr.msk.f32.mxu1 %vm269_vm1, %v240_v33 }
 0x10f   :  { %7882 = vmatmul.mubr.msk.f32.gmra.mxu1 %vm269_vm1, %v7845_v32 }
 0x110   :  { %7960 = vmatprep.mubr.msk.f32.mxu1 %vm103_vm0, %v982_v34 }
 0x1ab   :  { %v7852_v36 = vpop.f32.mrf.mxu1 }
 0x1ac   :  { %v9305_v12 = vadd.f32 %v7852_v36, %v6858_v61 }
 0x1ad   :  { %v366_v37 = vpop.f32.mrf.mxu1 }
 0x1ae   :  { %v9308_v15 = vadd.f32 %v6858_v61, %v366_v37  ;;  %v662_v18 = vand.u32 2147483647, %v9305_v12 }
 0x1af   :  { %v7855_v38 = vpop.f32.mrf.mxu1 }
 0x1b0   :  { %v9300_v4 = vadd.f32 %v7855_v38, %v6858_v61  ;;  %v661_v20 = vand.u32 2147483647, %v9308_v15  ;;  %v672_v22 = vadd.f32 1.0, %v662_v18  ;;  %v1000_v18 = vld [vmem:[%s11707_s5 + $0x90] sm:$0xff] }
 0x1b1   :  { %v376_v39 = vpop.f32.mrf.mxu1 }
 0x1b2   :  { %v9302_v8 = vadd.f32 %v6858_v61, %v376_v39  ;;  %v664_v13 = vand.u32 2147483647, %v9300_v4  ;;  %v671_v23 = vadd.f32 1.0, %v661_v20  ;;  %v1001_v20 = vld [vmem:[%s11707_s5 + $0x98] sm:$0xff] }
 0x1b3   :  { %v7858_v40 = vpop.f32.mrf.mxu1 }
 0x1b4   :  { %v663_v16 = vand.u32 2147483647, %v9302_v8  ;;  %v674_v19 = vadd.f32 1.0, %v664_v13  ;;  %v717_v13 = vld [vmem:[%s11708_s1 + $0x80] sm:$0xff] }
 0x1b5   :  { %v386_v41 = vpop.f32.mrf.mxu1 }
 0x1b6   :  { %v9298_v63 = vadd.f32 %v6858_v61, %v386_v41  ;;  %v673_v21 = vadd.f32 1.0, %v663_v16  ;;  %v709_v61 = vld [vmem:[%s11708_s1 + $0x40] sm:$0xff]  ;;  %v999_v16 = vld [vmem:[%s11707_s5 + $0x88] sm:$0xff] }
 0x1b7   :  { %v7861_v42 = vpop.f32.mrf.mxu1 }
 0x1b8   :  { %v665_v9 = vand.u32 2147483647, %v9298_v63 }
 0x1b9   :  { %v396_v43 = vpop.f32.mrf.mxu1 }
 0x1ba   :  { %v675_v17 = vadd.f32 1.0, %v665_v9  ;;  %v715_v9 = vld [vmem:[%s11708_s1 + $0x70] sm:$0xff] }
 0x1bb   :  { %v7864_v44 = vpop.f32.mrf.mxu1 }
 0x1bc   :  { %v983_v44 = vld [vmem:[%s11707_s5 + $0x8] sm:$0xff] }
 0x1bd   :  { %v406_v45 = vpop.f32.mrf.mxu1 }
 0x1be   :  { %v702_v45 = vld [vmem:[%s11708_s1 + $0x8] sm:$0xff] }
 0x1bf   :  { %v7871_v46 = vpop.f32.mrf.mxu1 }
 0x1c0   :  { %v984_v46 = vld [vmem:[%s11707_s5 + $0x10] sm:$0xff] }
 0x1c1   :  { %v552_v47 = vpop.f32.mrf.mxu1 }
 0x1c2   :  { %v703_v47 = vld [vmem:[%s11708_s1 + $0x10] sm:$0xff] }
 0x1c3   :  { %v7874_v48 = vpop.f32.mrf.mxu1 }
 0x1c4   :  { %v1266_v48 = vld [vmem:[%s11710_s6 + $0x8] sm:$0xff] }
 0x1c5   :  { %v562_v49 = vpop.f32.mrf.mxu1 }
 0x1c6   :  { %v985_v49 = vld [vmem:[%s11707_s5 + $0x18] sm:$0xff] }
 0x1c7   :  { %v7877_v50 = vpop.f32.mrf.mxu1 }
 0x1c8   :  { %v578_v59 = vadd.f32 %v7877_v50, %v6872_v52  ;;  %v704_v50 = vld [vmem:[%s11708_s1 + $0x18] sm:$0xff] }
 0x1c9   :  { %v572_v51 = vpop.f32.mrf.mxu1 }
 0x1ca   :  { %v666_v5 = vand.u32 2147483647, %v578_v59  ;;  %v705_v51 = vld [vmem:[%s11708_s1 + $0x20] sm:$0xff] }
 0x1cb   :  { %v7880_v53 = vpop.f32.mrf.mxu1 }
 0x1cc   :  { %v588_v54 = vadd.f32 %v7880_v53, %v6872_v52  ;;  %v676_v14 = vadd.f32 1.0, %v666_v5  ;;  %v9045_v53 = vmov 0.0   ;;  %v713_v5 = vld [vmem:[%s11708_s1 + $0x60] sm:$0xff] }
 0x1cd   :  { %v582_v55 = vpop.f32.mrf.mxu1 }
 0x1ce   :  { %v583_v56 = vadd.f32 %v6872_v52, %v582_v55  ;;  %v668_v57 = vand.u32 2147483647, %v588_v54  ;;  %v706_v55 = vld [vmem:[%s11708_s1 + $0x28] sm:$0xff] }
 0x1cf   :  { %v7883_v58 = vpop.f32.mrf.mxu1 }
 0x1d0   :  { %v598_v60 = vadd.f32 %v7883_v58, %v6872_v52  ;;  %v667_v0 = vand.u32 2147483647, %v583_v56  ;;  %v678_v3 = vadd.f32 1.0, %v668_v57  ;;  %v707_v57 = vld [vmem:[%s11708_s1 + $0x30] sm:$0xff] }
 0x1d1   :  { %v592_v62 = vpop.f32.mrf.mxu1  ;;  %v988_v58 = vld [vmem:[%s11707_s5 + $0x30] sm:$0xff] }
 0x1d2   :  { %v670_v1 = vand.u32 2147483647, %v598_v60  ;;  %v593_v2 = vadd.f32 %v6872_v52, %v592_v62  ;;  %v677_v10 = vadd.f32 1.0, %v667_v0  ;;  %v986_v52 = vld [vmem:[%s11707_s5 + $0x20] sm:$0xff]  ;;  %v991_v0 = vld [vmem:[%s11707_s5 + $0x48] sm:$0xff] }
 0x1d3   :  { %v990_v62 = vld [vmem:[%s11707_s5 + $0x40] sm:$0xff] }
 0x1d4   :  { %v680_v6 = vadd.f32 1.0, %v670_v1  ;;  %v669_v7 = vand.u32 2147483647, %v593_v2  ;;  %v711_v1 = vld [vmem:[%s11708_s1 + $0x50] sm:$0xff] }
 0x1d6   :  { %8837 = vrcp.f32 %v680_v6  ;;  %v679_v11 = vadd.f32 1.0, %v669_v7  ;;  %v994_v6 = vld [vmem:[%s11707_s5 + $0x60] sm:$0xff]  ;;  %v714_v7 = vld [vmem:[%s11708_s1 + $0x68] sm:$0xff] }
 0x1d7   :  { %8839 = vrcp.f32 %v678_v3  ;;  %v712_v3 = vld [vmem:[%s11708_s1 + $0x58] sm:$0xff] }
 0x1d8   :  { %8841 = vrcp.f32 %v679_v11  ;;  %v716_v11 = vld [vmem:[%s11708_s1 + $0x78] sm:$0xff] }
 0x1d9   :  { %8843 = vrcp.f32 %v677_v10  ;;  %v996_v10 = vld [vmem:[%s11707_s5 + $0x70] sm:$0xff] }
 0x1da   :  { %8845 = vrcp.f32 %v676_v14  ;;  %v998_v14 = vld [vmem:[%s11707_s5 + $0x80] sm:$0xff] }
 0x1db   :  { %8847 = vrcp.f32 %v675_v17  ;;  %v719_v17 = vld [vmem:[%s11708_s1 + $0x90] sm:$0xff] }
 0x1dc   :  { %8849 = vrcp.f32 %v674_v19  ;;  %v720_v19 = vld [vmem:[%s11708_s1 + $0x98] sm:$0xff] }
 0x1dd   :  { %8851 = vrcp.f32 %v673_v21  ;;  %v721_v21 = vld [vmem:[%s11708_s1 + $0xa0] sm:$0xff] }
 0x1de   :  { %8853 = vrcp.f32 %v672_v22  ;;  %v1002_v22 = vld [vmem:[%s11707_s5 + $0xa0] sm:$0xff] }
 0x1df   :  { %8855 = vrcp.f32 %v671_v23  ;;  %v722_v23 = vld [vmem:[%s11708_s1 + $0xa8] sm:$0xff] }
 0x1e3   :  { %v8838_v24 = vpop.eup %8837 }
 0x1e4   :  { %v8840_v25 = vpop.eup %8839  ;;  %v700_v26 = vmul.f32 %v8838_v24, %v598_v60  ;;  %v989_v60 = vld [vmem:[%s11707_s5 + $0x38] sm:$0xff]  ;;  %v1003_v24 = vld [vmem:[%s11707_s5 + $0xa8] sm:$0xff] }
 0x1e5   :  { %v8842_v27 = vpop.eup %8841  ;;  %v698_v30 = vmul.f32 %v8840_v25, %v588_v54  ;;  %v1265_v54 = vld [vmem:[%s11710_s6] sm:$0xff]  ;;  %v723_v25 = vld [vmem:[%s11708_s1 + $0xb0] sm:$0xff] }
 0x1e6   :  { %v699_v28 = vmul.f32 %v8842_v27, %v593_v2  ;;  %7884 = vmatprep.subr.mxu0 %v700_v26  ;;  %7940 = vmatprep.subr.mxu1 %v700_v26  ;;  %v8844_v29 = vpop.eup %8843  ;;  %v992_v2 = vld [vmem:[%s11707_s5 + $0x50] sm:$0xff]  ;;  %v724_v27 = vld [vmem:[%s11708_s1 + $0xb8] sm:$0xff] }
 0x1e7   :  { %7885 = vmatpush3.msra.mxu0 %v700_v26  ;;  %7941 = vmatpush3.msra.mxu1 %v700_v26  ;;  %v8846_v31 = vpop.eup %8845  ;;  %v697_v32 = vmul.f32 %v8844_v29, %v583_v56  ;;  %v987_v56 = vld [vmem:[%s11707_s5 + $0x28] sm:$0xff]  ;;  %v1004_v26 = vld [vmem:[%s11707_s5 + $0xb0] sm:$0xff] }
 0x1e8   :  { %7886 = vmatprep.subr.mxu0 %v699_v28  ;;  %7942 = vmatprep.subr.mxu1 %v699_v28  ;;  %v8848_v33 = vpop.eup %8847  ;;  %v696_v34 = vmul.f32 %v8846_v31, %v578_v59  ;;  %v708_v59 = vld [vmem:[%s11708_s1 + $0x38] sm:$0xff] }
 0x1e9   :  { %7887 = vmatpush3.msra.mxu0 %v699_v28  ;;  %7943 = vmatpush3.msra.mxu1 %v699_v28  ;;  %v8850_v35 = vpop.eup %8849  ;;  %v695_v36 = vmul.f32 %v8848_v33, %v9298_v63  ;;  %v710_v63 = vld [vmem:[%s11708_s1 + $0x48] sm:$0xff]  ;;  %v1005_v28 = vld [vmem:[%s11707_s5 + $0xb8] sm:$0xff] }
 0x1ea   :  { %7888 = vmatprep.subr.mxu0 %v698_v30  ;;  %7944 = vmatprep.subr.mxu1 %v698_v30  ;;  %v8852_v37 = vpop.eup %8851  ;;  %v694_v38 = vmul.f32 %v8850_v35, %v9300_v4  ;;  %v993_v4 = vld [vmem:[%s11707_s5 + $0x58] sm:$0xff] }
 0x1eb   :  { %7889 = vmatpush3.msra.mxu0 %v698_v30  ;;  %7945 = vmatpush3.msra.mxu1 %v698_v30  ;;  %v8854_v39 = vpop.eup %8853  ;;  %v693_v40 = vmul.f32 %v8852_v37, %v9302_v8  ;;  %v995_v8 = vld [vmem:[%s11707_s5 + $0x68] sm:$0xff] }
 0x1ec   :  { %7890 = vmatprep.subr.mxu0 %v697_v32  ;;  %7946 = vmatprep.subr.mxu1 %v697_v32  ;;  %v8856_v41 = vpop.eup %8855  ;;  %v692_v42 = vmul.f32 %v8854_v39, %v9305_v12  ;;  %v997_v12 = vld [vmem:[%s11707_s5 + $0x78] sm:$0xff] }
 0x1ed   :  { %7891 = vmatpush3.msra.mxu0 %v697_v32  ;;  %7947 = vmatpush3.msra.mxu1 %v697_v32  ;;  %v691_v43 = vmul.f32 %v8856_v41, %v9308_v15  ;;  %v718_v15 = vld [vmem:[%s11708_s1 + $0x88] sm:$0xff]  ;;  %s11711_s1 = sld [smem:[#allocation11_spill]] }
 0x1ee   :  { %7892 = vmatprep.subr.mxu0 %v696_v34  ;;  %7948 = vmatprep.subr.mxu1 %v696_v34 }
 0x1ef   :  { %7893 = vmatpush3.msra.mxu0 %v696_v34  ;;  %7949 = vmatpush3.msra.mxu1 %v696_v34 }
 0x1f0   :  { %7894 = vmatprep.subr.mxu0 %v695_v36  ;;  %7950 = vmatprep.subr.mxu1 %v695_v36 }
 0x1f1   :  { %7895 = vmatpush3.msra.mxu0 %v695_v36  ;;  %7951 = vmatpush3.msra.mxu1 %v695_v36 }
 0x1f2   :  { %7896 = vmatprep.subr.mxu0 %v694_v38  ;;  %7952 = vmatprep.subr.mxu1 %v694_v38 }
 0x1f3   :  { %7897 = vmatpush3.msra.mxu0 %v694_v38  ;;  %7953 = vmatpush3.msra.mxu1 %v694_v38  ;;  %v1264_v29 = vld [vmem:[%s11711_s1 + $0x8] sm:$0xff]  ;;  %v1263_v32 = vld [vmem:[%s11711_s1] sm:$0xff]  ;;  %v6938_v33 = vld [vmem:[%s11711_s1 + $0x18] sm:$0xff] }
 0x1f4   :  { %7898 = vmatprep.subr.mxu0 %v693_v40  ;;  %7954 = vmatprep.subr.mxu1 %v693_v40  ;;  %v6937_v36 = vld [vmem:[%s11711_s1 + $0x10] sm:$0xff]  ;;  %v6948_v41 = vld [vmem:[%s11711_s1 + $0x28] sm:$0xff] }
 0x1f5   :  { %7899 = vmatpush3.msra.mxu0 %v693_v40  ;;  %7955 = vmatpush3.msra.mxu1 %v693_v40 }
 0x1f6   :  { %7900 = vmatprep.subr.mxu0 %v692_v42  ;;  %7956 = vmatprep.subr.mxu1 %v692_v42 }
 0x1f7   :  { %7901 = vmatpush3.msra.mxu0 %v692_v42  ;;  %7957 = vmatpush3.msra.mxu1 %v692_v42 }
 0x1f8   :  { %7902 = vmatprep.subr.mxu0 %v691_v43  ;;  %7958 = vmatprep.subr.mxu1 %v691_v43 }
 0x1f9   :  { %7903 = vmatpush3.msra.mxu0 %v691_v43  ;;  %7959 = vmatpush3.msra.mxu1 %v691_v43  ;;  %v6943_v43 = vld [vmem:[%s11710_s6 + $0x18] sm:$0xff] }
 0x1fa   :  { %7961 = vmatmul.mubr.msk.f32.vlgmr.msra.gmra.mxu1 %vm103_vm0, %v983_v44  ;;  %7905 = vmatmul.mubr.msk.f32.vlgmr.msra.gmra.mxu0 %vm103_vm0, %v702_v45  ;;  %v6942_v45 = vld [vmem:[%s11710_s6 + $0x10] sm:$0xff] }
 0x1fb   :  { %7963 = vmatprep.mubr.msk.f32.mxu1 %vm103_vm0, %v984_v46  ;;  %7907 = vmatprep.mubr.msk.f32.mxu0 %vm103_vm0, %v703_v47  ;;  %v6947_v47 = vld [vmem:[%s11711_s1 + $0x20] sm:$0xff] }
 0x1fc   :  { %8831 = vmatprep.subr.mxu1 %v9045_v53  ;;  %7996 = vmatprep.subr.mxu0 %v9045_v53 }
 0x1fd   :  { %8833 = vmatpush3.msra.mxu1 %v1266_v48  ;;  %7997 = vmatpush3.msra.mxu0 %v1266_v48 }
 0x1fe   :  { %7964 = vmatmul.mubr.msk.f32.gmra.mxu1 %vm103_vm0, %v985_v49  ;;  %7908 = vmatmul.mubr.msk.f32.gmra.mxu0 %vm103_vm0, %v704_v50  ;;  %v6958_v49 = vld [vmem:[%s11711_s1 + $0x38] sm:$0xff] }
 0x1ff   :  { %7910 = vmatprep.mubr.msk.f32.mxu0 %vm103_vm0, %v705_v51  ;;  %7966 = vmatprep.mubr.msk.f32.mxu1 %vm103_vm0, %v986_v52  ;;  %v6953_v51 = vld [vmem:[%s11710_s6 + $0x28] sm:$0xff] }
 0x200   :  { %8832 = vmatprep.subr.mxu1 %v9045_v53  ;;  %7998 = vmatprep.subr.mxu0 %v9045_v53 }
 0x201   :  { %8834 = vmatpush3.msra.mxu1 %v1265_v54  ;;  %7999 = vmatpush3.msra.mxu0 %v1265_v54  ;;  %v6952_v54 = vld [vmem:[%s11710_s6 + $0x20] sm:$0xff] }
 0x202   :  { %7911 = vmatmul.mubr.msk.f32.gmra.mxu0 %vm103_vm0, %v706_v55  ;;  %7967 = vmatmul.mubr.msk.f32.gmra.mxu1 %vm103_vm0, %v987_v56  ;;  %v6957_v55 = vld [vmem:[%s11711_s1 + $0x30] sm:$0xff] }
 0x203   :  { %7913 = vmatprep.mubr.msk.f32.mxu0 %vm103_vm0, %v707_v57  ;;  %7969 = vmatprep.mubr.msk.f32.mxu1 %vm103_vm0, %v988_v58 }
 0x204   :  { %8009 = vmatprep.subr.mxu1 %v9045_v53  ;;  %8022 = vmatprep.subr.mxu0 %v9045_v53 }
 0x206   :  { %7914 = vmatmul.mubr.msk.f32.gmra.mxu0 %vm103_vm0, %v708_v59  ;;  %7970 = vmatmul.mubr.msk.f32.gmra.mxu1 %vm103_vm0, %v989_v60  ;;  %v6968_v60 = vld [vmem:[%s11711_s1 + $0x48] sm:$0xff] }
 0x207   :  { %7916 = vmatprep.mubr.msk.f32.mxu0 %vm103_vm0, %v709_v61  ;;  %7972 = vmatprep.mubr.msk.f32.mxu1 %vm103_vm0, %v990_v62  ;;  %v6963_v62 = vld [vmem:[%s11710_s6 + $0x38] sm:$0xff] }
 0x20a   :  { %7917 = vmatmul.mubr.msk.f32.gmra.mxu0 %vm103_vm0, %v710_v63  ;;  %7973 = vmatmul.mubr.msk.f32.gmra.mxu1 %vm103_vm0, %v991_v0  ;;  %v6962_v0 = vld [vmem:[%s11710_s6 + $0x30] sm:$0xff] }
 0x20b   :  { %7919 = vmatprep.mubr.msk.f32.mxu0 %vm103_vm0, %v711_v1  ;;  %7975 = vmatprep.mubr.msk.f32.mxu1 %vm103_vm0, %v992_v2  ;;  %v6967_v1 = vld [vmem:[%s11711_s1 + $0x40] sm:$0xff] }
 0x20e   :  { %7920 = vmatmul.mubr.msk.f32.gmra.mxu0 %vm103_vm0, %v712_v3  ;;  %7976 = vmatmul.mubr.msk.f32.gmra.mxu1 %vm103_vm0, %v993_v4 }
 0x20f   :  { %7922 = vmatprep.mubr.msk.f32.mxu0 %vm103_vm0, %v713_v5  ;;  %7978 = vmatprep.mubr.msk.f32.mxu1 %vm103_vm0, %v994_v6  ;;  %v6978_v6 = vld [vmem:[%s11711_s1 + $0x58] sm:$0xff] }
 0x212   :  { %7923 = vmatmul.mubr.msk.f32.gmra.mxu0 %vm103_vm0, %v714_v7  ;;  %7979 = vmatmul.mubr.msk.f32.gmra.mxu1 %vm103_vm0, %v995_v8  ;;  %v6973_v8 = vld [vmem:[%s11710_s6 + $0x48] sm:$0xff] }
 0x213   :  { %7925 = vmatprep.mubr.msk.f32.mxu0 %vm103_vm0, %v715_v9  ;;  %7981 = vmatprep.mubr.msk.f32.mxu1 %vm103_vm0, %v996_v10  ;;  %v6972_v10 = vld [vmem:[%s11710_s6 + $0x40] sm:$0xff] }
 0x216   :  { %7926 = vmatmul.mubr.msk.f32.gmra.mxu0 %vm103_vm0, %v716_v11  ;;  %7982 = vmatmul.mubr.msk.f32.gmra.mxu1 %vm103_vm0, %v997_v12  ;;  %v6977_v11 = vld [vmem:[%s11711_s1 + $0x50] sm:$0xff] }
 0x217   :  { %7928 = vmatprep.mubr.msk.f32.mxu0 %vm103_vm0, %v717_v13  ;;  %7984 = vmatprep.mubr.msk.f32.mxu1 %vm103_vm0, %v998_v14 }
 0x21a   :  { %7929 = vmatmul.mubr.msk.f32.gmra.mxu0 %vm103_vm0, %v718_v15  ;;  %7985 = vmatmul.mubr.msk.f32.gmra.mxu1 %vm103_vm0, %v999_v16  ;;  %v6988_v16 = vld [vmem:[%s11711_s1 + $0x68] sm:$0xff] }
 0x21b   :  { %7931 = vmatprep.mubr.msk.f32.mxu0 %vm103_vm0, %v719_v17  ;;  %7987 = vmatprep.mubr.msk.f32.mxu1 %vm103_vm0, %v1000_v18  ;;  %v6983_v18 = vld [vmem:[%s11710_s6 + $0x58] sm:$0xff] }
 0x21e   :  { %7932 = vmatmul.mubr.msk.f32.gmra.mxu0 %vm103_vm0, %v720_v19  ;;  %7988 = vmatmul.mubr.msk.f32.gmra.mxu1 %vm103_vm0, %v1001_v20  ;;  %v6982_v20 = vld [vmem:[%s11710_s6 + $0x50] sm:$0xff] }
 0x21f   :  { %7934 = vmatprep.mubr.msk.f32.mxu0 %vm103_vm0, %v721_v21  ;;  %7990 = vmatprep.mubr.msk.f32.mxu1 %vm103_vm0, %v1002_v22  ;;  %v6987_v21 = vld [vmem:[%s11711_s1 + $0x60] sm:$0xff] }
 0x222   :  { %7935 = vmatmul.mubr.msk.f32.gmra.mxu0 %vm103_vm0, %v722_v23  ;;  %7991 = vmatmul.mubr.msk.f32.gmra.mxu1 %vm103_vm0, %v1003_v24 }
 0x223   :  { %7937 = vmatprep.mubr.msk.f32.mxu0 %vm103_vm0, %v723_v25  ;;  %7993 = vmatprep.mubr.msk.f32.mxu1 %vm103_vm0, %v1004_v26  ;;  %v6998_v26 = vld [vmem:[%s11711_s1 + $0x78] sm:$0xff] }
 0x226   :  { %7938 = vmatmul.mubr.msk.f32.gmra.mxu0 %vm103_vm0, %v724_v27  ;;  %7994 = vmatmul.mubr.msk.f32.gmra.mxu1 %vm103_vm0, %v1005_v28  ;;  %v6993_v28 = vld [vmem:[%s11710_s6 + $0x68] sm:$0xff] }
 0x227   :  { %8003 = vmatprep.mubr.msk.f32.mxu1 %vm9046_vm2, %v9045_v53  ;;  %8000 = vmatprep.mubr.msk.f32.mxu0 %vm9046_vm2, %v9045_v53 }
 0x2ba   :  { %v7962_v30 = vpop.f32.mrf.mxu1  ;;  %v7906_v31 = vpop.f32.mrf.mxu0 }
 0x2bb   :  { %8004 = vmatmul.mubr.msk.f32.vlgmr.msra.gmra.mxu1 %vm269_vm1, %v7962_v30  ;;  %v6992_v30 = vld [vmem:[%s11710_s6 + $0x60] sm:$0xff] }
 0x2bc   :  { %v1144_v34 = vpop.f32.mrf.mxu1  ;;  %8006 = vmatprep.mubr.msk.f32.mxu1 %vm9046_vm2, %v9045_v53  ;;  %v863_v35 = vpop.f32.mrf.mxu0  ;;  %8010 = vmatpush3.msra.mxu1 %v1264_v29 }
 0x2bd   :  { %8001 = vmatmul.mubr.msk.f32.vlgmr.msra.gmra.mxu0 %vm269_vm1, %v1144_v34  ;;  %8011 = vmatprep.subr.mxu1 %v9045_v53 }
 0x2be   :  { %v7965_v37 = vpop.f32.mrf.mxu1  ;;  %v7909_v38 = vpop.f32.mrf.mxu0  ;;  %8012 = vmatpush3.msra.mxu1 %v1263_v32  ;;  %8023 = vmatpush3.msra.mxu0 %v6938_v33 }
 0x2bf   :  { %8024 = vmatprep.subr.mxu0 %v9045_v53  ;;  %8026 = vmatprep.mubr.msk.f32.mxu0 %vm9046_vm2, %v9045_v53 }
 0x2c0   :  { %v1154_v39 = vpop.f32.mrf.mxu1  ;;  %v873_v40 = vpop.f32.mrf.mxu0  ;;  %8025 = vmatpush3.msra.mxu0 %v6937_v36  ;;  %8035 = vmatprep.subr.mxu1 %v9045_v53 }
 0x2c1   :  { %8007 = vmatmul.mubr.msk.f32.gmra.mxu1 %vm269_vm1, %v1154_v39  ;;  %8027 = vmatmul.mubr.msk.f32.vlgmr.msra.gmra.mxu0 %vm269_vm1, %v7909_v38  ;;  %v7002_v39 = vld [vmem:[%s11710_s6 + $0x70] sm:$0xff] }
 0x2c2   :  { %8013 = vmatprep.mubr.msk.f32.mxu1 %vm9046_vm2, %v9045_v53  ;;  %v7912_v42 = vpop.f32.mrf.mxu0  ;;  %8029 = vmatprep.mubr.msk.f32.mxu0 %vm9046_vm2, %v9045_v53  ;;  %v7968_v52 = vpop.f32.mrf.mxu1 }
 0x2c3   :  { %8048 = vmatprep.subr.mxu0 %v9045_v53 }
 0x2c4   :  { %v883_v44 = vpop.f32.mrf.mxu0  ;;  %8049 = vmatpush3.msra.mxu0 %v6948_v41  ;;  %v1164_v57 = vpop.f32.mrf.mxu1 }
 0x2c5   :  { %8014 = vmatmul.mubr.msk.f32.vlgmr.msra.gmra.mxu1 %vm269_vm1, %v863_v35  ;;  %8030 = vmatmul.mubr.msk.f32.gmra.mxu0 %vm269_vm1, %v883_v44  ;;  %v2844_v44 = vld [vmem:[%s11712_s7 + $0x78] sm:$0xff] }
 0x2c6   :  { %8016 = vmatprep.mubr.msk.f32.mxu1 %vm9046_vm2, %v9045_v53  ;;  %8036 = vmatpush3.msra.mxu1 %v6943_v43  ;;  %v7915_v46 = vpop.f32.mrf.mxu0  ;;  %v7971_v59 = vpop.f32.mrf.mxu1 }
 0x2c7   :  { %8032 = vmatprep.mubr.msk.f32.mxu0 %vm9046_vm2, %v9045_v53  ;;  %8037 = vmatprep.subr.mxu1 %v9045_v53 }
 0x2c8   :  { %8038 = vmatpush3.msra.mxu1 %v6942_v45  ;;  %8050 = vmatprep.subr.mxu0 %v9045_v53  ;;  %v893_v48 = vpop.f32.mrf.mxu0  ;;  %v1174_v63 = vpop.f32.mrf.mxu1  ;;  %v2843_v45 = vld [vmem:[%s11712_s7 + $0x70] sm:$0xff] }
 0x2c9   :  { %8017 = vmatmul.mubr.msk.f32.gmra.mxu1 %vm269_vm1, %v7906_v31  ;;  %8033 = vmatmul.mubr.msk.f32.gmra.mxu0 %vm269_vm1, %v7912_v42  ;;  %v6997_v31 = vld [vmem:[%s11711_s1 + $0x70] sm:$0xff] }
 0x2ca   :  { %8019 = vmatprep.mubr.msk.f32.mxu1 %vm9046_vm2, %v9045_v53  ;;  %8051 = vmatpush3.msra.mxu0 %v6947_v47  ;;  %v7918_v50 = vpop.f32.mrf.mxu0  ;;  %v7974_v3 = vpop.f32.mrf.mxu1  ;;  %v2841_v47 = vld [vmem:[%s11712_s7 + $0x60] sm:$0xff] }
 0x2cb   :  { %8052 = vmatprep.mubr.msk.f32.mxu0 %vm9046_vm2, %v9045_v53  ;;  %8061 = vmatprep.subr.mxu1 %v9045_v53 }
 0x2cc   :  { %8074 = vmatprep.subr.mxu0 %v9045_v53  ;;  %v903_v56 = vpop.f32.mrf.mxu0  ;;  %v1184_v5 = vpop.f32.mrf.mxu1 }
 0x2cd   :  { %8020 = vmatmul.mubr.msk.f32.gmra.mxu1 %vm269_vm1, %v873_v40  ;;  %8053 = vmatmul.mubr.msk.f32.vlgmr.msra.gmra.mxu0 %vm269_vm1, %v893_v48  ;;  %v2840_v48 = vld [vmem:[%s11712_s7 + $0x58] sm:$0xff] }
 0x2ce   :  { %8039 = vmatprep.mubr.msk.f32.mxu1 %vm9046_vm2, %v9045_v53  ;;  %8055 = vmatprep.mubr.msk.f32.mxu0 %vm9046_vm2, %v9045_v53  ;;  %v7921_v58 = vpop.f32.mrf.mxu0  ;;  %v7977_v9 = vpop.f32.mrf.mxu1 }
 0x2cf   :  { %8075 = vmatpush3.msra.mxu0 %v6958_v49  ;;  %v2839_v49 = vld [vmem:[%s11712_s7 + $0x50] sm:$0xff] }
 0x2d0   :  { %8076 = vmatprep.subr.mxu0 %v9045_v53  ;;  %v913_v61 = vpop.f32.mrf.mxu0  ;;  %v1194_v13 = vpop.f32.mrf.mxu1 }
 0x2d1   :  { %8040 = vmatmul.mubr.msk.f32.vlgmr.msra.gmra.mxu1 %vm269_vm1, %v7965_v37  ;;  %8056 = vmatmul.mubr.msk.f32.gmra.mxu0 %vm269_vm1, %v7915_v46  ;;  %v7003_v37 = vld [vmem:[%s11710_s6 + $0x78] sm:$0xff]  ;;  %v2842_v46 = vld [vmem:[%s11712_s7 + $0x68] sm:$0xff] }
 0x2d2   :  { %8042 = vmatprep.mubr.msk.f32.mxu1 %vm9046_vm2, %v9045_v53  ;;  %8062 = vmatpush3.msra.mxu1 %v6953_v51  ;;  %v7924_v2 = vpop.f32.mrf.mxu0  ;;  %v7980_v15 = vpop.f32.mrf.mxu1  ;;  %v2837_v51 = vld [vmem:[%s11712_s7 + $0x40] sm:$0xff] }
 0x2d3   :  { %8058 = vmatprep.mubr.msk.f32.mxu0 %vm9046_vm2, %v9045_v53  ;;  %8063 = vmatprep.subr.mxu1 %v9045_v53 }
 0x2d4   :  { %8064 = vmatpush3.msra.mxu1 %v6952_v54  ;;  %8077 = vmatpush3.msra.mxu0 %v6957_v55  ;;  %v923_v4 = vpop.f32.mrf.mxu0  ;;  %v1204_v19 = vpop.f32.mrf.mxu1  ;;  %v2835_v54 = vld [vmem:[%s11712_s7 + $0x30] sm:$0xff]  ;;  %v2834_v55 = vld [vmem:[%s11712_s7 + $0x28] sm:$0xff] }
 0x2d5   :  { %8043 = vmatmul.mubr.msk.f32.gmra.mxu1 %vm269_vm1, %v1164_v57  ;;  %8059 = vmatmul.mubr.msk.f32.gmra.mxu0 %vm269_vm1, %v903_v56  ;;  %v2833_v56 = vld [vmem:[%s11712_s7 + $0x20] sm:$0xff]  ;;  %v2832_v57 = vld [vmem:[%s11712_s7 + $0x18] sm:$0xff] }
 0x2d6   :  { %8045 = vmatprep.mubr.msk.f32.mxu1 %vm9046_vm2, %v9045_v53  ;;  %8078 = vmatprep.mubr.msk.f32.mxu0 %vm9046_vm2, %v9045_v53  ;;  %v7927_v7 = vpop.f32.mrf.mxu0  ;;  %v7983_v23 = vpop.f32.mrf.mxu1 }
 0x2d7   :  { %8087 = vmatprep.subr.mxu1 %v9045_v53  ;;  %8100 = vmatprep.subr.mxu0 %v9045_v53 }
 0x2d8   :  { %v933_v12 = vpop.f32.mrf.mxu0  ;;  %v1214_v25 = vpop.f32.mrf.mxu1 }
 0x2d9   :  { %8046 = vmatmul.mubr.msk.f32.gmra.mxu1 %vm269_vm1, %v7968_v52  ;;  %8079 = vmatmul.mubr.msk.f32.vlgmr.msra.gmra.mxu0 %vm269_vm1, %v7918_v50  ;;  %v2838_v50 = vld [vmem:[%s11712_s7 + $0x48] sm:$0xff]  ;;  %v2836_v52 = vld [vmem:[%s11712_s7 + $0x38] sm:$0xff] }
 0x2da   :  { %8065 = vmatprep.mubr.msk.f32.mxu1 %vm9046_vm2, %v9045_v53  ;;  %8081 = vmatprep.mubr.msk.f32.mxu0 %vm9046_vm2, %v9045_v53  ;;  %v7930_v14 = vpop.f32.mrf.mxu0  ;;  %v7986_v29 = vpop.f32.mrf.mxu1 }
 0x2db   :  { %8101 = vmatpush3.msra.mxu0 %v6968_v60  ;;  %v2829_v60 = vld [vmem:[%s11712_s7] sm:$0xff] }
 0x2dc   :  { %8102 = vmatprep.subr.mxu0 %v9045_v53  ;;  %v943_v17 = vpop.f32.mrf.mxu0  ;;  %v1224_v33 = vpop.f32.mrf.mxu1 }
 0x2dd   :  { %8066 = vmatmul.mubr.msk.f32.vlgmr.msra.gmra.mxu1 %vm269_vm1, %v1174_v63  ;;  %8082 = vmatmul.mubr.msk.f32.gmra.mxu0 %vm269_vm1, %v913_v61 }
 0x2de   :  { %8068 = vmatprep.mubr.msk.f32.mxu1 %vm9046_vm2, %v9045_v53  ;;  %8088 = vmatpush3.msra.mxu1 %v6963_v62  ;;  %v7933_v22 = vpop.f32.mrf.mxu0  ;;  %v7989_v35 = vpop.f32.mrf.mxu1 }
 0x2df   :  { %8084 = vmatprep.mubr.msk.f32.mxu0 %vm9046_vm2, %v9045_v53  ;;  %8089 = vmatprep.subr.mxu1 %v9045_v53 }
 0x2e0   :  { %8090 = vmatpush3.msra.mxu1 %v6962_v0  ;;  %8103 = vmatpush3.msra.mxu0 %v6967_v1  ;;  %v953_v24 = vpop.f32.mrf.mxu0  ;;  %v1234_v38 = vpop.f32.mrf.mxu1 }
 0x2e1   :  { %8069 = vmatmul.mubr.msk.f32.gmra.mxu1 %vm269_vm1, %v7971_v59  ;;  %8085 = vmatmul.mubr.msk.f32.gmra.mxu0 %vm269_vm1, %v7921_v58  ;;  %v2831_v58 = vld [vmem:[%s11712_s7 + $0x10] sm:$0xff]  ;;  %v2830_v59 = vld [vmem:[%s11712_s7 + $0x8] sm:$0xff] }
 0x2e2   :  { %8071 = vmatprep.mubr.msk.f32.mxu1 %vm9046_vm2, %v9045_v53  ;;  %8104 = vmatprep.mubr.msk.f32.mxu0 %vm9046_vm2, %v9045_v53  ;;  %v7936_v27 = vpop.f32.mrf.mxu0  ;;  %v7992_v40 = vpop.f32.mrf.mxu1 }
 0x2e3   :  { %8113 = vmatprep.subr.mxu1 %v9045_v53  ;;  %8126 = vmatprep.subr.mxu0 %v9045_v53 }
 0x2e4   :  { %v963_v32 = vpop.f32.mrf.mxu0  ;;  %v1244_v41 = vpop.f32.mrf.mxu1 }
 0x2e5   :  { %8072 = vmatmul.mubr.msk.f32.gmra.mxu1 %vm269_vm1, %v1184_v5  ;;  %8105 = vmatmul.mubr.msk.f32.vlgmr.msra.gmra.mxu0 %vm269_vm1, %v923_v4 }
 0x2e6   :  { %8091 = vmatprep.mubr.msk.f32.mxu1 %vm9046_vm2, %v9045_v53  ;;  %8107 = vmatprep.mubr.msk.f32.mxu0 %vm9046_vm2, %v9045_v53  ;;  %v7939_v34 = vpop.f32.mrf.mxu0  ;;  %v7995_v42 = vpop.f32.mrf.mxu1 }
 0x2e7   :  { %8127 = vmatpush3.msra.mxu0 %v6978_v6 }
 0x2e8   :  { %8128 = vmatprep.subr.mxu0 %v9045_v53  ;;  %v973_v36 = vpop.f32.mrf.mxu0  ;;  %v1254_v43 = vpop.f32.mrf.mxu1 }
 0x2e9   :  { %8092 = vmatmul.mubr.msk.f32.vlgmr.msra.gmra.mxu1 %vm269_vm1, %v7974_v3  ;;  %8108 = vmatmul.mubr.msk.f32.gmra.mxu0 %vm269_vm1, %v7924_v2 }
 0x2ea   :  { %8094 = vmatprep.mubr.msk.f32.mxu1 %vm9046_vm2, %v9045_v53  ;;  %8114 = vmatpush3.msra.mxu1 %v6973_v8 }
 0x2eb   :  { %8110 = vmatprep.mubr.msk.f32.mxu0 %vm9046_vm2, %v9045_v53  ;;  %8115 = vmatprep.subr.mxu1 %v9045_v53 }
 0x2ec   :  { %8116 = vmatpush3.msra.mxu1 %v6972_v10  ;;  %8129 = vmatpush3.msra.mxu0 %v6977_v11 }
 0x2ed   :  { %8095 = vmatmul.mubr.msk.f32.gmra.mxu1 %vm269_vm1, %v1194_v13  ;;  %8111 = vmatmul.mubr.msk.f32.gmra.mxu0 %vm269_vm1, %v933_v12 }
 0x2ee   :  { %8097 = vmatprep.mubr.msk.f32.mxu1 %vm9046_vm2, %v9045_v53  ;;  %8130 = vmatprep.mubr.msk.f32.mxu0 %vm9046_vm2, %v9045_v53 }
 0x2ef   :  { %8139 = vmatprep.subr.mxu1 %v9045_v53  ;;  %8152 = vmatprep.subr.mxu0 %v9045_v53 }
 0x2f1   :  { %8098 = vmatmul.mubr.msk.f32.gmra.mxu1 %vm269_vm1, %v7977_v9  ;;  %8131 = vmatmul.mubr.msk.f32.vlgmr.msra.gmra.mxu0 %vm269_vm1, %v7927_v7 }
 0x2f2   :  { %8117 = vmatprep.mubr.msk.f32.mxu1 %vm9046_vm2, %v9045_v53  ;;  %8133 = vmatprep.mubr.msk.f32.mxu0 %vm9046_vm2, %v9045_v53 }
 0x2f3   :  { %8153 = vmatpush3.msra.mxu0 %v6988_v16 }
 0x2f4   :  { %8154 = vmatprep.subr.mxu0 %v9045_v53 }
 0x2f5   :  { %8118 = vmatmul.mubr.msk.f32.vlgmr.msra.gmra.mxu1 %vm269_vm1, %v1204_v19  ;;  %8134 = vmatmul.mubr.msk.f32.gmra.mxu0 %vm269_vm1, %v943_v17 }
 0x2f6   :  { %8120 = vmatprep.mubr.msk.f32.mxu1 %vm9046_vm2, %v9045_v53  ;;  %8140 = vmatpush3.msra.mxu1 %v6983_v18 }
 0x2f7   :  { %8136 = vmatprep.mubr.msk.f32.mxu0 %vm9046_vm2, %v9045_v53  ;;  %8141 = vmatprep.subr.mxu1 %v9045_v53 }
 0x2f8   :  { %8142 = vmatpush3.msra.mxu1 %v6982_v20  ;;  %8155 = vmatpush3.msra.mxu0 %v6987_v21 }
 0x2f9   :  { %8121 = vmatmul.mubr.msk.f32.gmra.mxu1 %vm269_vm1, %v7980_v15  ;;  %8137 = vmatmul.mubr.msk.f32.gmra.mxu0 %vm269_vm1, %v7930_v14 }
 0x2fa   :  { %8123 = vmatprep.mubr.msk.f32.mxu1 %vm9046_vm2, %v9045_v53  ;;  %8156 = vmatprep.mubr.msk.f32.mxu0 %vm9046_vm2, %v9045_v53 }
 0x2fb   :  { %8165 = vmatprep.subr.mxu1 %v9045_v53  ;;  %8178 = vmatprep.subr.mxu0 %v9045_v53 }
 0x2fd   :  { %8124 = vmatmul.mubr.msk.f32.gmra.mxu1 %vm269_vm1, %v1214_v25  ;;  %8157 = vmatmul.mubr.msk.f32.vlgmr.msra.gmra.mxu0 %vm269_vm1, %v953_v24 }
 0x2fe   :  { %8143 = vmatprep.mubr.msk.f32.mxu1 %vm9046_vm2, %v9045_v53  ;;  %8159 = vmatprep.mubr.msk.f32.mxu0 %vm9046_vm2, %v9045_v53 }
 0x2ff   :  { %8179 = vmatpush3.msra.mxu0 %v6998_v26 }
 0x300   :  { %8180 = vmatprep.subr.mxu0 %v9045_v53 }
 0x301   :  { %8144 = vmatmul.mubr.msk.f32.vlgmr.msra.gmra.mxu1 %vm269_vm1, %v7983_v23  ;;  %8160 = vmatmul.mubr.msk.f32.gmra.mxu0 %vm269_vm1, %v7933_v22 }
 0x302   :  { %8146 = vmatprep.mubr.msk.f32.mxu1 %vm9046_vm2, %v9045_v53  ;;  %8166 = vmatpush3.msra.mxu1 %v6993_v28 }
 0x303   :  { %8162 = vmatprep.mubr.msk.f32.mxu0 %vm9046_vm2, %v9045_v53  ;;  %8167 = vmatprep.subr.mxu1 %v9045_v53 }
 0x304   :  { %8168 = vmatpush3.msra.mxu1 %v6992_v30  ;;  %8181 = vmatpush3.msra.mxu0 %v6997_v31 }
 0x305   :  { %8147 = vmatmul.mubr.msk.f32.gmra.mxu1 %vm269_vm1, %v1224_v33  ;;  %8163 = vmatmul.mubr.msk.f32.gmra.mxu0 %vm269_vm1, %v963_v32 }
 0x306   :  { %8149 = vmatprep.mubr.msk.f32.mxu1 %vm9046_vm2, %v9045_v53  ;;  %8182 = vmatprep.mubr.msk.f32.mxu0 %vm9046_vm2, %v9045_v53 }
 0x307   :  { %8191 = vmatprep.subr.mxu1 %v9045_v53  ;;  %2871 = vmatprep.subr.mxu0 %v2844_v44 }
 0x309   :  { %8150 = vmatmul.mubr.msk.f32.gmra.mxu1 %vm269_vm1, %v7986_v29  ;;  %8183 = vmatmul.mubr.msk.f32.vlgmr.msra.gmra.mxu0 %vm269_vm1, %v7936_v27 }
 0x30a   :  { %8169 = vmatprep.mubr.msk.f32.mxu1 %vm9046_vm2, %v9045_v53  ;;  %8185 = vmatprep.mubr.msk.f32.mxu0 %vm9046_vm2, %v9045_v53 }
 0x30b   :  { %2872 = vmatpush1.msra.mxu0 %v2843_v45 }
 0x30c   :  { %2873 = vmatprep.subr.mxu0 %v2842_v46 }
 0x30d   :  { %8170 = vmatmul.mubr.msk.f32.vlgmr.msra.gmra.mxu1 %vm269_vm1, %v1234_v38  ;;  %8186 = vmatmul.mubr.msk.f32.gmra.mxu0 %vm269_vm1, %v973_v36 }
 0x30e   :  { %8172 = vmatprep.mubr.msk.f32.mxu1 %vm9046_vm2, %v9045_v53  ;;  %8192 = vmatpush3.msra.mxu1 %v7003_v37 }
 0x30f   :  { %8188 = vmatprep.mubr.msk.f32.mxu0 %vm9046_vm2, %v9045_v53  ;;  %8193 = vmatprep.subr.mxu1 %v9045_v53 }
 0x310   :  { %8194 = vmatpush3.msra.mxu1 %v7002_v39  ;;  %2874 = vmatpush1.msra.mxu0 %v2841_v47 }
 0x311   :  { %8173 = vmatmul.mubr.msk.f32.gmra.mxu1 %vm269_vm1, %v7989_v35  ;;  %8189 = vmatmul.mubr.msk.f32.gmra.mxu0 %vm269_vm1, %v7939_v34 }
 0x312   :  { %8175 = vmatprep.mubr.msk.f32.mxu1 %vm9046_vm2, %v9045_v53  ;;  %2919 = vmatprep.mubr.f32.mxu0 %v9045_v53 }
 0x313   :  { %8204 = vmatprep.subr.mxu1 %v9045_v53  ;;  %2875 = vmatprep.subr.mxu0 %v2840_v48 }
 0x314   :  { %2876 = vmatpush1.msra.mxu0 %v2839_v49 }
 0x315   :  { %8176 = vmatmul.mubr.msk.f32.gmra.mxu1 %vm269_vm1, %v1244_v41  ;;  %2877 = vmatprep.subr.mxu0 %v2838_v50 }
 0x316   :  { %8195 = vmatprep.mubr.msk.f32.mxu1 %vm9046_vm2, %v9045_v53  ;;  %2878 = vmatpush1.msra.mxu0 %v2837_v51 }
 0x317   :  { %2879 = vmatprep.subr.mxu0 %v2836_v52 }
 0x318   :  { %2880 = vmatpush1.msra.mxu0 %v2835_v54 }
 0x319   :  { %8196 = vmatmul.mubr.msk.f32.vlgmr.msra.gmra.mxu1 %vm269_vm1, %v7992_v40  ;;  %2881 = vmatprep.subr.mxu0 %v2834_v55 }
 0x31a   :  { %8198 = vmatprep.mubr.msk.f32.mxu1 %vm9046_vm2, %v9045_v53  ;;  %2882 = vmatpush1.msra.mxu0 %v2833_v56 }
 0x31b   :  { %2883 = vmatprep.subr.mxu0 %v2832_v57 }
 0x31c   :  { %2884 = vmatpush1.msra.mxu0 %v2831_v58 }
 0x31d   :  { %8199 = vmatmul.mubr.msk.f32.gmra.mxu1 %vm269_vm1, %v1254_v43  ;;  %2885 = vmatprep.subr.mxu0 %v2830_v59 }
 0x31e   :  { %8201 = vmatprep.mubr.msk.f32.mxu1 %vm9046_vm2, %v9045_v53  ;;  %2886 = vmatpush1.msra.mxu0 %v2829_v60 }
 0x31f   :  { %8219 = vmatprep.subr.mxu0 %v9045_v53 }
 0x321   :  { %8202 = vmatmul.mubr.msk.f32.gmra.mxu1 %vm269_vm1, %v7995_v42 }
 0x322   :  { %8210 = vmatprep.mubr.msk.f32.mxu1 %vm9046_vm2, %v9045_v53 }
 0x37b   :  { %v1347_v61 = vpop.f32.mrf.mxu1 }
 0x37d   :  { %v1342_v62 = vpop.f32.mrf.mxu0  ;;  %v8005_v63 = vpop.f32.mrf.mxu1 }
 0x37f   :  { %v8002_v0 = vpop.f32.mrf.mxu0 }
 0x381   :  { %v1352_v1 = vpop.f32.mrf.mxu1  ;;  %v1523_v2 = vpop.f32.mrf.mxu0 }
 0x383   :  { %v8008_v3 = vpop.f32.mrf.mxu1  ;;  %v8028_v4 = vpop.f32.mrf.mxu0 }
 0x385   :  { %v1431_v5 = vpop.f32.mrf.mxu1  ;;  %v1528_v6 = vpop.f32.mrf.mxu0 }
 0x386   :  { %v1432_v49 = vadd.f32 %v1431_v5, %v1342_v62 }
 0x387   :  { %v8015_v7 = vpop.f32.mrf.mxu1  ;;  %v8031_v8 = vpop.f32.mrf.mxu0 }
 0x388   :  { %v1537_v55 = vadd.f32 %v1523_v2, %v1432_v49 }
 0x389   :  { %v1436_v9 = vpop.f32.mrf.mxu1  ;;  %v1533_v10 = vpop.f32.mrf.mxu0 }
 0x38a   :  { %v1437_v56 = vadd.f32 %v1436_v9, %v1347_v61 }
 0x38b   :  { %v8018_v11 = vpop.f32.mrf.mxu1  ;;  %v8034_v12 = vpop.f32.mrf.mxu0 }
 0x38c   :  { %v1538_v0 = vadd.f32 %v1528_v6, %v1437_v56 }
 0x38d   :  { %v1441_v13 = vpop.f32.mrf.mxu1  ;;  %v1713_v14 = vpop.f32.mrf.mxu0 }
 0x38e   :  { %v1442_v3 = vadd.f32 %v1441_v13, %v1352_v1 }
 0x38f   :  { %v8021_v15 = vpop.f32.mrf.mxu1  ;;  %v8054_v16 = vpop.f32.mrf.mxu0 }
 0x390   :  { %v1539_v62 = vadd.f32 %v1533_v10, %v1442_v3 }
 0x391   :  { %v1618_v17 = vpop.f32.mrf.mxu1  ;;  %v1718_v18 = vpop.f32.mrf.mxu0 }
 0x392   :  { %v1632_v59 = vadd.f32 %v1618_v17, %v1537_v55 }
 0x393   :  { %v8041_v19 = vpop.f32.mrf.mxu1  ;;  %v8057_v20 = vpop.f32.mrf.mxu0 }
 0x394   :  { %v1727_v8 = vadd.f32 %v1713_v14, %v1632_v59 }
 0x395   :  { %v1623_v21 = vpop.f32.mrf.mxu1  ;;  %v1723_v22 = vpop.f32.mrf.mxu0 }
 0x396   :  { %v1633_v11 = vadd.f32 %v1623_v21, %v1538_v0 }
 0x397   :  { %v8044_v23 = vpop.f32.mrf.mxu1  ;;  %v8060_v24 = vpop.f32.mrf.mxu0 }
 0x398   :  { %v1728_v20 = vadd.f32 %v1718_v18, %v1633_v11 }
 0x399   :  { %v1628_v25 = vpop.f32.mrf.mxu1  ;;  %v1903_v26 = vpop.f32.mrf.mxu0 }
 0x39a   :  { %v1634_v2 = vadd.f32 %v1628_v25, %v1539_v62 }
 0x39b   :  { %v8047_v27 = vpop.f32.mrf.mxu1  ;;  %v8080_v28 = vpop.f32.mrf.mxu0 }
 0x39c   :  { %v1729_v6 = vadd.f32 %v1723_v22, %v1634_v2 }
 0x39d   :  { %v1808_v29 = vpop.f32.mrf.mxu1  ;;  %v1908_v30 = vpop.f32.mrf.mxu0 }
 0x39e   :  { %v1822_v5 = vadd.f32 %v1808_v29, %v1727_v8 }
 0x39f   :  { %v8067_v31 = vpop.f32.mrf.mxu1  ;;  %v8083_v32 = vpop.f32.mrf.mxu0 }
 0x3a0   :  { %v1917_v23 = vadd.f32 %v1903_v26, %v1822_v5 }
 0x3a1   :  { %v1813_v33 = vpop.f32.mrf.mxu1  ;;  %v1913_v34 = vpop.f32.mrf.mxu0 }
 0x3a2   :  { %v1823_v17 = vadd.f32 %v1813_v33, %v1728_v20 }
 0x3a3   :  { %v8070_v35 = vpop.f32.mrf.mxu1  ;;  %v8086_v36 = vpop.f32.mrf.mxu0 }
 0x3a4   :  { %v1918_v14 = vadd.f32 %v1908_v30, %v1823_v17 }
 0x3a5   :  { %v1818_v37 = vpop.f32.mrf.mxu1  ;;  %v2093_v38 = vpop.f32.mrf.mxu0 }
 0x3a6   :  { %v1824_v21 = vadd.f32 %v1818_v37, %v1729_v6 }
 0x3a7   :  { %v8073_v39 = vpop.f32.mrf.mxu1  ;;  %v8106_v40 = vpop.f32.mrf.mxu0 }
 0x3a8   :  { %v1919_v18 = vadd.f32 %v1913_v34, %v1824_v21  ;;  %v2957_v21 = vld [vmem:[%s11714_s30 + $0x8] sm:$0xff] }
 0x3a9   :  { %v1998_v41 = vpop.f32.mrf.mxu1  ;;  %v2098_v42 = vpop.f32.mrf.mxu0 }
 0x3aa   :  { %v2012_v1 = vadd.f32 %v1998_v41, %v1917_v23 }
 0x3ab   :  { %v8093_v43 = vpop.f32.mrf.mxu1  ;;  %v8109_v44 = vpop.f32.mrf.mxu0 }
 0x3ac   :  { %v2107_v10 = vadd.f32 %v2093_v38, %v2012_v1 }
 0x3ad   :  { %v2003_v45 = vpop.f32.mrf.mxu1  ;;  %v2103_v46 = vpop.f32.mrf.mxu0 }
 0x3ae   :  { %v2013_v29 = vadd.f32 %v2003_v45, %v1918_v14  ;;  %v7016_v14 = vld [vmem:[%s11714_s30 + $0x18] sm:$0xff] }
 0x3af   :  { %v8096_v47 = vpop.f32.mrf.mxu1  ;;  %v8112_v48 = vpop.f32.mrf.mxu0 }
 0x3b0   :  { %v2108_v26 = vadd.f32 %v2098_v42, %v2013_v29  ;;  %v7023_v29 = vld [vmem:[%s11714_s30 + $0x30] sm:$0xff] }
 0x3b1   :  { %v2008_v50 = vpop.f32.mrf.mxu1  ;;  %v2283_v51 = vpop.f32.mrf.mxu0 }
 0x3b2   :  { %v2014_v33 = vadd.f32 %v2008_v50, %v1919_v18  ;;  %v3302_v18 = vld [vmem:[%s11661_s13 + $0x78] sm:$0xff] }
 0x3b3   :  { %v8099_v52 = vpop.f32.mrf.mxu1  ;;  %v8132_v54 = vpop.f32.mrf.mxu0 }
 0x3b4   :  { %v2109_v30 = vadd.f32 %v2103_v46, %v2014_v33  ;;  %v3297_v33 = vld [vmem:[%s11661_s13 + $0x50] sm:$0xff] }
 0x3b5   :  { %v2188_v57 = vpop.f32.mrf.mxu1  ;;  %v2288_v58 = vpop.f32.mrf.mxu0 }
 0x3b6   :  { %v2202_v25 = vadd.f32 %v2188_v57, %v2107_v10  ;;  %v7018_v10 = vld [vmem:[%s11714_s30 + $0x28] sm:$0x3] }
 0x3b7   :  { %v8119_v60 = vpop.f32.mrf.mxu1  ;;  %v8135_v63 = vpop.f32.mrf.mxu0 }
 0x3b8   :  { %v2297_v22 = vadd.f32 %v2283_v51, %v2202_v25  ;;  %v3301_v25 = vld [vmem:[%s11661_s13 + $0x70] sm:$0xff] }
 0x3b9   :  { %v2193_v4 = vpop.f32.mrf.mxu1  ;;  %v2293_v7 = vpop.f32.mrf.mxu0 }
 0x3ba   :  { %v2203_v41 = vadd.f32 %v2193_v4, %v2108_v26  ;;  %v3298_v26 = vld [vmem:[%s11661_s13 + $0x58] sm:$0xff] }
 0x3bb   :  { %v8122_v12 = vpop.f32.mrf.mxu1  ;;  %v8138_v15 = vpop.f32.mrf.mxu0 }
 0x3bc   :  { %v2298_v38 = vadd.f32 %v2288_v58, %v2203_v41  ;;  %v7007_v58 = vld [vmem:[%s11713_s2] ss:$0 sm:$0xff]  ;;  %v3293_v41 = vld [vmem:[%s11661_s13 + $0x30] sm:$0xff] }
 0x3bd   :  { %v2198_v16 = vpop.f32.mrf.mxu1  ;;  %v2473_v19 = vpop.f32.mrf.mxu0 }
 0x3be   :  { %v2204_v45 = vadd.f32 %v2198_v16, %v2109_v30  ;;  %v3290_v30 = vld [vmem:[%s11661_s13 + $0x18] sm:$0xff] }
 0x3bf   :  { %v8125_v61 = vpop.f32.mrf.mxu1  ;;  %v8158_v9 = vpop.f32.mrf.mxu0 }
 0x3c0   :  { %v2299_v42 = vadd.f32 %v2293_v7, %v2204_v45 }
 0x3c1   :  { %v2378_v24 = vpop.f32.mrf.mxu1  ;;  %v2478_v27 = vpop.f32.mrf.mxu0 }
 0x3c2   :  { %v2392_v37 = vadd.f32 %v2378_v24, %v2297_v22  ;;  %v3294_v22 = vld [vmem:[%s11661_s13 + $0x38] sm:$0xff] }
 0x3c3   :  { %v8145_v13 = vpop.f32.mrf.mxu1  ;;  %v8161_v28 = vpop.f32.mrf.mxu0 }
 0x3c4   :  { %v2487_v34 = vadd.f32 %v2473_v19, %v2392_v37  ;;  %v2956_v28 = vld [vmem:[%s11714_s30] sm:$0xff]  ;;  %v3289_v37 = vld [vmem:[%s11661_s13 + $0x10] sm:$0xff] }
 0x3c5   :  { %v2383_v31 = vpop.f32.mrf.mxu1  ;;  %v2483_v32 = vpop.f32.mrf.mxu0 }
 0x3c6   :  { %v2393_v56 = vadd.f32 %v2383_v31, %v2298_v38  ;;  %v7017_v31 = vld [vmem:[%s11714_s30 + $0x20] sm:$0xff]  ;;  %v2940_v38 = vlaneseq }
 0x3c7   :  { %v8148_v35 = vpop.f32.mrf.mxu1  ;;  %v8164_v36 = vpop.f32.mrf.mxu0 }
 0x3c8   :  { %v2488_v63 = vadd.f32 %v2478_v27, %v2393_v56  ;;  %v7024_v35 = vld [vmem:[%s11714_s30 + $0x38] sm:$0xff]  ;;  %v7025_v36 = vld [vmem:[%s11714_s30 + $0x40] sm:$0x3]  ;;  %v9984_v45 = vshrl.u32 %v2940_v38, 7 }
 0x3c9   :  { %v2388_v39 = vpop.f32.mrf.mxu1  ;;  %v2663_v40 = vpop.f32.mrf.mxu0 }
 0x3ca   :  { %v2394_v51 = vadd.f32 %v2388_v39, %v2299_v42  ;;  %v3300_v39 = vld [vmem:[%s11661_s13 + $0x68] sm:$0xff]  ;;  %11715 = vst [vmem:[#allocation3_spill] sm:$0xff] %v9984_v45 }
 0x3cb   :  { %v8151_v43 = vpop.f32.mrf.mxu1  ;;  %v8184_v44 = vpop.f32.mrf.mxu0 }
 0x3cc   :  { %v2489_v8 = vadd.f32 %v2483_v32, %v2394_v51  ;;  %v2958_v32 = vld [vmem:[%s11714_s30 + $0x10] sm:$0x3]  ;;  %v3296_v43 = vld [vmem:[%s11661_s13 + $0x48] sm:$0xff]  ;;  %v3295_v44 = vld [vmem:[%s11661_s13 + $0x40] sm:$0xff] }
 0x3cd   :  { %v2568_v47 = vpop.f32.mrf.mxu1  ;;  %v2668_v48 = vpop.f32.mrf.mxu0 }
 0x3ce   :  { %v2582_v50 = vadd.f32 %v2568_v47, %v2487_v34  ;;  %v3292_v47 = vld [vmem:[%s11661_s13 + $0x28] sm:$0xff]  ;;  %v11689_v34 = vsub.s32 2, %v9984_v45 }
 0x3cf   :  { %v8171_v49 = vpop.f32.mrf.mxu1  ;;  %v8187_v52 = vpop.f32.mrf.mxu0 }
 0x3d0   :  { %v2677_v3 = vadd.f32 %v2663_v40, %v2582_v50  ;;  %v3299_v40 = vld [vmem:[%s11661_s13 + $0x60] sm:$0xff]  ;;  %v3288_v49 = vld [vmem:[%s11661_s13 + $0x8] sm:$0xff] }
 0x3d1   :  { %v2573_v54 = vpop.f32.mrf.mxu1  ;;  %v2673_v55 = vpop.f32.mrf.mxu0  ;;  %v3287_v52 = vld [vmem:[%s11661_s13] sm:$0xff] }
 0x3d2   :  { %v2583_v4 = vadd.f32 %v2573_v54, %v2488_v63  ;;  %v11690_v54 = vsub.s32 3, %v9984_v45 }
 0x3d3   :  { %v8174_v57 = vpop.f32.mrf.mxu1  ;;  %v8190_v59 = vpop.f32.mrf.mxu0 }
 0x3d4   :  { %v2678_v15 = vadd.f32 %v2668_v48, %v2583_v4  ;;  %v3291_v48 = vld [vmem:[%s11661_s13 + $0x20] sm:$0xff] }
 0x3d5   :  { %v2578_v60 = vpop.f32.mrf.mxu1 }
 0x3d6   :  { %v2584_v62 = vadd.f32 %v2578_v60, %v2489_v8  ;;  %v11688_v60 = vsub.s32 1, %v9984_v45 }
 0x3d7   :  { %v8177_v0 = vpop.f32.mrf.mxu1 }
 0x3d8   :  { %v2679_v20 = vadd.f32 %v2673_v55, %v2584_v62  ;;  %v2938_v55 = vld [vmem:[%s11662_s11] sm:$0xf] }
 0x3d9   :  { %v2758_v46 = vpop.f32.mrf.mxu1  ;;  %v2943_v56 = vrot.slane %v2938_v55, %v11690_v54  ;;  %v3056_v42 = vrot.slane %v2938_v55, %v11689_v34  ;;  %v4368_v34 = vld [vmem:[%s11669_s16 + $0x78] sm:$0xff] }
 0x3da   :  { %v2772_v11 = vadd.f32 %v2758_v46, %v2677_v3  ;;  %v7011_v3 = vld [vmem:[%s11663_s12] ss:$0 sm:$0xff] }
 0x3db   :  { %v8197_v12 = vpop.f32.mrf.mxu1 }
 0x3dc   :  { %v2782_v5 = vadd.f32 %v7007_v58, %v2772_v11  ;;  %v11687_v11 = vsub.s32 0, %v9984_v45  ;;  %v4367_v45 = vld [vmem:[%s11669_s16 + $0x70] sm:$0xff] }
 0x3dd   :  { %v2763_v7 = vpop.f32.mrf.mxu1 }
 0x3de   :  { %v2773_v16 = vadd.f32 %v2763_v7, %v2678_v15  ;;  %7008 = vmatmul.mubr.msk.f32.vlgmr.msra.gmra.mxu0 %vm2845_vm3, %v2782_v5 }
 0x3df   :  { %v8200_v19 = vpop.f32.mrf.mxu1  ;;  %2925 = vmatprep.mubr.f32.mxu0 %v9045_v53 }
 0x3e0   :  { %v2783_v2 = vadd.f32 %v7007_v58, %v2773_v16 }
 0x3e1   :  { %v2768_v61 = vpop.f32.mrf.mxu1 }
 0x3e2   :  { %v2774_v9 = vadd.f32 %v2768_v61, %v2679_v20  ;;  %7009 = vmatmul.mubr.msk.f32.gmra.mxu0 %vm2845_vm3, %v2783_v2  ;;  %v3262_v61 = vrot.slane %v2938_v55, %v11687_v11 }
 0x3e3   :  { %v8203_v23 = vpop.f32.mrf.mxu1  ;;  %2931 = vmatprep.mubr.f32.mxu0 %v9045_v53 }
 0x3e4   :  { %v2784_v17 = vadd.f32 %v7007_v58, %v2774_v9  ;;  %v3159_v58 = vrot.slane %v2938_v55, %v11688_v60 }
 0x3e6   :  { %7010 = vmatmul.mubr.msk.f32.gmra.mxu0 %vm2845_vm3, %v2784_v17 }
 0x3e7   :  { %8225 = vmatprep.mubr.msk.f32.mxu0 %vm9046_vm2, %v9045_v53 }
 0x49e   :  { %v9839_v24 = vpop.f32.mrf.mxu0 }
 0x49f   :  { %v2944_v51 = vmul.f32 %v2943_v56, %v9839_v24 }
 0x4a0   :  { %v9841_v27 = vpop.f32.mrf.mxu0 }
 0x4a1   :  { %v2953_v62 = vadd.f32 %v7011_v3, %v2944_v51 }
 0x4a2   :  { %v9843_v6 = vpop.f32.mrf.mxu0 }
 0x4a3   :  { %v2945_v12 = vmul.f32 %v2943_v56, %v9843_v6 }
 0x4a4   :  { %v9845_v1 = vpop.f32.mrf.mxu0 }
 0x4a5   :  { %v2954_v9 = vadd.f32 %v7011_v3, %v2945_v12  ;;  %v10035_v12 = vld [vmem:[%s11665_s22 + $0x8] sm:$0xff] }
 0x4a6   :  { %v9847_v13 = vpop.f32.mrf.mxu0 }
 0x4a7   :  { %8205 = vmatpush3.msk.msra.mxu1 %vm2969_vm4, %v9847_v13  ;;  %8220 = vmatpush3.msk.msra.mxu0 %vm2969_vm4, %v9847_v13  ;;  %v2946_v17 = vmul.f32 %v2943_v56, %v9847_v13 }
 0x4a8   :  { %8206 = vmatprep.subr.mxu1 %v9045_v53  ;;  %8221 = vmatprep.subr.mxu0 %v9045_v53  ;;  %v9993_v57 = vpop.f32.mrf.mxu0 }
 0x4a9   :  { %8207 = vmatpush3.msra.mxu1 %v9843_v6  ;;  %8222 = vmatpush3.msra.mxu0 %v9843_v6 }
 0x4aa   :  { %8208 = vmatprep.subr.mxu1 %v9045_v53  ;;  %8223 = vmatprep.subr.mxu0 %v9045_v53 }
 0x4ab   :  { %8209 = vmatpush3.msra.mxu1 %v9839_v24  ;;  %8224 = vmatpush3.msra.mxu0 %v9839_v24 }
 0x4ac   :  { %8211 = vmatmul.mubr.msk.f32.vlgmr.msra.gmra.mxu1 %vm2959_vm5, %v2956_v28  ;;  %8234 = vmatprep.subr.mxu1 %v9045_v53 }
 0x4ad   :  { %8235 = vmatpush3.msk.msra.mxu1 %vm2969_vm4, %v9847_v13  ;;  %8226 = vmatmul.mubr.msk.f32.vlgmr.msra.gmra.mxu0 %vm2959_vm5, %v7016_v14 }
 0x4ae   :  { %8236 = vmatprep.subr.mxu1 %v9045_v53  ;;  %8213 = vmatprep.mubr.msk.f32.mxu1 %vm9046_vm2, %v9045_v53 }
 0x4af   :  { %8237 = vmatpush3.msra.mxu1 %v9843_v6  ;;  %8228 = vmatprep.mubr.msk.f32.mxu0 %vm9046_vm2, %v9045_v53 }
 0x4b0   :  { %8214 = vmatmul.mubr.msk.f32.gmra.mxu1 %vm2959_vm5, %v2957_v21  ;;  %8238 = vmatprep.subr.mxu1 %v9045_v53 }
 0x4b1   :  { %8239 = vmatpush3.msra.mxu1 %v9839_v24  ;;  %8229 = vmatmul.mubr.msk.f32.gmra.mxu0 %vm2959_vm5, %v7017_v31 }
 0x4b2   :  { %8216 = vmatprep.mubr.msk.f32.mxu1 %vm9046_vm2, %v9045_v53  ;;  %8231 = vmatprep.mubr.msk.f32.mxu0 %vm9046_vm2, %v9045_v53 }
 0x4b3   :  { %8249 = vmatprep.subr.mxu0 %v9045_v53 }
 0x4b4   :  { %8217 = vmatmul.mubr.msk.f32.gmra.mxu1 %vm2959_vm5, %v2958_v32  ;;  %8250 = vmatpush3.msra.mxu0 %v3302_v18 }
 0x4b5   :  { %8232 = vmatmul.mubr.msk.f32.gmra.mxu0 %vm2959_vm5, %v7018_v10  ;;  %8240 = vmatprep.mubr.msk.f32.mxu1 %vm9046_vm2, %v9045_v53 }
 0x4b6   :  { %8281 = vmatprep.mubr.msk.f32.mxu0 %vm9046_vm2, %v9045_v53  ;;  %8251 = vmatprep.subr.mxu0 %v9045_v53 }
 0x4b7   :  { %8252 = vmatpush3.msra.mxu0 %v3301_v25 }
 0x4b8   :  { %8241 = vmatmul.mubr.msk.f32.vlgmr.msra.gmra.mxu1 %vm2959_vm5, %v7023_v29  ;;  %8253 = vmatprep.subr.mxu0 %v9045_v53  ;;  %v2955_v29 = vadd.f32 %v7011_v3, %v2946_v17  ;;  %v10119_v17 = vld [vmem:[%s11665_s22 + $0x60] sm:$0xff] }
 0x4b9   :  { %8243 = vmatprep.mubr.msk.f32.mxu1 %vm9046_vm2, %v9045_v53  ;;  %8254 = vmatpush3.msra.mxu0 %v3300_v39 }
 0x4ba   :  { %8255 = vmatprep.subr.mxu0 %v9045_v53 }
 0x4bb   :  { %8256 = vmatpush3.msra.mxu0 %v3299_v40 }
 0x4bc   :  { %8244 = vmatmul.mubr.msk.f32.gmra.mxu1 %vm2959_vm5, %v7024_v35  ;;  %8257 = vmatprep.subr.mxu0 %v9045_v53 }
 0x4bd   :  { %8246 = vmatprep.mubr.msk.f32.mxu1 %vm9046_vm2, %v9045_v53  ;;  %8258 = vmatpush3.msra.mxu0 %v3298_v26 }
 0x4be   :  { %8259 = vmatprep.subr.mxu0 %v9045_v53 }
 0x4bf   :  { %8260 = vmatpush3.msra.mxu0 %v3297_v33 }
 0x4c0   :  { %8247 = vmatmul.mubr.msk.f32.gmra.mxu1 %vm2959_vm5, %v7025_v36  ;;  %8261 = vmatprep.subr.mxu0 %v9045_v53 }
 0x4c1   :  { %8262 = vmatpush3.msra.mxu0 %v3296_v43 }
 0x4c2   :  { %8263 = vmatprep.subr.mxu0 %v9045_v53 }
 0x4c3   :  { %8264 = vmatpush3.msra.mxu0 %v3295_v44 }
 0x4c4   :  { %8265 = vmatprep.subr.mxu0 %v9045_v53 }
 0x4c5   :  { %8266 = vmatpush3.msra.mxu0 %v3294_v22 }
 0x4c6   :  { %8267 = vmatprep.subr.mxu0 %v9045_v53 }
 0x4c7   :  { %8268 = vmatpush3.msra.mxu0 %v3293_v41 }
 0x4c8   :  { %8269 = vmatprep.subr.mxu0 %v9045_v53 }
 0x4c9   :  { %8270 = vmatpush3.msra.mxu0 %v3292_v47 }
 0x4ca   :  { %8271 = vmatprep.subr.mxu0 %v9045_v53 }
 0x4cb   :  { %8272 = vmatpush3.msra.mxu0 %v3291_v48 }
 0x4cc   :  { %8273 = vmatprep.subr.mxu0 %v9045_v53 }
 0x4cd   :  { %8274 = vmatpush3.msra.mxu0 %v3290_v30 }
 0x4ce   :  { %8275 = vmatprep.subr.mxu0 %v9045_v53 }
 0x4cf   :  { %8276 = vmatpush3.msra.mxu0 %v3289_v37 }
 0x4d0   :  { %8277 = vmatprep.subr.mxu0 %v9045_v53 }
 0x4d1   :  { %8278 = vmatpush3.msra.mxu0 %v3288_v49 }
 0x4d2   :  { %8279 = vmatprep.subr.mxu0 %v9045_v53 }
 0x4d3   :  { %8280 = vmatpush3.msra.mxu0 %v3287_v52 }
 0x56c   :  { %v3039_v59 = vpop.f32.mrf.mxu1 }
 0x56d   :  { %v3142_v50 = vpop.f32.mrf.mxu0  ;;  %v3057_v46 = vmul.f32 %v3056_v42, %v3039_v59 }
 0x56e   :  { %v8212_v63 = vpop.f32.mrf.mxu1  ;;  %v3160_v20 = vmul.f32 %v3159_v58, %v3142_v50 }
 0x56f   :  { %v8227_v0 = vpop.f32.mrf.mxu0  ;;  %v3060_v19 = vadd.f32 %v3057_v46, %v2953_v62  ;;  %v10049_v62 = vld [vmem:[%s11665_s22 + $0x10] sm:$0xff] }
 0x570   :  { %v3044_v4 = vpop.f32.mrf.mxu1 }
 0x571   :  { %v3147_v8 = vpop.f32.mrf.mxu0  ;;  %v3058_v7 = vmul.f32 %v3056_v42, %v3044_v4  ;;  %v3163_v6 = vadd.f32 %v3160_v20, %v3060_v19  ;;  %v10077_v19 = vld [vmem:[%s11665_s22 + $0x30] sm:$0xff]  ;;  %v10084_v20 = vld [vmem:[%s11665_s22 + $0x38] sm:$0xff] }
 0x572   :  { %v8215_v15 = vpop.f32.mrf.mxu1  ;;  %v3161_v14 = vmul.f32 %v3159_v58, %v3147_v8  ;;  %v10028_v8 = vld [vmem:[%s11665_s22] sm:$0xff] }
 0x573   :  { %v8230_v5 = vpop.f32.mrf.mxu0  ;;  %v3061_v28 = vadd.f32 %v3058_v7, %v2954_v9  ;;  %v10042_v15 = vld [vmem:[%s11666_s20] sm:$0xff]  ;;  %v10105_v9 = vld [vmem:[%s11665_s22 + $0x50] sm:$0xff] }
 0x574   :  { %v3049_v16 = vpop.f32.mrf.mxu1  ;;  %8296 = vmatprep.mubr.msk.f32.mxu1 %vm2959_vm5, %v10042_v15  ;;  %v10056_v5 = vld [vmem:[%s11665_s22 + $0x18] sm:$0xff]  ;;  %v10063_v7 = vld [vmem:[%s11665_s22 + $0x20] sm:$0xff] }
 0x575   :  { %v3152_v2 = vpop.f32.mrf.mxu0  ;;  %v3059_v31 = vmul.f32 %v3056_v42, %v3049_v16  ;;  %v3164_v36 = vadd.f32 %v3161_v14, %v3061_v28  ;;  %v10070_v16 = vld [vmem:[%s11665_s22 + $0x28] sm:$0xff]  ;;  %v10133_v28 = vld [vmem:[%s11665_s22 + $0x70] sm:$0xff]  ;;  %v10140_v14 = vld [vmem:[%s11665_s22 + $0x78] sm:$0xff] }
 0x576   :  { %v8218_v23 = vpop.f32.mrf.mxu1  ;;  %v3162_v39 = vmul.f32 %v3159_v58, %v3152_v2  ;;  %v3632_v58 = vld [vmem:[%s11664_s17] sm:$0xff] }
 0x577   :  { %v8233_v24 = vpop.f32.mrf.mxu0  ;;  %v3062_v25 = vadd.f32 %v3059_v31, %v2955_v29  ;;  %8323 = vmatprep.subr.mxu0 %v3632_v58  ;;  %v10091_v2 = vld [vmem:[%s11665_s22 + $0x40] sm:$0xff]  ;;  %v10112_v23 = vld [vmem:[%s11665_s22 + $0x58] sm:$0xff] }
 0x578   :  { %v3245_v21 = vpop.f32.mrf.mxu1  ;;  %v10126_v24 = vld [vmem:[%s11665_s22 + $0x68] sm:$0xff]  ;;  %v7030_v31 = vld [vmem:[%s11667_s14] ss:$0 sm:$0xff] }
 0x579   :  { %v3263_v32 = vmul.f32 %v3262_v61, %v3245_v21  ;;  %v3165_v22 = vadd.f32 %v3162_v39, %v3062_v25  ;;  %v10147_v21 = vld [vmem:[%s11665_s22 + $0x80] sm:$0xff] }
 0x57a   :  { %v8242_v10 = vpop.f32.mrf.mxu1 }
 0x57b   :  { %v3266_v35 = vadd.f32 %v3263_v32, %v3163_v6  ;;  %v10154_v6 = vld [vmem:[%s11665_s22 + $0x88] sm:$0xff] }
 0x57c   :  { %v3250_v18 = vpop.f32.mrf.mxu1 }
 0x57d   :  { %v3269_v40 = vsub.f32 0.0, %v3266_v35  ;;  %v3264_v26 = vmul.f32 %v3262_v61, %v3250_v18 }
 0x57e   :  { %v8245_v33 = vpop.f32.mrf.mxu1 }
 0x57f   :  { %v3272_v43 = vmul.f32 1.442695, %v3269_v40  ;;  %v3267_v44 = vadd.f32 %v3264_v26, %v3164_v36 }
 0x580   :  { %v3255_v13 = vpop.f32.mrf.mxu1 }
 0x581   :  { %8857 = vpow2.f32 %v3272_v43  ;;  %v3270_v41 = vsub.f32 0.0, %v3267_v44  ;;  %v3265_v47 = vmul.f32 %v3262_v61, %v3255_v13  ;;  %v10098_v61 = vld [vmem:[%s11665_s22 + $0x48] sm:$0xff] }
 0x582   :  { %v8248_v48 = vpop.f32.mrf.mxu1 }
 0x583   :  { %v3274_v30 = vmul.f32 1.442695, %v3270_v41  ;;  %v3268_v37 = vadd.f32 %v3265_v47, %v3165_v22 }
 0x585   :  { %8859 = vpow2.f32 %v3274_v30  ;;  %v3271_v49 = vsub.f32 0.0, %v3268_v37 }
 0x587   :  { %v3276_v52 = vmul.f32 1.442695, %v3271_v49 }
 0x589   :  { %8861 = vpow2.f32 %v3276_v52 }
 0x58e   :  { %v8858_v38 = vpop.eup %8857 }
 0x58f   :  { %v3278_v55 = vadd.f32 1.0, %v8858_v38 }
 0x591   :  { %8863 = vrcp.f32 %v3278_v55 }
 0x592   :  { %v8860_v56 = vpop.eup %8859 }
 0x593   :  { %v3279_v59 = vadd.f32 1.0, %v8860_v56 }
 0x595   :  { %8865 = vrcp.f32 %v3279_v59 }
 0x596   :  { %v8862_v42 = vpop.eup %8861 }
 0x597   :  { %v3280_v50 = vadd.f32 1.0, %v8862_v42 }
 0x599   :  { %8867 = vrcp.f32 %v3280_v50 }
 0x59e   :  { %v8864_v63 = vpop.eup %8863 }
 0x59f   :  { %v10009_v51 = vmul.f32 %v8864_v63, %v3266_v35 }
 0x5a1   :  { %8282 = vmatmul.mubr.f32.vlgmr.msra.gmra.mxu0 %v10009_v51 }
 0x5a2   :  { %v8866_v0 = vpop.eup %8865  ;;  %8284 = vmatprep.mubr.msk.f32.mxu0 %vm9046_vm2, %v9045_v53  ;;  %8324 = vmatpush3.msra.mxu0 %v3632_v58 }
 0x5a3   :  { %v10014_v3 = vmul.f32 %v8866_v0, %v3267_v44 }
 0x5a5   :  { %8285 = vmatmul.mubr.f32.gmra.mxu0 %v10014_v3 }
 0x5a6   :  { %v8868_v4 = vpop.eup %8867  ;;  %8287 = vmatprep.mubr.msk.f32.mxu0 %vm9046_vm2, %v9045_v53 }
 0x5a7   :  { %v10019_v46 = vmul.f32 %v8868_v4, %v3268_v37 }
 0x5a9   :  { %8288 = vmatmul.mubr.f32.gmra.mxu0 %v10019_v46 }
 0x5aa   :  { %8325 = vmatprep.mubr.msk.f32.mxu0 %vm3633_vm6, %v10028_v8 }
 0x5ad   :  { %8326 = vmatmul.mubr.msk.f32.vlgmr.msra.gmra.mxu0 %vm3633_vm6, %v10035_v12 }
 0x5ae   :  { %8328 = vmatprep.mubr.msk.f32.mxu0 %vm3633_vm6, %v10049_v62 }
 0x5b1   :  { %8329 = vmatmul.mubr.msk.f32.gmra.mxu0 %vm3633_vm6, %v10056_v5 }
 0x5b2   :  { %8331 = vmatprep.mubr.msk.f32.mxu0 %vm3633_vm6, %v10063_v7 }
 0x5b5   :  { %8332 = vmatmul.mubr.msk.f32.gmra.mxu0 %vm3633_vm6, %v10070_v16 }
 0x5b6   :  { %8334 = vmatprep.mubr.msk.f32.mxu0 %vm3633_vm6, %v10077_v19 }
 0x5b9   :  { %8335 = vmatmul.mubr.msk.f32.gmra.mxu0 %vm3633_vm6, %v10084_v20 }
 0x5ba   :  { %8337 = vmatprep.mubr.msk.f32.mxu0 %vm3633_vm6, %v10091_v2 }
 0x5bd   :  { %8338 = vmatmul.mubr.msk.f32.gmra.mxu0 %vm3633_vm6, %v10098_v61 }
 0x5be   :  { %8340 = vmatprep.mubr.msk.f32.mxu0 %vm3633_vm6, %v10105_v9 }
 0x5c1   :  { %8341 = vmatmul.mubr.msk.f32.gmra.mxu0 %vm3633_vm6, %v10112_v23 }
 0x5c2   :  { %8343 = vmatprep.mubr.msk.f32.mxu0 %vm3633_vm6, %v10119_v17 }
 0x5c5   :  { %8344 = vmatmul.mubr.msk.f32.gmra.mxu0 %vm3633_vm6, %v10126_v24 }
 0x5c6   :  { %8346 = vmatprep.mubr.msk.f32.mxu0 %vm3633_vm6, %v10133_v28 }
 0x5c9   :  { %8347 = vmatmul.mubr.msk.f32.gmra.mxu0 %vm3633_vm6, %v10140_v14 }
 0x5ca   :  { %8349 = vmatprep.mubr.msk.f32.mxu0 %vm3633_vm6, %v10147_v21 }
 0x5cd   :  { %8350 = vmatmul.mubr.msk.f32.gmra.mxu0 %vm3633_vm6, %v10154_v6 }
 0x661   :  { %v3376_v32 = vpop.f32.mrf.mxu0 }
 0x662   :  { %v3377_v10 = vadd.f32 %v7030_v31, %v3376_v32 }
 0x663   :  { %v8283_v29 = vpop.f32.mrf.mxu0 }
 0x664   :  { %v3393_v35 = vand.u32 2147483647, %v3377_v10  ;;  %v3390_v29 = vmax.f32 %v3377_v10, 0.0 }
 0x665   :  { %v3381_v36 = vpop.f32.mrf.mxu0 }
 0x666   :  { %v3396_v18 = vsub.f32 0.0, %v3393_v35  ;;  %v3382_v25 = vadd.f32 %v7030_v31, %v3381_v36 }
 0x667   :  { %v8286_v39 = vpop.f32.mrf.mxu0 }
 0x668   :  { %v3394_v40 = vand.u32 2147483647, %v3382_v25  ;;  %v3399_v26 = vmul.f32 1.442695, %v3396_v18  ;;  %v3391_v63 = vmax.f32 %v3382_v25, 0.0  ;;  %v10170_v25 = vld [vmem:[%s11666_s20 + $0x8] sm:$0xff] }
 0x669   :  { %v3386_v33 = vpop.f32.mrf.mxu0  ;;  %v10176_v39 = vld [vmem:[%s11666_s20 + $0x10] sm:$0xff] }
 0x66a   :  { %v3397_v43 = vsub.f32 0.0, %v3394_v40  ;;  %v3387_v44 = vadd.f32 %v7030_v31, %v3386_v33  ;;  %8869 = vpow2.f32 %v3399_v26  ;;  %v10185_v40 = vld [vmem:[%s11666_s20 + $0x18] sm:$0xff]  ;;  %v10192_v26 = vld [vmem:[%s11666_s20 + $0x20] sm:$0xff]  ;;  %v10204_v33 = vld [vmem:[%s11666_s20 + $0x28] sm:$0xff] }
 0x66b   :  { %v8289_v13 = vpop.f32.mrf.mxu0 }
 0x66c   :  { %v3401_v22 = vmul.f32 1.442695, %v3397_v43  ;;  %v3395_v41 = vand.u32 2147483647, %v3387_v44  ;;  %v3392_v0 = vmax.f32 %v3387_v44, 0.0  ;;  %v10210_v43 = vld [vmem:[%s11666_s20 + $0x30] sm:$0xff] }
 0x66d   :  { %v10220_v44 = vld [vmem:[%s11666_s20 + $0x38] sm:$0xff]  ;;  %v10225_v13 = vld [vmem:[%s11666_s20 + $0x40] sm:$0xff] }
 0x66e   :  { %8871 = vpow2.f32 %v3401_v22  ;;  %v3398_v47 = vsub.f32 0.0, %v3395_v41  ;;  %v10234_v22 = vld [vmem:[%s11666_s20 + $0x48] sm:$0xff]  ;;  %v10239_v41 = vld [vmem:[%s11666_s20 + $0x50] sm:$0xff] }
 0x670   :  { %v3403_v48 = vmul.f32 1.442695, %v3398_v47  ;;  %v10248_v47 = vld [vmem:[%s11666_s20 + $0x58] sm:$0xff] }
 0x672   :  { %8873 = vpow2.f32 %v3403_v48  ;;  %v10253_v48 = vld [vmem:[%s11666_s20 + $0x60] sm:$0xff] }
 0x677   :  { %v8870_v30 = vpop.eup %8869 }
 0x678   :  { %v3405_v52 = vadd.f32 1.0, %v8870_v30  ;;  %v10262_v30 = vld [vmem:[%s11666_s20 + $0x68] sm:$0xff] }
 0x67b   :  { %v8872_v37 = vpop.eup %8871 }
 0x67c   :  { %v3406_v49 = vadd.f32 1.0, %v8872_v37  ;;  %v10267_v37 = vld [vmem:[%s11666_s20 + $0x70] sm:$0xff] }
 0x67e   :  { %8875 = vlog2.f32 %v3406_v49  ;;  %v10276_v49 = vld [vmem:[%s11666_s20 + $0x78] sm:$0xff] }
 0x67f   :  { %v8874_v38 = vpop.eup %8873  ;;  %8877 = vlog2.f32 %v3405_v52  ;;  %v10281_v52 = vld [vmem:[%s11666_s20 + $0x80] sm:$0xff] }
 0x680   :  { %v3407_v55 = vadd.f32 1.0, %v8874_v38  ;;  %v10290_v38 = vld [vmem:[%s11666_s20 + $0x88] sm:$0xff] }
 0x682   :  { %8879 = vlog2.f32 %v3407_v55  ;;  %v3897_v55 = vld [vmem:[%s11668_s15] sm:$0xff] }
 0x68b   :  { %v8876_v56 = vpop.eup %8875 }
 0x68c   :  { %v8878_v59 = vpop.eup %8877  ;;  %v3411_v42 = vmul.f32 0.6931472, %v8876_v56 }
 0x68d   :  { %v3409_v58 = vmul.f32 0.6931472, %v8878_v59 }
 0x68e   :  { %v3415_v32 = vadd.f32 %v3411_v42, %v3391_v63 }
 0x68f   :  { %v8880_v50 = vpop.eup %8879  ;;  %v3414_v36 = vadd.f32 %v3409_v58, %v3390_v29 }
 0x690   :  { %v3413_v4 = vmul.f32 0.6931472, %v8880_v50  ;;  %v3418_v18 = vmul.f32 %v3415_v32, %v10014_v3 }
 0x691   :  { %v3417_v10 = vmul.f32 %v3414_v36, %v10009_v51 }
 0x692   :  { %v3416_v31 = vadd.f32 %v3413_v4, %v3392_v0 }
 0x694   :  { %8290 = vmatprep.subr.msk.mxu1 %vm2969_vm4, %v3416_v31  ;;  %v3419_v35 = vmul.f32 %v3416_v31, %v10019_v46 }
 0x695   :  { %8291 = vmatpush3.msk.msra.mxu1 %vm2969_vm4, %v3416_v31 }
 0x696   :  { %8292 = vmatprep.subr.mxu1 %v3415_v32  ;;  %8390 = vmatprep.subr.msk.mxu0 %vm2969_vm4, %v3419_v35 }
 0x697   :  { %8293 = vmatpush3.msra.mxu1 %v3415_v32  ;;  %8391 = vmatpush3.msk.msra.mxu0 %vm2969_vm4, %v3419_v35 }
 0x698   :  { %8294 = vmatprep.subr.mxu1 %v3414_v36  ;;  %8392 = vmatprep.subr.mxu0 %v3418_v18 }
 0x699   :  { %8295 = vmatpush3.msra.mxu1 %v3414_v36  ;;  %8393 = vmatpush3.msra.mxu0 %v3418_v18 }
 0x69a   :  { %8297 = vmatmul.mubr.msk.f32.vlgmr.msra.gmra.mxu1 %vm2959_vm5, %v10170_v25  ;;  %8352 = vmatprep.subr.mxu1 %v9045_v53 }
 0x69b   :  { %8394 = vmatprep.subr.mxu0 %v3417_v10  ;;  %8353 = vmatpush3.xpose.msra.mxu1 %v10019_v46 }
 0x69c   :  { %8395 = vmatpush3.msra.mxu0 %v3417_v10  ;;  %8299 = vmatprep.mubr.msk.f32.mxu1 %vm2959_vm5, %v10176_v39 }
 0x69d   :  { %8354 = vmatprep.subr.mxu1 %v9045_v53  ;;  %4638 = vmatprep.subr.mxu0 %v9045_v53 }
 0x69e   :  { %8300 = vmatmul.mubr.msk.f32.gmra.mxu1 %vm2959_vm5, %v10185_v40 }
 0x69f   :  { %8355 = vmatpush3.xpose.msra.mxu1 %v10014_v3  ;;  %8302 = vmatprep.mubr.msk.f32.mxu1 %vm2959_vm5, %v10192_v26 }
 0x6a0   :  { %8356 = vmatprep.subr.mxu1 %v9045_v53 }
 0x6a2   :  { %8303 = vmatmul.mubr.msk.f32.gmra.mxu1 %vm2959_vm5, %v10204_v33 }
 0x6a3   :  { %8357 = vmatpush3.xpose.msra.mxu1 %v10009_v51  ;;  %8305 = vmatprep.mubr.msk.f32.mxu1 %vm2959_vm5, %v10210_v43 }
 0x6a6   :  { %8306 = vmatmul.mubr.msk.f32.gmra.mxu1 %vm2959_vm5, %v10220_v44 }
 0x6a7   :  { %8308 = vmatprep.mubr.msk.f32.mxu1 %vm2959_vm5, %v10225_v13 }
 0x6aa   :  { %8309 = vmatmul.mubr.msk.f32.gmra.mxu1 %vm2959_vm5, %v10234_v22 }
 0x6ab   :  { %8311 = vmatprep.mubr.msk.f32.mxu1 %vm2959_vm5, %v10239_v41 }
 0x6ae   :  { %8312 = vmatmul.mubr.msk.f32.gmra.mxu1 %vm2959_vm5, %v10248_v47 }
 0x6af   :  { %8314 = vmatprep.mubr.msk.f32.mxu1 %vm2959_vm5, %v10253_v48 }
 0x6b2   :  { %8315 = vmatmul.mubr.msk.f32.gmra.mxu1 %vm2959_vm5, %v10262_v30 }
 0x6b3   :  { %8317 = vmatprep.mubr.msk.f32.mxu1 %vm2959_vm5, %v10267_v37 }
 0x6b6   :  { %8318 = vmatmul.mubr.msk.f32.gmra.mxu1 %vm2959_vm5, %v10276_v49 }
 0x6b7   :  { %8320 = vmatprep.mubr.msk.f32.mxu1 %vm2959_vm5, %v10281_v52 }
 0x6ba   :  { %8321 = vmatmul.mubr.msk.f32.gmra.mxu1 %vm2959_vm5, %v10290_v38 }
 0x6bb   :  { %8358 = vmatprep.mubr.msk.f32.mxu1 %vm9046_vm2, %v9045_v53 }
 0x6be   :  { %8359 = vmatmul.mubr.f32.vlgmr.msra.gmra.mxu1 %v3897_v55 }
 0x6bf   :  { %8363 = vmatprep.mubr.msk.f32.mxu1 %vm3633_vm6, %v10028_v8 }
 0x75a   :  { %v10301_v56 = vpop.f32.mrf.mxu1 }
 0x75c   :  { %v10303_v59 = vpop.f32.mrf.mxu1 }
 0x75e   :  { %v10305_v42 = vpop.f32.mrf.mxu1 }
 0x760   :  { %v10307_v50 = vpop.f32.mrf.mxu1 }
 0x762   :  { %v10309_v63 = vpop.f32.mrf.mxu1 }
 0x764   :  { %v10311_v0 = vpop.f32.mrf.mxu1 }
 0x766   :  { %v10313_v4 = vpop.f32.mrf.mxu1 }
 0x768   :  { %v10315_v58 = vpop.f32.mrf.mxu1 }
 0x76a   :  { %v10317_v31 = vpop.f32.mrf.mxu1 }
 0x76c   :  { %v10319_v32 = vpop.f32.mrf.mxu1 }
 0x76e   :  { %v10321_v8 = vpop.f32.mrf.mxu1 }
 0x770   :  { %v10323_v29 = vpop.f32.mrf.mxu1 }
 0x772   :  { %v10325_v35 = vpop.f32.mrf.mxu1 }
 0x774   :  { %v10327_v36 = vpop.f32.mrf.mxu1 }
 0x776   :  { %v10329_v18 = vpop.f32.mrf.mxu1 }
 0x778   :  { %v10331_v10 = vpop.f32.mrf.mxu1 }
 0x77a   :  { %v10333_v55 = vpop.f32.mrf.mxu1 }
 0x77c   :  { %v10335_v11 = vpop.f32.mrf.mxu1 }
 0x77e   :  { %v3964_v60 = vpop.f32.mrf.mxu1 }
 0x77f   :  { %8361 = vmatprep.subr.mxu1 %v3964_v60 }
 0x780   :  { %v8360_v54 = vpop.f32.mrf.mxu1  ;;  %8362 = vmatpush3.msra.mxu1 %v3964_v60  ;;  %v4365_v60 = vld [vmem:[%s11669_s16 + $0x60] sm:$0xff] }
 0x781   :  { %8364 = vmatmul.mubr.msk.f32.vlgmr.msra.gmra.mxu1 %vm3633_vm6, %v10035_v12  ;;  %8423 = vmatprep.subr.mxu1 %v9045_v53  ;;  %v4366_v54 = vld [vmem:[%s11669_s16 + $0x68] sm:$0xff] }
 0x782   :  { %8366 = vmatprep.mubr.msk.f32.mxu1 %vm3633_vm6, %v10049_v62  ;;  %8424 = vmatpush3.msra.mxu1 %v4368_v34  ;;  %v4364_v34 = vld [vmem:[%s11669_s16 + $0x58] sm:$0xff]  ;;  %v4362_v12 = vld [vmem:[%s11669_s16 + $0x48] sm:$0xff]  ;;  %v4361_v62 = vld [vmem:[%s11669_s16 + $0x40] sm:$0xff] }
 0x783   :  { %8425 = vmatprep.subr.mxu1 %v9045_v53 }
 0x784   :  { %8426 = vmatpush3.msra.mxu1 %v4367_v45  ;;  %v4363_v45 = vld [vmem:[%s11669_s16 + $0x50] sm:$0xff] }
 0x785   :  { %8367 = vmatmul.mubr.msk.f32.gmra.mxu1 %vm3633_vm6, %v10056_v5  ;;  %8427 = vmatprep.subr.mxu1 %v9045_v53  ;;  %v4360_v5 = vld [vmem:[%s11669_s16 + $0x38] sm:$0xff] }
 0x786   :  { %8369 = vmatprep.mubr.msk.f32.mxu1 %vm3633_vm6, %v10063_v7  ;;  %8428 = vmatpush3.msra.mxu1 %v4366_v54  ;;  %v4359_v7 = vld [vmem:[%s11669_s16 + $0x30] sm:$0xff] }
 0x787   :  { %8429 = vmatprep.subr.mxu1 %v9045_v53 }
 0x788   :  { %8430 = vmatpush3.msra.mxu1 %v4365_v60 }
 0x789   :  { %8370 = vmatmul.mubr.msk.f32.gmra.mxu1 %vm3633_vm6, %v10070_v16  ;;  %8431 = vmatprep.subr.mxu1 %v9045_v53  ;;  %v4358_v16 = vld [vmem:[%s11669_s16 + $0x28] sm:$0xff] }
 0x78a   :  { %8372 = vmatprep.mubr.msk.f32.mxu1 %vm3633_vm6, %v10077_v19  ;;  %8432 = vmatpush3.msra.mxu1 %v4364_v34  ;;  %v4357_v19 = vld [vmem:[%s11669_s16 + $0x20] sm:$0xff] }
 0x78b   :  { %8433 = vmatprep.subr.mxu1 %v9045_v53 }
 0x78c   :  { %8434 = vmatpush3.msra.mxu1 %v4363_v45 }
 0x78d   :  { %8373 = vmatmul.mubr.msk.f32.gmra.mxu1 %vm3633_vm6, %v10084_v20  ;;  %8435 = vmatprep.subr.mxu1 %v9045_v53  ;;  %v4356_v20 = vld [vmem:[%s11669_s16 + $0x18] sm:$0xff] }
 0x78e   :  { %8375 = vmatprep.mubr.msk.f32.mxu1 %vm3633_vm6, %v10091_v2  ;;  %8436 = vmatpush3.msra.mxu1 %v4362_v12  ;;  %v4355_v2 = vld [vmem:[%s11669_s16 + $0x10] sm:$0xff] }
 0x78f   :  { %8437 = vmatprep.subr.mxu1 %v9045_v53 }
 0x790   :  { %8438 = vmatpush3.msra.mxu1 %v4361_v62 }
 0x791   :  { %8376 = vmatmul.mubr.msk.f32.gmra.mxu1 %vm3633_vm6, %v10098_v61  ;;  %8439 = vmatprep.subr.mxu1 %v9045_v53  ;;  %v4354_v61 = vld [vmem:[%s11669_s16 + $0x8] sm:$0xff] }
 0x792   :  { %8378 = vmatprep.mubr.msk.f32.mxu1 %vm3633_vm6, %v10105_v9  ;;  %8440 = vmatpush3.msra.mxu1 %v4360_v5  ;;  %v4353_v9 = vld [vmem:[%s11669_s16] sm:$0xff] }
 0x793   :  { %8441 = vmatprep.subr.mxu1 %v9045_v53 }
 0x794   :  { %8442 = vmatpush3.msra.mxu1 %v4359_v7 }
 0x795   :  { %8379 = vmatmul.mubr.msk.f32.gmra.mxu1 %vm3633_vm6, %v10112_v23  ;;  %8443 = vmatprep.subr.mxu1 %v9045_v53  ;;  %v2828_v23 = vld [vmem:[%s11670_s23 + $0x8] sm:$0xff] }
 0x796   :  { %8381 = vmatprep.mubr.msk.f32.mxu1 %vm3633_vm6, %v10119_v17  ;;  %8444 = vmatpush3.msra.mxu1 %v4358_v16  ;;  %v2827_v17 = vld [vmem:[%s11670_s23] sm:$0xff] }
 0x797   :  { %8445 = vmatprep.subr.mxu1 %v9045_v53 }
 0x798   :  { %8446 = vmatpush3.msra.mxu1 %v4357_v19 }
 0x799   :  { %8382 = vmatmul.mubr.msk.f32.gmra.mxu1 %vm3633_vm6, %v10126_v24  ;;  %8447 = vmatprep.subr.mxu1 %v9045_v53 }
 0x79a   :  { %8384 = vmatprep.mubr.msk.f32.mxu1 %vm3633_vm6, %v10133_v28  ;;  %8448 = vmatpush3.msra.mxu1 %v4356_v20 }
 0x79b   :  { %8449 = vmatprep.subr.mxu1 %v9045_v53 }
 0x79c   :  { %8450 = vmatpush3.msra.mxu1 %v4355_v2 }
 0x79d   :  { %8385 = vmatmul.mubr.msk.f32.gmra.mxu1 %vm3633_vm6, %v10140_v14  ;;  %8451 = vmatprep.subr.mxu1 %v9045_v53 }
 0x79e   :  { %8387 = vmatprep.mubr.msk.f32.mxu1 %vm3633_vm6, %v10147_v21  ;;  %8452 = vmatpush3.msra.mxu1 %v4354_v61 }
 0x79f   :  { %8453 = vmatprep.subr.mxu1 %v9045_v53 }
 0x7a0   :  { %8454 = vmatpush3.msra.mxu1 %v4353_v9 }
 0x7a1   :  { %8388 = vmatmul.mubr.msk.f32.gmra.mxu1 %vm3633_vm6, %v10154_v6  ;;  %4488 = vmatprep.subr.mxu1 %v2828_v23 }
 0x7a2   :  { %8455 = vmatprep.mubr.msk.f32.mxu1 %vm9046_vm2, %v9045_v53 }
 0x7a5   :  { %8456 = vmatmul.mubr.f32.vlgmr.msra.gmra.mxu1 %v10009_v51 }
 0x7a6   :  { %8458 = vmatprep.mubr.msk.f32.mxu1 %vm9046_vm2, %v9045_v53  ;;  %4489 = vmatpush1.msra.mxu1 %v2827_v17 }
 0x7a7   :  { %8464 = vmatprep.subr.mxu1 %v9045_v53 }
 0x7a9   :  { %8459 = vmatmul.mubr.f32.gmra.mxu1 %v10014_v3 }
 0x7aa   :  { %8461 = vmatprep.mubr.msk.f32.mxu1 %vm9046_vm2, %v9045_v53 }
 0x7ad   :  { %8462 = vmatmul.mubr.f32.gmra.mxu1 %v10019_v46 }
 0x7ae   :  { %4522 = vmatprep.mubr.f32.mxu1 %v9045_v53 }
 0x841   :  { %v8365_v24 = vpop.f32.mrf.mxu1 }
 0x842   :  { %v4124_v21 = vmul.f32 %v8365_v24, %v10170_v25 }
 0x843   :  { %v4034_v28 = vpop.f32.mrf.mxu1 }
 0x844   :  { %v4123_v14 = vmul.f32 %v4034_v28, %v10042_v15 }
 0x845   :  { %v8368_v6 = vpop.f32.mrf.mxu1 }
 0x846   :  { %8396 = vmatprep.mubr.msk.f32.mxu0 %vm2959_vm5, %v4123_v14  ;;  %v4126_v34 = vmul.f32 %v8368_v6, %v10185_v40 }
 0x847   :  { %v4044_v54 = vpop.f32.mrf.mxu1  ;;  %8397 = vmatmul.mubr.msk.f32.vlgmr.msra.gmra.mxu0 %vm2959_vm5, %v4124_v21  ;;  %v8327_v21 = vpop.f32.mrf.mxu0 }
 0x848   :  { %v4125_v60 = vmul.f32 %v4044_v54, %v10176_v39 }
 0x849   :  { %v8371_v45 = vpop.f32.mrf.mxu1  ;;  %v3754_v6 = vpop.f32.mrf.mxu0 }
 0x84a   :  { %8399 = vmatprep.mubr.msk.f32.mxu0 %vm2959_vm5, %v4125_v60  ;;  %v4128_v25 = vmul.f32 %v8371_v45, %v10204_v33 }
 0x84b   :  { %v4054_v12 = vpop.f32.mrf.mxu1  ;;  %8400 = vmatmul.mubr.msk.f32.gmra.mxu0 %vm2959_vm5, %v4126_v34  ;;  %v8330_v54 = vpop.f32.mrf.mxu0 }
 0x84c   :  { %v4127_v15 = vmul.f32 %v4054_v12, %v10192_v26 }
 0x84d   :  { %v8374_v62 = vpop.f32.mrf.mxu1  ;;  %v3764_v60 = vpop.f32.mrf.mxu0 }
 0x84e   :  { %8402 = vmatprep.mubr.msk.f32.mxu0 %vm2959_vm5, %v4127_v15  ;;  %v4130_v40 = vmul.f32 %v8374_v62, %v10220_v44  ;;  %v4753_v62 = vld [vmem:[%s11671_s19 + $0x70] sm:$0xff] }
 0x84f   :  { %v4064_v5 = vpop.f32.mrf.mxu1  ;;  %8403 = vmatmul.mubr.msk.f32.gmra.mxu0 %vm2959_vm5, %v4128_v25  ;;  %v10495_v34 = vpop.f32.mrf.mxu0  ;;  %v4754_v25 = vld [vmem:[%s11671_s19 + $0x78] sm:$0xff] }
 0x850   :  { %v4129_v39 = vmul.f32 %v4064_v5, %v10210_v43 }
 0x851   :  { %v8377_v7 = vpop.f32.mrf.mxu1  ;;  %v10497_v45 = vpop.f32.mrf.mxu0 }
 0x852   :  { %8405 = vmatprep.mubr.msk.f32.mxu0 %vm2959_vm5, %v4129_v39  ;;  %v4132_v33 = vmul.f32 %v8377_v7, %v10234_v22  ;;  %v4752_v39 = vld [vmem:[%s11671_s19 + $0x68] sm:$0xff] }
 0x853   :  { %v4074_v16 = vpop.f32.mrf.mxu1  ;;  %8406 = vmatmul.mubr.msk.f32.gmra.mxu0 %vm2959_vm5, %v4130_v40  ;;  %v10499_v12 = vpop.f32.mrf.mxu0  ;;  %v4751_v40 = vld [vmem:[%s11671_s19 + $0x60] sm:$0xff] }
 0x854   :  { %v4131_v26 = vmul.f32 %v4074_v16, %v10225_v13  ;;  %v4750_v16 = vld [vmem:[%s11671_s19 + $0x58] sm:$0xff] }
 0x855   :  { %v8380_v19 = vpop.f32.mrf.mxu1  ;;  %v10501_v15 = vpop.f32.mrf.mxu0 }
 0x856   :  { %8408 = vmatprep.mubr.msk.f32.mxu0 %vm2959_vm5, %v4131_v26  ;;  %v4134_v44 = vmul.f32 %v8380_v19, %v10248_v47  ;;  %v4749_v26 = vld [vmem:[%s11671_s19 + $0x50] sm:$0xff]  ;;  %v4748_v19 = vld [vmem:[%s11671_s19 + $0x48] sm:$0xff] }
 0x857   :  { %v4084_v20 = vpop.f32.mrf.mxu1  ;;  %8409 = vmatmul.mubr.msk.f32.gmra.mxu0 %vm2959_vm5, %v4132_v33  ;;  %v8339_v5 = vpop.f32.mrf.mxu0 }
 0x858   :  { %v4133_v43 = vmul.f32 %v4084_v20, %v10239_v41  ;;  %v4747_v20 = vld [vmem:[%s11671_s19 + $0x40] sm:$0xff] }
 0x859   :  { %v8383_v2 = vpop.f32.mrf.mxu1  ;;  %v10517_v7 = vpop.f32.mrf.mxu0 }
 0x85a   :  { %8411 = vmatprep.mubr.msk.f32.mxu0 %vm2959_vm5, %v4133_v43  ;;  %v4136_v61 = vmul.f32 %v8383_v2, %v10262_v30  ;;  %v3843_v2 = vmul.f32 %v3754_v6, %v10303_v59  ;;  %v4743_v59 = vld [vmem:[%s11671_s19 + $0x20] sm:$0xff] }
 0x85b   :  { %v4094_v9 = vpop.f32.mrf.mxu1  ;;  %8412 = vmatmul.mubr.msk.f32.gmra.mxu0 %vm2959_vm5, %v4134_v44  ;;  %v8342_v33 = vpop.f32.mrf.mxu0  ;;  %v4746_v44 = vld [vmem:[%s11671_s19 + $0x38] sm:$0xff] }
 0x85c   :  { %v4135_v13 = vmul.f32 %v4094_v9, %v10253_v48 }
 0x85d   :  { %v8386_v22 = vpop.f32.mrf.mxu1  ;;  %v3804_v43 = vpop.f32.mrf.mxu0 }
 0x85e   :  { %8414 = vmatprep.mubr.msk.f32.mxu0 %vm2959_vm5, %v4135_v13  ;;  %v4138_v23 = vmul.f32 %v8386_v22, %v10276_v49  ;;  %v4744_v13 = vld [vmem:[%s11671_s19 + $0x28] sm:$0xff]  ;;  %v3861_v22 = vmul.f32 1.442695, %v3843_v2 }
 0x85f   :  { %v4104_v17 = vpop.f32.mrf.mxu1  ;;  %8415 = vmatmul.mubr.msk.f32.gmra.mxu0 %vm2959_vm5, %v4136_v61  ;;  %v4745_v61 = vld [vmem:[%s11671_s19 + $0x30] sm:$0xff]  ;;  %v10544_v9 = vpop.f32.mrf.mxu0 }
 0x860   :  { %v4137_v41 = vmul.f32 %v4104_v17, %v10267_v37  ;;  %v3844_v17 = vmul.f32 %v8327_v21, %v10301_v56  ;;  %8881 = vpow2.f32 %v3861_v22  ;;  %v3846_v56 = vmul.f32 %v8330_v54, %v10305_v42 }
 0x861   :  { %v8389_v47 = vpop.f32.mrf.mxu1  ;;  %v3853_v21 = vmul.f32 %v3804_v43, %v10323_v29  ;;  %v3848_v42 = vmul.f32 %v10495_v34, %v10309_v63  ;;  %v3854_v29 = vmul.f32 %v8342_v33, %v10321_v8  ;;  %v3850_v34 = vmul.f32 %v10499_v12, %v10313_v4 }
 0x862   :  { %8417 = vmatprep.mubr.msk.f32.mxu0 %vm2959_vm5, %v4137_v41  ;;  %v4140_v30 = vmul.f32 %v8389_v47, %v10290_v38  ;;  %v4742_v41 = vld [vmem:[%s11671_s19 + $0x18] sm:$0xff]  ;;  %v3856_v4 = vmul.f32 %v10544_v9, %v10325_v35 }
 0x863   :  { %v4114_v24 = vpop.f32.mrf.mxu1  ;;  %8418 = vmatmul.mubr.msk.f32.gmra.mxu0 %vm2959_vm5, %v4138_v23  ;;  %v3814_v23 = vpop.f32.mrf.mxu0  ;;  %v3875_v43 = vmul.f32 1.442695, %v3850_v34 }
 0x864   :  { %v4139_v48 = vmul.f32 %v4114_v24, %v10281_v52  ;;  %v3845_v24 = vmul.f32 %v3764_v60, %v10307_v50  ;;  %v3881_v60 = vmul.f32 1.442695, %v3853_v21 }
 0x865   :  { %v4435_v28 = vpop.f32.mrf.mxu1  ;;  %v10560_v47 = vpop.f32.mrf.mxu0 }
 0x866   :  { %7105 = vmatmul.mubr.msk.f32.vlgmr.msra.gmra.mxu1 %vm3633_vm6, %v4435_v28  ;;  %8420 = vmatprep.mubr.msk.f32.mxu0 %vm2959_vm5, %v4139_v48  ;;  %v3865_v28 = vmul.f32 1.442695, %v3845_v24 }
 0x867   :  { %v8457_v49 = vpop.f32.mrf.mxu1  ;;  %4528 = vmatprep.mubr.f32.mxu1 %v9045_v53  ;;  %8421 = vmatmul.mubr.msk.f32.gmra.mxu0 %vm2959_vm5, %v4140_v30  ;;  %v3863_v30 = vmul.f32 1.442695, %v3844_v17  ;;  %v3824_v48 = vpop.f32.mrf.mxu0  ;;  %v3887_v17 = vmul.f32 1.442695, %v3856_v4 }
 0x868   :  { %8465 = vmatpush3.msra.mxu1 %v4754_v25  ;;  %v3852_v49 = vmul.f32 %v8339_v5, %v10317_v31 }
 0x869   :  { %v4440_v37 = vpop.f32.mrf.mxu1  ;;  %8466 = vmatprep.subr.mxu1 %v9045_v53  ;;  %8883 = vpow2.f32 %v3863_v30 }
 0x86a   :  { %7106 = vmatmul.mubr.msk.f32.gmra.mxu1 %vm3633_vm6, %v4440_v37  ;;  %v3867_v37 = vmul.f32 1.442695, %v3846_v56  ;;  %8885 = vpow2.f32 %v3865_v28 }
 0x86b   :  { %v8460_v14 = vpop.f32.mrf.mxu1  ;;  %4534 = vmatprep.mubr.f32.mxu1 %v9045_v53  ;;  %8467 = vmatpush3.msra.mxu1 %v4753_v62  ;;  %v3849_v62 = vmul.f32 %v10501_v15, %v10315_v58  ;;  %v3855_v58 = vmul.f32 %v3814_v23, %v10327_v36 }
 0x86c   :  { %8468 = vmatprep.subr.mxu1 %v9045_v53  ;;  %v10566_v14 = vpop.f32.mrf.mxu0  ;;  %8887 = vpow2.f32 %v3867_v37 }
 0x86d   :  { %v4445_v38 = vpop.f32.mrf.mxu1  ;;  %8469 = vmatpush3.msra.mxu1 %v4752_v39  ;;  %v8882_v50 = vpop.eup %8881 }
 0x86e   :  { %7107 = vmatmul.mubr.msk.f32.gmra.mxu1 %vm3633_vm6, %v4445_v38  ;;  %8470 = vmatprep.subr.mxu1 %v9045_v53  ;;  %v3847_v38 = vmul.f32 %v10497_v45, %v10311_v0  ;;  %v10571_v6 = vpop.f32.mrf.mxu0  ;;  %v4547_v25 = vmul.f32 0.0, %v8882_v50  ;;  %v3871_v0 = vmul.f32 1.442695, %v3848_v42 }
 0x86f   :  { %v8463_v52 = vpop.f32.mrf.mxu1  ;;  %8496 = vmatprep.mubr.msk.f32.mxu1 %vm9046_vm2, %v9045_v53  ;;  %8471 = vmatpush3.msra.mxu1 %v4751_v40 }
 0x870   :  { %8472 = vmatprep.subr.mxu1 %v9045_v53  ;;  %v3879_v52 = vmul.f32 1.442695, %v3852_v49  ;;  %v3869_v54 = vmul.f32 1.442695, %v3847_v38  ;;  %v3858_v49 = vmul.f32 %v10560_v47, %v10329_v18 }
 0x871   :  { %8473 = vmatpush3.msra.mxu1 %v4750_v16  ;;  %v3873_v16 = vmul.f32 1.442695, %v3849_v62 }
 0x872   :  { %8474 = vmatprep.subr.mxu1 %v9045_v53  ;;  %8889 = vpow2.f32 %v3879_v52  ;;  %v3891_v42 = vmul.f32 1.442695, %v3858_v49 }
 0x873   :  { %8475 = vmatpush3.msra.mxu1 %v4749_v26  ;;  %8891 = vpow2.f32 %v3869_v54 }
 0x874   :  { %8476 = vmatprep.subr.mxu1 %v9045_v53  ;;  %8893 = vpow2.f32 %v3881_v60  ;;  %v3859_v60 = vmul.f32 %v10571_v6, %v10335_v11 }
 0x875   :  { %8477 = vmatpush3.msra.mxu1 %v4748_v19  ;;  %8895 = vpow2.f32 %v3871_v0  ;;  %v3883_v19 = vmul.f32 1.442695, %v3854_v29 }
 0x876   :  { %8478 = vmatprep.subr.mxu1 %v9045_v53  ;;  %v8884_v39 = vpop.eup %8883  ;;  %8897 = vpow2.f32 %v3873_v16 }
 0x877   :  { %8479 = vmatpush3.msra.mxu1 %v4747_v20  ;;  %v8886_v20 = vpop.eup %8885  ;;  %8899 = vpow2.f32 %v3883_v19 }
 0x878   :  { %8480 = vmatprep.subr.mxu1 %v9045_v53  ;;  %8901 = vpow2.f32 %v3875_v43  ;;  %v2804_v43 = vld [vmem:[%s11672_s21 + $0x8] sm:$0xff] }
 0x879   :  { %8481 = vmatpush3.msra.mxu1 %v4746_v44  ;;  %v3851_v44 = vmul.f32 %v10517_v7, %v10319_v32  ;;  %v8888_v2 = vpop.eup %8887  ;;  %v3857_v32 = vmul.f32 %v3824_v48, %v10331_v10 }
 0x87a   :  { %8482 = vmatprep.subr.mxu1 %v9045_v53 }
 0x87b   :  { %8483 = vmatpush3.msra.mxu1 %v4745_v61  ;;  %v3885_v61 = vmul.f32 1.442695, %v3855_v58  ;;  %v3877_v23 = vmul.f32 1.442695, %v3851_v44  ;;  %v3889_v38 = vmul.f32 1.442695, %v3857_v32 }
 0x87c   :  { %8484 = vmatprep.subr.mxu1 %v9045_v53 }
 0x87d   :  { %8485 = vmatpush3.msra.mxu1 %v4744_v13  ;;  %8903 = vpow2.f32 %v3885_v61 }
 0x87e   :  { %8486 = vmatprep.subr.mxu1 %v9045_v53  ;;  %8905 = vpow2.f32 %v3877_v23 }
 0x87f   :  { %8487 = vmatpush3.msra.mxu1 %v4743_v59  ;;  %v8890_v36 = vpop.eup %8889  ;;  %8907 = vpow2.f32 %v3887_v17 }
 0x880   :  { %8488 = vmatprep.subr.mxu1 %v9045_v53  ;;  %v4574_v35 = vmul.f32 0.0, %v8890_v36  ;;  %v8892_v9 = vpop.eup %8891  ;;  %8909 = vpow2.f32 %v3889_v38 }
 0x881   :  { %8489 = vmatpush3.msra.mxu1 %v4742_v41  ;;  %v8894_v28 = vpop.eup %8893  ;;  %8911 = vpow2.f32 %v3891_v42 }
 0x882   :  { %8490 = vmatprep.subr.mxu1 %v9045_v53  ;;  %v8896_v48 = vpop.eup %8895 }
 0x907   :  { %v8398_v31 = vpop.f32.mrf.mxu0 }
 0x909   :  { %v4264_v5 = vpop.f32.mrf.mxu0 }
 0x90a   :  { %v10578_v45 = vadd.f32 %v4547_v25, %v4264_v5 }
 0x90b   :  { %v8401_v40 = vpop.f32.mrf.mxu0 }
 0x90c   :  { %v4550_v63 = vmul.f32 %v8884_v39, %v10578_v45  ;;  %v3860_v39 = vmul.f32 %v10566_v14, %v10333_v55 }
 0x90d   :  { %v4274_v26 = vpop.f32.mrf.mxu0 }
 0x90e   :  { %v10584_v15 = vadd.f32 %v8398_v31, %v4550_v63  ;;  %v8898_v31 = vpop.eup %8897  ;;  %v3895_v58 = vmul.f32 1.442695, %v3860_v39  ;;  %v7124_v39 = vld [vmem:[%s11712_s7 + $0xe0] sm:$0xff] }
 0x90f   :  { %v8404_v8 = vpop.f32.mrf.mxu0  ;;  %v8900_v25 = vpop.eup %8899 }
 0x910   :  { %v4553_v33 = vmul.f32 %v8886_v20, %v10584_v15  ;;  %v8902_v29 = vpop.eup %8901 }
 0x911   :  { %v4284_v12 = vpop.f32.mrf.mxu0  ;;  %v8904_v16 = vpop.eup %8903 }
 0x912   :  { %v10591_v13 = vadd.f32 %v4553_v33, %v4274_v26  ;;  %v8906_v6 = vpop.eup %8905 }
 0x913   :  { %v8407_v22 = vpop.f32.mrf.mxu0  ;;  %v8908_v44 = vpop.eup %8907 }
 0x914   :  { %v4556_v59 = vmul.f32 %v8888_v2, %v10591_v13  ;;  %v8910_v36 = vpop.eup %8909 }
 0x915   :  { %v4294_v41 = vpop.f32.mrf.mxu0  ;;  %v8912_v23 = vpop.eup %8911 }
 0x916   :  { %v10595_v7 = vadd.f32 %v8401_v40, %v4556_v59  ;;  %v3893_v40 = vmul.f32 1.442695, %v3859_v60 }
 0x917   :  { %v8410_v30 = vpop.f32.mrf.mxu0 }
 0x918   :  { %v4559_v24 = vmul.f32 %v8892_v9, %v10595_v7  ;;  %v10598_v56 = vadd.f32 %v8410_v30, %v4574_v35  ;;  %8913 = vpow2.f32 %v3893_v40  ;;  %v7123_v40 = vld [vmem:[%s11712_s7 + $0xd8] sm:$0xff] }
 0x919   :  { %v10602_v37 = vpop.f32.mrf.mxu0  ;;  %8915 = vpow2.f32 %v3895_v58  ;;  %v7115_v58 = vld [vmem:[%s11712_s7 + $0x98] sm:$0xff] }
 0x91a   :  { %v10604_v52 = vadd.f32 %v4559_v24, %v4284_v12  ;;  %v4577_v10 = vmul.f32 %v8894_v28, %v10598_v56 }
 0x91b   :  { %v8413_v21 = vpop.f32.mrf.mxu0 }
 0x91c   :  { %v4562_v50 = vmul.f32 %v8896_v48, %v10604_v52 }
 0x91d   :  { %v4314_v54 = vpop.f32.mrf.mxu0 }
 0x91e   :  { %v10610_v18 = vadd.f32 %v8404_v8, %v4562_v50  ;;  %v4578_v47 = vadd.f32 %v4577_v10, %v4314_v54 }
 0x91f   :  { %v8416_v0 = vpop.f32.mrf.mxu0 }
 0x920   :  { %v4565_v62 = vmul.f32 %v8898_v31, %v10610_v18  ;;  %v4580_v5 = vmul.f32 %v8900_v25, %v4578_v47  ;;  %v2807_v31 = vld [vmem:[%s11672_s21 + $0x20] sm:$0x3]  ;;  %v4740_v25 = vld [vmem:[%s11671_s19 + $0x8] sm:$0xff] }
 0x921   :  { %v4324_v11 = vpop.f32.mrf.mxu0 }
 0x922   :  { %v4566_v63 = vadd.f32 %v4565_v62, %v4294_v41  ;;  %v4581_v34 = vadd.f32 %v8413_v21, %v4580_v5  ;;  %v4739_v62 = vld [vmem:[%s11671_s19] sm:$0xff]  ;;  %v7127_v5 = vld [vmem:[%s11712_s7 + $0xf8] sm:$0xff] }
 0x923   :  { %v8419_v12 = vpop.f32.mrf.mxu0 }
 0x924   :  { %v4568_v26 = vmul.f32 %v8902_v29, %v4566_v63  ;;  %v4583_v19 = vmul.f32 %v8904_v16, %v4581_v34  ;;  %v7125_v29 = vld [vmem:[%s11712_s7 + $0xe8] sm:$0xff]  ;;  %v7120_v16 = vld [vmem:[%s11712_s7 + $0xc0] sm:$0xff] }
 0x925   :  { %v8914_v9 = vpop.eup %8913 }
 0x926   :  { %v4569_v20 = vadd.f32 %v8407_v22, %v4568_v26  ;;  %v4584_v8 = vadd.f32 %v4583_v19, %v4324_v11  ;;  %v10615_v33 = vpop.f32.mrf.mxu1  ;;  %v4334_v22 = vpop.f32.mrf.mxu0  ;;  %v7119_v26 = vld [vmem:[%s11712_s7 + $0xb8] sm:$0xff]  ;;  %v7118_v19 = vld [vmem:[%s11712_s7 + $0xb0] sm:$0xff]  ;;  %v7117_v11 = vld [vmem:[%s11712_s7 + $0xa8] sm:$0xff] }
 0x927   :  { %v8916_v49 = vpop.eup %8915 }
 0x928   :  { %v4571_v55 = vmul.f32 %v8906_v6, %v4569_v20  ;;  %v4586_v14 = vmul.f32 %v8908_v44, %v4584_v8  ;;  %v4526_v4 = vpop.f32.mrf.mxu1  ;;  %v8422_v41 = vpop.f32.mrf.mxu0  ;;  %v7116_v6 = vld [vmem:[%s11712_s7 + $0xa0] sm:$0xff]  ;;  %v4719_v44 = vsub.f32 0.0, %v9845_v1 }
 0x929   :  { %v4542_v2 = vmul.f32 %v4526_v4, %v2804_v43 }
 0x92a   :  { %v4587_v61 = vadd.f32 %v8416_v0, %v4586_v14  ;;  %v4344_v30 = vpop.f32.mrf.mxu0  ;;  %v4572_v10 = vadd.f32 %v4571_v55, %v10602_v37  ;;  %v4530_v37 = vpop.f32.mrf.mxu1  ;;  %v7126_v0 = vld [vmem:[%s11712_s7 + $0xf0] sm:$0xff]  ;;  %v4723_v55 = vmul.f32 1.442695, %v4719_v44  ;;  %v4720_v14 = vsub.f32 0.0, %v9993_v57 }
 0x92b   :  { %7109 = vmatprep.mubr.msk.f32.mxu0 %vm269_vm1, %v4542_v2  ;;  %v7158_v44 = vld [vmem:[%s11661_s13 + $0xb0] sm:$0xff] }
 0x92c   :  { %v4589_v59 = vmul.f32 %v8910_v36, %v4587_v61  ;;  %v4725_v4 = vmul.f32 1.442695, %v4720_v14  ;;  %v7156_v14 = vld [vmem:[%s11661_s13 + $0xa0] sm:$0xff] }
 0x92e   :  { %v4590_v17 = vadd.f32 %v4589_v59, %v4334_v22 }
 0x930   :  { %v4592_v32 = vmul.f32 %v8912_v23, %v4590_v17  ;;  %v7108_v23 = vld [vmem:[%s11673_s18] ss:$0 sm:$0xff] }
 0x932   :  { %v4593_v35 = vadd.f32 %v8419_v12, %v4592_v32 }
 0x934   :  { %4639 = vmatpush1.msra.mxu0 %v4593_v35  ;;  %v4595_v24 = vmul.f32 %v8914_v9, %v4593_v35 }
 0x935   :  { %4640 = vmatprep.subr.mxu0 %v9045_v53 }
 0x936   :  { %v4596_v28 = vadd.f32 %v4595_v24, %v4344_v30  ;;  %4641 = vmatpush1.msra.mxu0 %v4590_v17 }
 0x937   :  { %4642 = vmatprep.subr.mxu0 %v9045_v53 }
 0x938   :  { %v4598_v38 = vmul.f32 %v8916_v49, %v4596_v28  ;;  %4643 = vmatpush1.msra.mxu0 %v4587_v61  ;;  %v4627_v49 = vmul.f32 %v7108_v23, %v10014_v3  ;;  %v7112_v3 = vld [vmem:[%s11712_s7 + $0x80] sm:$0xff] }
 0x939   :  { %4644 = vmatprep.subr.mxu0 %v9045_v53 }
 0x93a   :  { %4645 = vmatpush1.msra.mxu0 %v4584_v8  ;;  %v4599_v48 = vadd.f32 %v8422_v41, %v4598_v38  ;;  %v7113_v8 = vld [vmem:[%s11712_s7 + $0x88] sm:$0xff]  ;;  %v4626_v41 = vmul.f32 %v7108_v23, %v10009_v51 }
 0x93b   :  { %4646 = vmatprep.subr.mxu0 %v9045_v53 }
 0x93c   :  { %4647 = vmatpush1.msra.mxu0 %v4581_v34  ;;  %v7121_v34 = vld [vmem:[%s11712_s7 + $0xc8] sm:$0xff] }
 0x93d   :  { %4648 = vmatprep.subr.mxu0 %v9045_v53 }
 0x93e   :  { %4649 = vmatpush1.msra.mxu0 %v4578_v47  ;;  %v4741_v47 = vld [vmem:[%s11671_s19 + $0x10] sm:$0xff] }
 0x93f   :  { %4650 = vmatprep.subr.mxu0 %v9045_v53  ;;  %8491 = vmatpush3.msra.mxu1 %v4741_v47 }
 0x940   :  { %4651 = vmatpush1.msra.mxu0 %v10598_v56  ;;  %v4532_v56 = vpop.f32.mrf.mxu1  ;;  %8492 = vmatprep.subr.mxu1 %v9045_v53 }
 0x941   :  { %4652 = vmatprep.subr.mxu0 %v9045_v53  ;;  %8493 = vmatpush3.msra.mxu1 %v4740_v25  ;;  %v4964_v25 = vld [vmem:[%s11714_s30] sm:$0xff] }
 0x942   :  { %4653 = vmatpush1.msra.mxu0 %v4572_v10  ;;  %v4536_v21 = vpop.f32.mrf.mxu1  ;;  %8494 = vmatprep.subr.mxu1 %v9045_v53 }
 0x943   :  { %4654 = vmatprep.subr.mxu0 %v9045_v53  ;;  %8495 = vmatpush3.msra.mxu1 %v4739_v62  ;;  %v7138_v62 = vld [vmem:[%s11714_s30 + $0x18] sm:$0xff] }
 0x944   :  { %4655 = vmatpush1.msra.mxu0 %v4569_v20  ;;  %v4538_v42 = vpop.f32.mrf.mxu1  ;;  %8520 = vmatprep.subr.mxu1 %v9045_v53  ;;  %v7114_v20 = vld [vmem:[%s11712_s7 + $0x90] sm:$0xff] }
 0x945   :  { %4656 = vmatprep.subr.mxu0 %v9045_v53 }
 0x946   :  { %4657 = vmatpush1.msra.mxu0 %v4566_v63  ;;  %v7122_v63 = vld [vmem:[%s11712_s7 + $0xd0] sm:$0xff] }
 0x947   :  { %4658 = vmatprep.subr.mxu0 %v9045_v53 }
 0x948   :  { %4659 = vmatpush1.msra.mxu0 %v10610_v18  ;;  %v4545_v18 = vmul.f32 %v4536_v21, %v2807_v31 }
 0x949   :  { %4660 = vmatprep.subr.mxu0 %v9045_v53 }
 0x94a   :  { %4661 = vmatpush1.msra.mxu0 %v10604_v52  ;;  %v2803_v52 = vld [vmem:[%s11672_s21] sm:$0xff] }
 0x94b   :  { %4662 = vmatprep.subr.mxu0 %v9045_v53 }
 0x94c   :  { %4663 = vmatpush1.msra.mxu0 %v10595_v7  ;;  %v2806_v7 = vld [vmem:[%s11672_s21 + $0x18] sm:$0xff] }
 0x94d   :  { %4664 = vmatprep.subr.mxu0 %v9045_v53  ;;  %v4544_v50 = vmul.f32 %v4532_v56, %v2806_v7 }
 0x94e   :  { %4665 = vmatpush1.msra.mxu0 %v10591_v13  ;;  %v4541_v13 = vmul.f32 %v10615_v33, %v2803_v52  ;;  %v4718_v33 = vsub.f32 0.0, %v9841_v27 }
 0x94f   :  { %4666 = vmatprep.subr.mxu0 %v9045_v53 }
 0x950   :  { %4667 = vmatpush1.msra.mxu0 %v10584_v15  ;;  %v2805_v15 = vld [vmem:[%s11672_s21 + $0x10] sm:$0xff]  ;;  %v4721_v43 = vmul.f32 1.442695, %v4718_v33  ;;  %v7160_v33 = vld [vmem:[%s11661_s13 + $0xc0] sm:$0xff] }
 0x951   :  { %4668 = vmatprep.subr.mxu0 %v9045_v53  ;;  %v4543_v54 = vmul.f32 %v4530_v37, %v2805_v15 }
 0x952   :  { %4669 = vmatpush1.msra.mxu0 %v10578_v45  ;;  %v2808_v45 = vld [vmem:[%s11672_s21 + $0x28] sm:$0x3]  ;;  %8917 = vpow2.f32 %v4721_v43  ;;  %v7159_v43 = vld [vmem:[%s11661_s13 + $0xb8] sm:$0xff] }
 0x953   :  { %4698 = vmatprep.subr.mxu0 %v9045_v53  ;;  %v4546_v60 = vmul.f32 %v4538_v42, %v2808_v45  ;;  %8919 = vpow2.f32 %v4723_v55  ;;  %v7157_v55 = vld [vmem:[%s11661_s13 + $0xa8] sm:$0xff] }
 0x954   :  { %4699 = vmatpush2.msra.mxu0 %v4599_v48  ;;  %8921 = vpow2.f32 %v4725_v4  ;;  %v4628_v48 = vmul.f32 %v7108_v23, %v10019_v46  ;;  %v7155_v4 = vld [vmem:[%s11661_s13 + $0x98] sm:$0xff] }
 0x955   :  { %4700 = vmatprep.subr.mxu0 %v9045_v53 }
 0x956   :  { %4701 = vmatpush2.msra.mxu0 %v4596_v28 }
 0x957   :  { %4703 = vmatmul.mubr.f32.vlgmr.msra.gmra.mxu0 %v4541_v13  ;;  %4877 = vmatprep.subr.mxu0 %v7127_v5  ;;  %v4965_v5 = vld [vmem:[%s11714_s30 + $0x8] sm:$0xff] }
 0x958   :  { %7110 = vmatprep.mubr.msk.f32.mxu0 %vm269_vm1, %v4544_v50  ;;  %4878 = vmatpush1.msra.mxu0 %v7126_v0  ;;  %v7139_v0 = vld [vmem:[%s11714_s30 + $0x20] sm:$0xff] }
 0x959   :  { %4879 = vmatprep.subr.mxu0 %v7125_v29  ;;  %v4966_v29 = vld [vmem:[%s11714_s30 + $0x10] sm:$0x3] }
 0x95a   :  { %4880 = vmatpush1.msra.mxu0 %v7124_v39  ;;  %v7140_v39 = vld [vmem:[%s11714_s30 + $0x28] sm:$0x3] }
 0x95b   :  { %4708 = vmatmul.mubr.f32.gmra.mxu0 %v4543_v54  ;;  %4881 = vmatprep.subr.mxu0 %v7123_v40  ;;  %v7145_v40 = vld [vmem:[%s11714_s30 + $0x30] sm:$0xff] }
 0x95c   :  { %7111 = vmatprep.mubr.msk.f32.mxu0 %vm269_vm1, %v4546_v60  ;;  %4882 = vmatpush1.msra.mxu0 %v7122_v63  ;;  %v7146_v63 = vld [vmem:[%s11714_s30 + $0x38] sm:$0xff] }
 0x95d   :  { %4883 = vmatprep.subr.mxu0 %v7121_v34  ;;  %v7147_v34 = vld [vmem:[%s11714_s30 + $0x40] sm:$0x3] }
 0x95e   :  { %4884 = vmatpush1.msra.mxu0 %v7120_v16  ;;  %v10836_v16 = vld [vmem:[%s11666_s20] sm:$0xff] }
 0x95f   :  { %4713 = vmatmul.mubr.f32.gmra.mxu0 %v4545_v18  ;;  %4885 = vmatprep.subr.mxu0 %v7119_v26  ;;  %v8918_v12 = vpop.eup %8917  ;;  %v7167_v26 = vld [vmem:[%s11661_s13 + $0xf8] sm:$0xff] }
 0x960   :  { %4925 = vmatprep.mubr.f32.mxu0 %v9045_v53  ;;  %4886 = vmatpush1.msra.mxu0 %v7118_v19  ;;  %v4727_v2 = vadd.f32 1.0, %v8918_v12  ;;  %v8920_v61 = vpop.eup %8919  ;;  %v7166_v19 = vld [vmem:[%s11661_s13 + $0xf0] sm:$0xff] }
 0x961   :  { %4887 = vmatprep.subr.mxu0 %v7117_v11  ;;  %v4728_v36 = vadd.f32 1.0, %v8920_v61  ;;  %v8922_v59 = vpop.eup %8921  ;;  %v7165_v11 = vld [vmem:[%s11661_s13 + $0xe8] sm:$0xff]  ;;  %v7154_v12 = vld [vmem:[%s11661_s13 + $0x90] sm:$0xff]  ;;  %v7152_v61 = vld [vmem:[%s11661_s13 + $0x80] sm:$0xff] }
 0x962   :  { %4888 = vmatpush1.msra.mxu0 %v7116_v6  ;;  %8923 = vrcp.f32 %v4727_v2  ;;  %v4729_v22 = vadd.f32 1.0, %v8922_v59  ;;  %v7164_v6 = vld [vmem:[%s11661_s13 + $0xe0] sm:$0xff]  ;;  %v7153_v2 = vld [vmem:[%s11661_s13 + $0x88] sm:$0xff] }
 0x963   :  { %4889 = vmatprep.subr.mxu0 %v7115_v58  ;;  %8925 = vrcp.f32 %v4728_v36  ;;  %v7163_v58 = vld [vmem:[%s11661_s13 + $0xd8] sm:$0xff]  ;;  %v7131_v36 = vld [vmem:[%s11662_s11 + $0x4] sm:$0xf] }
 0x964   :  { %4890 = vmatpush1.msra.mxu0 %v7114_v20  ;;  %8927 = vrcp.f32 %v4729_v22  ;;  %v7162_v20 = vld [vmem:[%s11661_s13 + $0xd0] sm:$0xff]  ;;  %v11716_v22 = vld [vmem:[#allocation3_spill] sm:$0xff] }
 0x965   :  { %4891 = vmatprep.subr.mxu0 %v7113_v8  ;;  %v7161_v8 = vld [vmem:[%s11661_s13 + $0xc8] sm:$0xff]  ;;  %v11717_v23 = vsub.s32 3, %v11716_v22 }
 0x966   :  { %4892 = vmatpush1.msra.mxu0 %v7112_v3 }
 0x967   :  { %8505 = vmatprep.subr.mxu0 %v9045_v53 }
 0x96f   :  { %v8924_v17 = vpop.eup %8923 }
 0x970   :  { %v4733_v35 = vmul.f32 %v8924_v17, %v9841_v27  ;;  %v8926_v30 = vpop.eup %8925  ;;  %v4951_v17 = vrot.slane %v7131_v36, %v11717_v23 }
 0x971   :  { %v4734_v10 = vmul.f32 %v8926_v30, %v9845_v1  ;;  %v8928_v56 = vpop.eup %8927 }
 0x972   :  { %v4735_v7 = vmul.f32 %v8928_v56, %v9993_v57 }
 0xa17   :  { %v4704_v32 = vpop.f32.mrf.mxu0 }
 0xa18   :  { %v4705_v9 = vadd.f32 %v4704_v32, %v4626_v41  ;;  %v11718_v32 = vsub.s32 2, %v11716_v22 }
 0xa19   :  { %v4706_v24 = vpop.f32.mrf.mxu0 }
 0xa1a   :  { %v4736_v28 = vmul.f32 %v4733_v35, %v4705_v9  ;;  %v5062_v35 = vrot.slane %v7131_v36, %v11718_v32 }
 0xa1b   :  { %v4709_v38 = vpop.f32.mrf.mxu0 }
 0xa1c   :  { %v4710_v37 = vadd.f32 %v4709_v38, %v4627_v49  ;;  %8497 = vmatmul.mubr.f32.vlgmr.msra.gmra.mxu1 %v4736_v28  ;;  %v7133_v49 = vld [vmem:[%s11663_s12 + $0x1] ss:$0 sm:$0xff] }
 0xa1d   :  { %v4711_v52 = vpop.f32.mrf.mxu0  ;;  %8499 = vmatprep.mubr.msk.f32.mxu1 %vm9046_vm2, %v9045_v53 }
 0xa1e   :  { %v4737_v51 = vmul.f32 %v4734_v10, %v4710_v37  ;;  %v11719_v37 = vsub.s32 1, %v11716_v22 }
 0xa1f   :  { %v4714_v27 = vpop.f32.mrf.mxu0 }
 0xa20   :  { %v4715_v21 = vadd.f32 %v4714_v27, %v4628_v48  ;;  %8500 = vmatmul.mubr.f32.gmra.mxu1 %v4737_v51  ;;  %v5164_v56 = vrot.slane %v7131_v36, %v11719_v37  ;;  %v10948_v37 = vld [vmem:[%s11665_s22 + $0x8] sm:$0xff] }
 0xa21   :  { %v4716_v13 = vpop.f32.mrf.mxu0  ;;  %8502 = vmatprep.mubr.msk.f32.mxu1 %vm9046_vm2, %v9045_v53 }
 0xa22   :  { %v4738_v1 = vmul.f32 %v4735_v7, %v4715_v21 }
 0xa24   :  { %8503 = vmatmul.mubr.f32.gmra.mxu1 %v4738_v1 }
 0xa25   :  { %8526 = vmatprep.mubr.msk.f32.mxu1 %vm9046_vm2, %v9045_v53 }
 0xadc   :  { %v4821_v46 = vpop.f32.mrf.mxu1 }
 0xadd   :  { %7128 = vmatmul.mubr.msk.f32.vlgmr.msra.gmra.mxu0 %vm2845_vm3, %v4821_v46 }
 0xade   :  { %v8498_v57 = vpop.f32.mrf.mxu1  ;;  %4931 = vmatprep.mubr.f32.mxu0 %v9045_v53 }
 0xadf   :  { %v11720_v57 = vsub.s32 0, %v11716_v22 }
 0xae0   :  { %v4826_v15 = vpop.f32.mrf.mxu1 }
 0xae1   :  { %7129 = vmatmul.mubr.msk.f32.gmra.mxu0 %vm2845_vm3, %v4826_v15  ;;  %v5266_v15 = vrot.slane %v7131_v36, %v11720_v57  ;;  %v11032_v57 = vld [vmem:[%s11665_s22 + $0x68] sm:$0xff] }
 0xae2   :  { %v8501_v50 = vpop.f32.mrf.mxu1  ;;  %4937 = vmatprep.mubr.f32.mxu0 %v9045_v53 }
 0xae4   :  { %v4831_v45 = vpop.f32.mrf.mxu1 }
 0xae5   :  { %7130 = vmatmul.mubr.msk.f32.gmra.mxu0 %vm2845_vm3, %v4831_v45 }
 0xae6   :  { %v8504_v42 = vpop.f32.mrf.mxu1  ;;  %8511 = vmatprep.mubr.msk.f32.mxu0 %vm9046_vm2, %v9045_v53 }
 0xb9d   :  { %v10751_v54 = vpop.f32.mrf.mxu0 }
 0xb9e   :  { %v4952_v24 = vmul.f32 %v4951_v17, %v10751_v54 }
 0xb9f   :  { %v10753_v31 = vpop.f32.mrf.mxu0 }
 0xba0   :  { %v4961_v27 = vadd.f32 %v7133_v49, %v4952_v24 }
 0xba1   :  { %v10755_v60 = vpop.f32.mrf.mxu0 }
 0xba2   :  { %v4953_v51 = vmul.f32 %v4951_v17, %v10755_v60 }
 0xba3   :  { %v10757_v18 = vpop.f32.mrf.mxu0 }
 0xba4   :  { %v4962_v50 = vadd.f32 %v7133_v49, %v4953_v51  ;;  %v10969_v51 = vld [vmem:[%s11665_s22 + $0x20] sm:$0xff] }
 0xba5   :  { %v10759_v47 = vpop.f32.mrf.mxu0 }
 0xba6   :  { %8506 = vmatpush3.msk.msra.mxu0 %vm2969_vm4, %v10759_v47  ;;  %8521 = vmatpush3.msk.msra.mxu1 %vm2969_vm4, %v10759_v47  ;;  %v4954_v42 = vmul.f32 %v4951_v17, %v10759_v47 }
 0xba7   :  { %8507 = vmatprep.subr.mxu0 %v9045_v53  ;;  %8522 = vmatprep.subr.mxu1 %v9045_v53  ;;  %v10906_v59 = vpop.f32.mrf.mxu0 }
 0xba8   :  { %8508 = vmatpush3.msra.mxu0 %v10755_v60  ;;  %8523 = vmatpush3.msra.mxu1 %v10755_v60 }
 0xba9   :  { %8509 = vmatprep.subr.mxu0 %v9045_v53  ;;  %8524 = vmatprep.subr.mxu1 %v9045_v53 }
 0xbaa   :  { %8510 = vmatpush3.msra.mxu0 %v10751_v54  ;;  %8525 = vmatpush3.msra.mxu1 %v10751_v54 }
 0xbab   :  { %8512 = vmatmul.mubr.msk.f32.vlgmr.msra.gmra.mxu0 %vm2959_vm5, %v4964_v25  ;;  %8535 = vmatprep.subr.mxu0 %v9045_v53 }
 0xbac   :  { %8536 = vmatpush3.msk.msra.mxu0 %vm2969_vm4, %v10759_v47  ;;  %8527 = vmatmul.mubr.msk.f32.vlgmr.msra.gmra.mxu1 %vm2959_vm5, %v7138_v62 }
 0xbad   :  { %8537 = vmatprep.subr.mxu0 %v9045_v53  ;;  %8514 = vmatprep.mubr.msk.f32.mxu0 %vm9046_vm2, %v9045_v53 }
 0xbae   :  { %8538 = vmatpush3.msra.mxu0 %v10755_v60  ;;  %8529 = vmatprep.mubr.msk.f32.mxu1 %vm9046_vm2, %v9045_v53 }
 0xbaf   :  { %8515 = vmatmul.mubr.msk.f32.gmra.mxu0 %vm2959_vm5, %v4965_v5  ;;  %8539 = vmatprep.subr.mxu0 %v9045_v53 }
 0xbb0   :  { %8540 = vmatpush3.msra.mxu0 %v10751_v54  ;;  %8530 = vmatmul.mubr.msk.f32.gmra.mxu1 %vm2959_vm5, %v7139_v0 }
 0xbb1   :  { %8517 = vmatprep.mubr.msk.f32.mxu0 %vm9046_vm2, %v9045_v53  ;;  %8532 = vmatprep.mubr.msk.f32.mxu1 %vm9046_vm2, %v9045_v53 }
 0xbb2   :  { %8550 = vmatprep.subr.mxu1 %v9045_v53 }
 0xbb3   :  { %8518 = vmatmul.mubr.msk.f32.gmra.mxu0 %vm2959_vm5, %v4966_v29  ;;  %8551 = vmatpush3.msra.mxu1 %v7167_v26 }
 0xbb4   :  { %8533 = vmatmul.mubr.msk.f32.gmra.mxu1 %vm2959_vm5, %v7140_v39  ;;  %8541 = vmatprep.mubr.msk.f32.mxu0 %vm9046_vm2, %v9045_v53 }
 0xbb5   :  { %8582 = vmatprep.mubr.msk.f32.mxu1 %vm9046_vm2, %v9045_v53  ;;  %8552 = vmatprep.subr.mxu1 %v9045_v53 }
 0xbb6   :  { %8553 = vmatpush3.msra.mxu1 %v7166_v19 }
 0xbb7   :  { %8542 = vmatmul.mubr.msk.f32.vlgmr.msra.gmra.mxu0 %vm2959_vm5, %v7145_v40  ;;  %8554 = vmatprep.subr.mxu1 %v9045_v53  ;;  %v4963_v40 = vadd.f32 %v7133_v49, %v4954_v42  ;;  %v11060_v42 = vld [vmem:[%s11665_s22 + $0x88] sm:$0xff] }
 0xbb8   :  { %8544 = vmatprep.mubr.msk.f32.mxu0 %vm9046_vm2, %v9045_v53  ;;  %8555 = vmatpush3.msra.mxu1 %v7165_v11 }
 0xbb9   :  { %8556 = vmatprep.subr.mxu1 %v9045_v53 }
 0xbba   :  { %8557 = vmatpush3.msra.mxu1 %v7164_v6 }
 0xbbb   :  { %8545 = vmatmul.mubr.msk.f32.gmra.mxu0 %vm2959_vm5, %v7146_v63  ;;  %8558 = vmatprep.subr.mxu1 %v9045_v53 }
 0xbbc   :  { %8547 = vmatprep.mubr.msk.f32.mxu0 %vm9046_vm2, %v9045_v53  ;;  %8559 = vmatpush3.msra.mxu1 %v7163_v58 }
 0xbbd   :  { %8560 = vmatprep.subr.mxu1 %v9045_v53 }
 0xbbe   :  { %8561 = vmatpush3.msra.mxu1 %v7162_v20 }
 0xbbf   :  { %8548 = vmatmul.mubr.msk.f32.gmra.mxu0 %vm2959_vm5, %v7147_v34  ;;  %8562 = vmatprep.subr.mxu1 %v9045_v53 }
 0xbc0   :  { %8597 = vmatprep.mubr.msk.f32.mxu0 %vm2959_vm5, %v10836_v16  ;;  %8563 = vmatpush3.msra.mxu1 %v7161_v8 }
 0xbc1   :  { %8564 = vmatprep.subr.mxu1 %v9045_v53 }
 0xbc2   :  { %8565 = vmatpush3.msra.mxu1 %v7160_v33 }
 0xbc3   :  { %8566 = vmatprep.subr.mxu1 %v9045_v53 }
 0xbc4   :  { %8567 = vmatpush3.msra.mxu1 %v7159_v43 }
 0xbc5   :  { %8568 = vmatprep.subr.mxu1 %v9045_v53 }
 0xbc6   :  { %8569 = vmatpush3.msra.mxu1 %v7158_v44 }
 0xbc7   :  { %8570 = vmatprep.subr.mxu1 %v9045_v53 }
 0xbc8   :  { %8571 = vmatpush3.msra.mxu1 %v7157_v55 }
 0xbc9   :  { %8572 = vmatprep.subr.mxu1 %v9045_v53 }
 0xbca   :  { %8573 = vmatpush3.msra.mxu1 %v7156_v14 }
 0xbcb   :  { %8574 = vmatprep.subr.mxu1 %v9045_v53 }
 0xbcc   :  { %8575 = vmatpush3.msra.mxu1 %v7155_v4 }
 0xbcd   :  { %8576 = vmatprep.subr.mxu1 %v9045_v53 }
 0xbce   :  { %8577 = vmatpush3.msra.mxu1 %v7154_v12 }
 0xbcf   :  { %8578 = vmatprep.subr.mxu1 %v9045_v53 }
 0xbd0   :  { %8579 = vmatpush3.msra.mxu1 %v7153_v2 }
 0xbd1   :  { %8580 = vmatprep.subr.mxu1 %v9045_v53 }
 0xbd2   :  { %8581 = vmatpush3.msra.mxu1 %v7152_v61 }
 0xc6b   :  { %v5045_v41 = vpop.f32.mrf.mxu0 }
 0xc6c   :  { %v5147_v9 = vpop.f32.mrf.mxu1  ;;  %v5063_v10 = vmul.f32 %v5062_v35, %v5045_v41 }
 0xc6d   :  { %v8513_v30 = vpop.f32.mrf.mxu0  ;;  %v5165_v3 = vmul.f32 %v5164_v56, %v5147_v9 }
 0xc6e   :  { %v8528_v28 = vpop.f32.mrf.mxu1  ;;  %v5066_v1 = vadd.f32 %v5063_v10, %v4961_v27  ;;  %v7189_v10 = vld [vmem:[%s11664_s17 + $0x8] sm:$0xff]  ;;  %v10983_v27 = vld [vmem:[%s11665_s22 + $0x30] sm:$0xff] }
 0xc6f   :  { %v5050_v38 = vpop.f32.mrf.mxu0  ;;  %8624 = vmatprep.subr.mxu1 %v7189_v10 }
 0xc70   :  { %v5152_v52 = vpop.f32.mrf.mxu1  ;;  %v5064_v21 = vmul.f32 %v5062_v35, %v5050_v38  ;;  %v5168_v60 = vadd.f32 %v5165_v3, %v5066_v1  ;;  %v10938_v38 = vld [vmem:[%s11665_s22] sm:$0xff]  ;;  %v11011_v1 = vld [vmem:[%s11665_s22 + $0x50] sm:$0xff]  ;;  %v11018_v3 = vld [vmem:[%s11665_s22 + $0x58] sm:$0xff] }
 0xc71   :  { %v8516_v48 = vpop.f32.mrf.mxu0  ;;  %v5166_v62 = vmul.f32 %v5164_v56, %v5152_v52  ;;  %v10962_v52 = vld [vmem:[%s11665_s22 + $0x18] sm:$0xff] }
 0xc72   :  { %v8531_v7 = vpop.f32.mrf.mxu1  ;;  %v5067_v25 = vadd.f32 %v5064_v21, %v4962_v50  ;;  %v10976_v48 = vld [vmem:[%s11665_s22 + $0x28] sm:$0xff]  ;;  %v10997_v21 = vld [vmem:[%s11665_s22 + $0x40] sm:$0xff]  ;;  %v11046_v50 = vld [vmem:[%s11665_s22 + $0x78] sm:$0xff] }
 0xc73   :  { %v5055_v13 = vpop.f32.mrf.mxu0  ;;  %v10990_v7 = vld [vmem:[%s11665_s22 + $0x38] sm:$0xff] }
 0xc74   :  { %v5157_v46 = vpop.f32.mrf.mxu1  ;;  %v5065_v0 = vmul.f32 %v5062_v35, %v5055_v13  ;;  %v5169_v34 = vadd.f32 %v5166_v62, %v5067_v25  ;;  %v11004_v13 = vld [vmem:[%s11665_s22 + $0x48] sm:$0xff] }
 0xc75   :  { %v8519_v45 = vpop.f32.mrf.mxu0  ;;  %v5167_v11 = vmul.f32 %v5164_v56, %v5157_v46  ;;  %v10955_v56 = vld [vmem:[%s11665_s22 + $0x10] sm:$0xff]  ;;  %v11025_v46 = vld [vmem:[%s11665_s22 + $0x60] sm:$0xff] }
 0xc76   :  { %v8534_v54 = vpop.f32.mrf.mxu1  ;;  %v5068_v19 = vadd.f32 %v5065_v0, %v4963_v40  ;;  %v11053_v45 = vld [vmem:[%s11665_s22 + $0x80] sm:$0xff] }
 0xc77   :  { %v5249_v5 = vpop.f32.mrf.mxu0  ;;  %v7169_v54 = vld [vmem:[%s11667_s14 + $0x1] ss:$0 sm:$0xff] }
 0xc78   :  { %v5267_v29 = vmul.f32 %v5266_v15, %v5249_v5  ;;  %v5170_v43 = vadd.f32 %v5167_v11, %v5068_v19 }
 0xc79   :  { %v8543_v39 = vpop.f32.mrf.mxu0 }
 0xc7a   :  { %v5270_v63 = vadd.f32 %v5267_v29, %v5168_v60 }
 0xc7b   :  { %v5254_v26 = vpop.f32.mrf.mxu0 }
 0xc7c   :  { %v5273_v6 = vsub.f32 0.0, %v5270_v63  ;;  %v5268_v58 = vmul.f32 %v5266_v15, %v5254_v26 }
 0xc7d   :  { %v8546_v20 = vpop.f32.mrf.mxu0 }
 0xc7e   :  { %v5276_v8 = vmul.f32 1.442695, %v5273_v6  ;;  %v5271_v33 = vadd.f32 %v5268_v58, %v5169_v34 }
 0xc7f   :  { %v5259_v47 = vpop.f32.mrf.mxu0 }
 0xc80   :  { %8929 = vpow2.f32 %v5276_v8  ;;  %v5274_v44 = vsub.f32 0.0, %v5271_v33  ;;  %v5269_v55 = vmul.f32 %v5266_v15, %v5259_v47  ;;  %v11039_v15 = vld [vmem:[%s11665_s22 + $0x70] sm:$0xff] }
 0xc81   :  { %v8549_v14 = vpop.f32.mrf.mxu0 }
 0xc82   :  { %v5278_v4 = vmul.f32 1.442695, %v5274_v44  ;;  %v5272_v12 = vadd.f32 %v5269_v55, %v5170_v43 }
 0xc84   :  { %8931 = vpow2.f32 %v5278_v4  ;;  %v5275_v2 = vsub.f32 0.0, %v5272_v12 }
 0xc86   :  { %v5280_v61 = vmul.f32 1.442695, %v5275_v2 }
 0xc88   :  { %8933 = vpow2.f32 %v5280_v61 }
 0xc8d   :  { %v8930_v36 = vpop.eup %8929 }
 0xc8e   :  { %v5282_v22 = vadd.f32 1.0, %v8930_v36 }
 0xc90   :  { %8935 = vrcp.f32 %v5282_v22 }
 0xc91   :  { %v8932_v23 = vpop.eup %8931 }
 0xc92   :  { %v5283_v17 = vadd.f32 1.0, %v8932_v23 }
 0xc94   :  { %8937 = vrcp.f32 %v5283_v17 }
 0xc95   :  { %v8934_v41 = vpop.eup %8933 }
 0xc96   :  { %v5284_v32 = vadd.f32 1.0, %v8934_v41 }
 0xc98   :  { %8939 = vrcp.f32 %v5284_v32 }
 0xc9d   :  { %v8936_v35 = vpop.eup %8935 }
 0xc9e   :  { %v10922_v9 = vmul.f32 %v8936_v35, %v5270_v63 }
 0xca0   :  { %8583 = vmatmul.mubr.f32.vlgmr.msra.gmra.mxu1 %v10922_v9 }
 0xca1   :  { %v8938_v30 = vpop.eup %8937  ;;  %8585 = vmatprep.mubr.msk.f32.mxu1 %vm9046_vm2, %v9045_v53  ;;  %8625 = vmatpush3.msra.mxu1 %v7189_v10 }
 0xca2   :  { %v10927_v24 = vmul.f32 %v8938_v30, %v5271_v33 }
 0xca4   :  { %8586 = vmatmul.mubr.f32.gmra.mxu1 %v10927_v24 }
 0xca5   :  { %v8940_v28 = vpop.eup %8939  ;;  %8588 = vmatprep.mubr.msk.f32.mxu1 %vm9046_vm2, %v9045_v53 }
 0xca6   :  { %v10932_v49 = vmul.f32 %v8940_v28, %v5272_v12 }
 0xca8   :  { %8589 = vmatmul.mubr.f32.gmra.mxu1 %v10932_v49 }
 0xca9   :  { %8626 = vmatprep.mubr.msk.f32.mxu1 %vm3633_vm6, %v10938_v38 }
 0xcac   :  { %8627 = vmatmul.mubr.msk.f32.vlgmr.msra.gmra.mxu1 %vm3633_vm6, %v10948_v37 }
 0xcad   :  { %8629 = vmatprep.mubr.msk.f32.mxu1 %vm3633_vm6, %v10955_v56 }
 0xcb0   :  { %8630 = vmatmul.mubr.msk.f32.gmra.mxu1 %vm3633_vm6, %v10962_v52 }
 0xcb1   :  { %8632 = vmatprep.mubr.msk.f32.mxu1 %vm3633_vm6, %v10969_v51 }
 0xcb4   :  { %8633 = vmatmul.mubr.msk.f32.gmra.mxu1 %vm3633_vm6, %v10976_v48 }
 0xcb5   :  { %8635 = vmatprep.mubr.msk.f32.mxu1 %vm3633_vm6, %v10983_v27 }
 0xcb8   :  { %8636 = vmatmul.mubr.msk.f32.gmra.mxu1 %vm3633_vm6, %v10990_v7 }
 0xcb9   :  { %8638 = vmatprep.mubr.msk.f32.mxu1 %vm3633_vm6, %v10997_v21 }
 0xcbc   :  { %8639 = vmatmul.mubr.msk.f32.gmra.mxu1 %vm3633_vm6, %v11004_v13 }
 0xcbd   :  { %8641 = vmatprep.mubr.msk.f32.mxu1 %vm3633_vm6, %v11011_v1 }
 0xcc0   :  { %8642 = vmatmul.mubr.msk.f32.gmra.mxu1 %vm3633_vm6, %v11018_v3 }
 0xcc1   :  { %8644 = vmatprep.mubr.msk.f32.mxu1 %vm3633_vm6, %v11025_v46 }
 0xcc4   :  { %8645 = vmatmul.mubr.msk.f32.gmra.mxu1 %vm3633_vm6, %v11032_v57 }
 0xcc5   :  { %8647 = vmatprep.mubr.msk.f32.mxu1 %vm3633_vm6, %v11039_v15 }
 0xcc8   :  { %8648 = vmatmul.mubr.msk.f32.gmra.mxu1 %vm3633_vm6, %v11046_v50 }
 0xcc9   :  { %8650 = vmatprep.mubr.msk.f32.mxu1 %vm3633_vm6, %v11053_v45 }
 0xccc   :  { %8651 = vmatmul.mubr.msk.f32.gmra.mxu1 %vm3633_vm6, %v11060_v42 }
 0xd60   :  { %v5382_v25 = vpop.f32.mrf.mxu1 }
 0xd61   :  { %v5383_v62 = vadd.f32 %v7169_v54, %v5382_v25 }
 0xd62   :  { %v8584_v5 = vpop.f32.mrf.mxu1 }
 0xd63   :  { %v5399_v60 = vand.u32 2147483647, %v5383_v62  ;;  %v5396_v30 = vmax.f32 %v5383_v62, 0.0  ;;  %v11077_v62 = vld [vmem:[%s11666_s20 + $0x8] sm:$0xff]  ;;  %v11086_v5 = vld [vmem:[%s11666_s20 + $0x10] sm:$0xff] }
 0xd64   :  { %v5387_v0 = vpop.f32.mrf.mxu1 }
 0xd65   :  { %v5402_v29 = vsub.f32 0.0, %v5399_v60  ;;  %v5388_v39 = vadd.f32 %v7169_v54, %v5387_v0  ;;  %v11095_v60 = vld [vmem:[%s11666_s20 + $0x18] sm:$0xff]  ;;  %v11103_v0 = vld [vmem:[%s11666_s20 + $0x20] sm:$0xff] }
 0xd66   :  { %v8587_v40 = vpop.f32.mrf.mxu1 }
 0xd67   :  { %v5400_v63 = vand.u32 2147483647, %v5388_v39  ;;  %v5405_v34 = vmul.f32 1.442695, %v5402_v29  ;;  %v5397_v22 = vmax.f32 %v5388_v39, 0.0  ;;  %v11111_v29 = vld [vmem:[%s11666_s20 + $0x28] sm:$0xff] }
 0xd68   :  { %v5392_v26 = vpop.f32.mrf.mxu1  ;;  %v11119_v39 = vld [vmem:[%s11666_s20 + $0x30] sm:$0xff]  ;;  %v11126_v40 = vld [vmem:[%s11666_s20 + $0x38] sm:$0xff] }
 0xd69   :  { %v5403_v19 = vsub.f32 0.0, %v5400_v63  ;;  %v5393_v11 = vadd.f32 %v7169_v54, %v5392_v26  ;;  %8941 = vpow2.f32 %v5405_v34  ;;  %v11133_v63 = vld [vmem:[%s11666_s20 + $0x40] sm:$0xff]  ;;  %v11140_v34 = vld [vmem:[%s11666_s20 + $0x48] sm:$0xff]  ;;  %v11147_v26 = vld [vmem:[%s11666_s20 + $0x50] sm:$0xff] }
 0xd6a   :  { %v8590_v6 = vpop.f32.mrf.mxu1 }
 0xd6b   :  { %v5407_v58 = vmul.f32 1.442695, %v5403_v19  ;;  %v5401_v20 = vand.u32 2147483647, %v5393_v11  ;;  %v5398_v23 = vmax.f32 %v5393_v11, 0.0  ;;  %v11154_v19 = vld [vmem:[%s11666_s20 + $0x58] sm:$0xff] }
 0xd6c   :  { %v11161_v11 = vld [vmem:[%s11666_s20 + $0x60] sm:$0xff]  ;;  %v11168_v6 = vld [vmem:[%s11666_s20 + $0x68] sm:$0xff] }
 0xd6d   :  { %8943 = vpow2.f32 %v5407_v58  ;;  %v5404_v8 = vsub.f32 0.0, %v5401_v20  ;;  %v11175_v58 = vld [vmem:[%s11666_s20 + $0x70] sm:$0xff]  ;;  %v11182_v20 = vld [vmem:[%s11666_s20 + $0x78] sm:$0xff] }
 0xd6f   :  { %v5409_v33 = vmul.f32 1.442695, %v5404_v8  ;;  %v11189_v8 = vld [vmem:[%s11666_s20 + $0x80] sm:$0xff] }
 0xd71   :  { %8945 = vpow2.f32 %v5409_v33  ;;  %v11196_v33 = vld [vmem:[%s11666_s20 + $0x88] sm:$0xff] }
 0xd76   :  { %v8942_v47 = vpop.eup %8941 }
 0xd77   :  { %v5411_v55 = vadd.f32 1.0, %v8942_v47  ;;  %v7208_v47 = vld [vmem:[%s11668_s15 + $0x8] sm:$0xff] }
 0xd7a   :  { %v8944_v43 = vpop.eup %8943 }
 0xd7b   :  { %v5412_v44 = vadd.f32 1.0, %v8944_v43 }
 0xd7d   :  { %8947 = vlog2.f32 %v5412_v44 }
 0xd7e   :  { %v8946_v14 = vpop.eup %8945  ;;  %8949 = vlog2.f32 %v5411_v55 }
 0xd7f   :  { %v5413_v4 = vadd.f32 1.0, %v8946_v14 }
 0xd81   :  { %8951 = vlog2.f32 %v5413_v4 }
 0xd8a   :  { %v8948_v12 = vpop.eup %8947 }
 0xd8b   :  { %v8950_v2 = vpop.eup %8949  ;;  %v5417_v61 = vmul.f32 0.6931472, %v8948_v12 }
 0xd8c   :  { %v5415_v41 = vmul.f32 0.6931472, %v8950_v2 }
 0xd8d   :  { %v5421_v35 = vadd.f32 %v5417_v61, %v5397_v22 }
 0xd8e   :  { %v8952_v36 = vpop.eup %8951  ;;  %v5420_v10 = vadd.f32 %v5415_v41, %v5396_v30 }
 0xd8f   :  { %v5419_v17 = vmul.f32 0.6931472, %v8952_v36  ;;  %v5424_v54 = vmul.f32 %v5421_v35, %v10927_v24 }
 0xd90   :  { %v5423_v25 = vmul.f32 %v5420_v10, %v10922_v9 }
 0xd91   :  { %v5422_v32 = vadd.f32 %v5419_v17, %v5398_v23 }
 0xd93   :  { %8591 = vmatprep.subr.msk.mxu0 %vm2969_vm4, %v5422_v32  ;;  %v5425_v28 = vmul.f32 %v5422_v32, %v10932_v49 }
 0xd94   :  { %8592 = vmatpush3.msk.msra.mxu0 %vm2969_vm4, %v5422_v32 }
 0xd95   :  { %8593 = vmatprep.subr.mxu0 %v5421_v35  ;;  %8691 = vmatprep.subr.msk.mxu1 %vm2969_vm4, %v5425_v28 }
 0xd96   :  { %8594 = vmatpush3.msra.mxu0 %v5421_v35  ;;  %8692 = vmatpush3.msk.msra.mxu1 %vm2969_vm4, %v5425_v28 }
 0xd97   :  { %8595 = vmatprep.subr.mxu0 %v5420_v10  ;;  %8693 = vmatprep.subr.mxu1 %v5424_v54 }
 0xd98   :  { %8596 = vmatpush3.msra.mxu0 %v5420_v10  ;;  %8694 = vmatpush3.msra.mxu1 %v5424_v54  ;;  %v7261_v54 = vld [vmem:[%s11669_s16 + $0xf8] sm:$0xff] }
 0xd99   :  { %8598 = vmatmul.mubr.msk.f32.vlgmr.msra.gmra.mxu0 %vm2959_vm5, %v11077_v62  ;;  %8653 = vmatprep.subr.mxu0 %v9045_v53 }
 0xd9a   :  { %8695 = vmatprep.subr.mxu1 %v5423_v25  ;;  %8654 = vmatpush3.xpose.msra.mxu0 %v10932_v49 }
 0xd9b   :  { %8696 = vmatpush3.msra.mxu1 %v5423_v25  ;;  %8600 = vmatprep.mubr.msk.f32.mxu0 %vm2959_vm5, %v11086_v5 }
 0xd9c   :  { %8655 = vmatprep.subr.mxu0 %v9045_v53  ;;  %6539 = vmatprep.subr.mxu1 %v9045_v53 }
 0xd9d   :  { %8601 = vmatmul.mubr.msk.f32.gmra.mxu0 %vm2959_vm5, %v11095_v60 }
 0xd9e   :  { %8656 = vmatpush3.xpose.msra.mxu0 %v10927_v24  ;;  %8603 = vmatprep.mubr.msk.f32.mxu0 %vm2959_vm5, %v11103_v0 }
 0xd9f   :  { %8657 = vmatprep.subr.mxu0 %v9045_v53 }
 0xda1   :  { %8604 = vmatmul.mubr.msk.f32.gmra.mxu0 %vm2959_vm5, %v11111_v29 }
 0xda2   :  { %8658 = vmatpush3.xpose.msra.mxu0 %v10922_v9  ;;  %8606 = vmatprep.mubr.msk.f32.mxu0 %vm2959_vm5, %v11119_v39 }
 0xda5   :  { %8607 = vmatmul.mubr.msk.f32.gmra.mxu0 %vm2959_vm5, %v11126_v40 }
 0xda6   :  { %8609 = vmatprep.mubr.msk.f32.mxu0 %vm2959_vm5, %v11133_v63 }
 0xda9   :  { %8610 = vmatmul.mubr.msk.f32.gmra.mxu0 %vm2959_vm5, %v11140_v34 }
 0xdaa   :  { %8612 = vmatprep.mubr.msk.f32.mxu0 %vm2959_vm5, %v11147_v26 }
 0xdad   :  { %8613 = vmatmul.mubr.msk.f32.gmra.mxu0 %vm2959_vm5, %v11154_v19 }
 0xdae   :  { %8615 = vmatprep.mubr.msk.f32.mxu0 %vm2959_vm5, %v11161_v11 }
 0xdb1   :  { %8616 = vmatmul.mubr.msk.f32.gmra.mxu0 %vm2959_vm5, %v11168_v6 }
 0xdb2   :  { %8618 = vmatprep.mubr.msk.f32.mxu0 %vm2959_vm5, %v11175_v58 }
 0xdb5   :  { %8619 = vmatmul.mubr.msk.f32.gmra.mxu0 %vm2959_vm5, %v11182_v20 }
 0xdb6   :  { %8621 = vmatprep.mubr.msk.f32.mxu0 %vm2959_vm5, %v11189_v8 }
 0xdb9   :  { %8622 = vmatmul.mubr.msk.f32.gmra.mxu0 %vm2959_vm5, %v11196_v33 }
 0xdba   :  { %8659 = vmatprep.mubr.msk.f32.mxu0 %vm9046_vm2, %v9045_v53 }
 0xdbd   :  { %8660 = vmatmul.mubr.f32.vlgmr.msra.gmra.mxu0 %v7208_v47  ;;  %v7260_v47 = vld [vmem:[%s11669_s16 + $0xf0] sm:$0xff] }
 0xdbe   :  { %8664 = vmatprep.mubr.msk.f32.mxu0 %vm3633_vm6, %v10938_v38 }
 0xe59   :  { %v11207_v43 = vpop.f32.mrf.mxu0 }
 0xe5b   :  { %v11209_v44 = vpop.f32.mrf.mxu0 }
 0xe5d   :  { %v11211_v55 = vpop.f32.mrf.mxu0 }
 0xe5f   :  { %v11213_v14 = vpop.f32.mrf.mxu0 }
 0xe61   :  { %v11215_v4 = vpop.f32.mrf.mxu0 }
 0xe63   :  { %v11217_v12 = vpop.f32.mrf.mxu0 }
 0xe65   :  { %v11219_v2 = vpop.f32.mrf.mxu0 }
 0xe67   :  { %v11221_v61 = vpop.f32.mrf.mxu0 }
 0xe69   :  { %v11223_v36 = vpop.f32.mrf.mxu0 }
 0xe6b   :  { %v11225_v22 = vpop.f32.mrf.mxu0 }
 0xe6d   :  { %v11227_v38 = vpop.f32.mrf.mxu0 }
 0xe6f   :  { %v11229_v23 = vpop.f32.mrf.mxu0 }
 0xe71   :  { %v11231_v17 = vpop.f32.mrf.mxu0 }
 0xe73   :  { %v11233_v41 = vpop.f32.mrf.mxu0 }
 0xe75   :  { %v11235_v32 = vpop.f32.mrf.mxu0 }
 0xe77   :  { %v11237_v35 = vpop.f32.mrf.mxu0 }
 0xe79   :  { %v11239_v30 = vpop.f32.mrf.mxu0 }
 0xe7b   :  { %v11241_v28 = vpop.f32.mrf.mxu0 }
 0xe7d   :  { %v5863_v10 = vpop.f32.mrf.mxu0 }
 0xe7e   :  { %8662 = vmatprep.subr.mxu0 %v5863_v10 }
 0xe7f   :  { %8663 = vmatpush3.msra.mxu0 %v5863_v10  ;;  %v8661_v25 = vpop.f32.mrf.mxu0  ;;  %v7259_v10 = vld [vmem:[%s11669_s16 + $0xe8] sm:$0xff] }
 0xe80   :  { %8665 = vmatmul.mubr.msk.f32.vlgmr.msra.gmra.mxu0 %vm3633_vm6, %v10948_v37  ;;  %8724 = vmatprep.subr.mxu0 %v9045_v53  ;;  %v7258_v37 = vld [vmem:[%s11669_s16 + $0xe0] sm:$0xff] }
 0xe81   :  { %8667 = vmatprep.mubr.msk.f32.mxu0 %vm3633_vm6, %v10955_v56  ;;  %8725 = vmatpush3.msra.mxu0 %v7261_v54  ;;  %v7257_v56 = vld [vmem:[%s11669_s16 + $0xd8] sm:$0xff] }
 0xe82   :  { %8726 = vmatprep.subr.mxu0 %v9045_v53 }
 0xe83   :  { %8727 = vmatpush3.msra.mxu0 %v7260_v47 }
 0xe84   :  { %8668 = vmatmul.mubr.msk.f32.gmra.mxu0 %vm3633_vm6, %v10962_v52  ;;  %8728 = vmatprep.subr.mxu0 %v9045_v53  ;;  %v7256_v52 = vld [vmem:[%s11669_s16 + $0xd0] sm:$0xff] }
 0xe85   :  { %8670 = vmatprep.mubr.msk.f32.mxu0 %vm3633_vm6, %v10969_v51  ;;  %8729 = vmatpush3.msra.mxu0 %v7259_v10  ;;  %v7255_v51 = vld [vmem:[%s11669_s16 + $0xc8] sm:$0xff] }
 0xe86   :  { %8730 = vmatprep.subr.mxu0 %v9045_v53 }
 0xe87   :  { %8731 = vmatpush3.msra.mxu0 %v7258_v37 }
 0xe88   :  { %8671 = vmatmul.mubr.msk.f32.gmra.mxu0 %vm3633_vm6, %v10976_v48  ;;  %8732 = vmatprep.subr.mxu0 %v9045_v53  ;;  %v7254_v48 = vld [vmem:[%s11669_s16 + $0xc0] sm:$0xff] }
 0xe89   :  { %8673 = vmatprep.mubr.msk.f32.mxu0 %vm3633_vm6, %v10983_v27  ;;  %8733 = vmatpush3.msra.mxu0 %v7257_v56  ;;  %v7253_v27 = vld [vmem:[%s11669_s16 + $0xb8] sm:$0xff] }
 0xe8a   :  { %8734 = vmatprep.subr.mxu0 %v9045_v53 }
 0xe8b   :  { %8735 = vmatpush3.msra.mxu0 %v7256_v52 }
 0xe8c   :  { %8674 = vmatmul.mubr.msk.f32.gmra.mxu0 %vm3633_vm6, %v10990_v7  ;;  %8736 = vmatprep.subr.mxu0 %v9045_v53  ;;  %v7252_v7 = vld [vmem:[%s11669_s16 + $0xb0] sm:$0xff] }
 0xe8d   :  { %8676 = vmatprep.mubr.msk.f32.mxu0 %vm3633_vm6, %v10997_v21  ;;  %8737 = vmatpush3.msra.mxu0 %v7255_v51  ;;  %v7251_v21 = vld [vmem:[%s11669_s16 + $0xa8] sm:$0xff] }
 0xe8e   :  { %8738 = vmatprep.subr.mxu0 %v9045_v53 }
 0xe8f   :  { %8739 = vmatpush3.msra.mxu0 %v7254_v48 }
 0xe90   :  { %8677 = vmatmul.mubr.msk.f32.gmra.mxu0 %vm3633_vm6, %v11004_v13  ;;  %8740 = vmatprep.subr.mxu0 %v9045_v53  ;;  %v7250_v13 = vld [vmem:[%s11669_s16 + $0xa0] sm:$0xff] }
 0xe91   :  { %8679 = vmatprep.mubr.msk.f32.mxu0 %vm3633_vm6, %v11011_v1  ;;  %8741 = vmatpush3.msra.mxu0 %v7253_v27  ;;  %v7249_v1 = vld [vmem:[%s11669_s16 + $0x98] sm:$0xff] }
 0xe92   :  { %8742 = vmatprep.subr.mxu0 %v9045_v53 }
 0xe93   :  { %8743 = vmatpush3.msra.mxu0 %v7252_v7 }
 0xe94   :  { %8680 = vmatmul.mubr.msk.f32.gmra.mxu0 %vm3633_vm6, %v11018_v3  ;;  %8744 = vmatprep.subr.mxu0 %v9045_v53  ;;  %v7248_v3 = vld [vmem:[%s11669_s16 + $0x90] sm:$0xff] }
 0xe95   :  { %8682 = vmatprep.mubr.msk.f32.mxu0 %vm3633_vm6, %v11025_v46  ;;  %8745 = vmatpush3.msra.mxu0 %v7251_v21  ;;  %v7247_v46 = vld [vmem:[%s11669_s16 + $0x88] sm:$0xff] }
 0xe96   :  { %8746 = vmatprep.subr.mxu0 %v9045_v53 }
 0xe97   :  { %8747 = vmatpush3.msra.mxu0 %v7250_v13 }
 0xe98   :  { %8683 = vmatmul.mubr.msk.f32.gmra.mxu0 %vm3633_vm6, %v11032_v57  ;;  %8748 = vmatprep.subr.mxu0 %v9045_v53  ;;  %v7246_v57 = vld [vmem:[%s11669_s16 + $0x80] sm:$0xff] }
 0xe99   :  { %8685 = vmatprep.mubr.msk.f32.mxu0 %vm3633_vm6, %v11039_v15  ;;  %8749 = vmatpush3.msra.mxu0 %v7249_v1  ;;  %v9037_v15 = vld [vmem:[%s11670_s23 + $0x8] sm:$0xff] }
 0xe9a   :  { %8750 = vmatprep.subr.mxu0 %v9045_v53 }
 0xe9b   :  { %8751 = vmatpush3.msra.mxu0 %v7248_v3 }
 0xe9c   :  { %8686 = vmatmul.mubr.msk.f32.gmra.mxu0 %vm3633_vm6, %v11046_v50  ;;  %8752 = vmatprep.subr.mxu0 %v9045_v53  ;;  %v9038_v50 = vld [vmem:[%s11670_s23] sm:$0xff] }
 0xe9d   :  { %8688 = vmatprep.mubr.msk.f32.mxu0 %vm3633_vm6, %v11053_v45  ;;  %8753 = vmatpush3.msra.mxu0 %v7247_v46 }
 0xe9e   :  { %8754 = vmatprep.subr.mxu0 %v9045_v53 }
 0xe9f   :  { %8755 = vmatpush3.msra.mxu0 %v7246_v57 }
 0xea0   :  { %8689 = vmatmul.mubr.msk.f32.gmra.mxu0 %vm3633_vm6, %v11060_v42  ;;  %6388 = vmatprep.subr.mxu0 %v9037_v15 }
 0xea1   :  { %8756 = vmatprep.mubr.msk.f32.mxu0 %vm9046_vm2, %v9045_v53 }
 0xea4   :  { %8757 = vmatmul.mubr.f32.vlgmr.msra.gmra.mxu0 %v10922_v9 }
 0xea5   :  { %8759 = vmatprep.mubr.msk.f32.mxu0 %vm9046_vm2, %v9045_v53  ;;  %6389 = vmatpush1.msra.mxu0 %v9038_v50 }
 0xea6   :  { %8765 = vmatprep.subr.mxu0 %v9045_v53 }
 0xea8   :  { %8760 = vmatmul.mubr.f32.gmra.mxu0 %v10927_v24 }
 0xea9   :  { %8762 = vmatprep.mubr.msk.f32.mxu0 %vm9046_vm2, %v9045_v53 }
 0xeac   :  { %8763 = vmatmul.mubr.f32.gmra.mxu0 %v10932_v49 }
 0xead   :  { %6422 = vmatprep.mubr.f32.mxu0 %v9045_v53 }
 0xf40   :  { %v8666_v45 = vpop.f32.mrf.mxu0 }
 0xf41   :  { %v6023_v25 = vmul.f32 %v11077_v62, %v8666_v45 }
 0xf42   :  { %v5933_v42 = vpop.f32.mrf.mxu0 }
 0xf43   :  { %v6022_v54 = vmul.f32 %v10836_v16, %v5933_v42 }
 0xf44   :  { %v8669_v47 = vpop.f32.mrf.mxu0 }
 0xf45   :  { %8697 = vmatprep.mubr.msk.f32.mxu1 %vm2959_vm5, %v6022_v54  ;;  %v6025_v56 = vmul.f32 %v11095_v60, %v8669_v47 }
 0xf46   :  { %v5943_v10 = vpop.f32.mrf.mxu0  ;;  %8698 = vmatmul.mubr.msk.f32.vlgmr.msra.gmra.mxu1 %vm2959_vm5, %v6023_v25  ;;  %v8628_v25 = vpop.f32.mrf.mxu1 }
 0xf47   :  { %v6024_v37 = vmul.f32 %v11086_v5, %v5943_v10 }
 0xf48   :  { %v8672_v52 = vpop.f32.mrf.mxu0  ;;  %v5652_v47 = vpop.f32.mrf.mxu1 }
 0xf49   :  { %8700 = vmatprep.mubr.msk.f32.mxu1 %vm2959_vm5, %v6024_v37  ;;  %v6027_v62 = vmul.f32 %v11111_v29, %v8672_v52 }
 0xf4a   :  { %v5953_v51 = vpop.f32.mrf.mxu0  ;;  %8701 = vmatmul.mubr.msk.f32.gmra.mxu1 %vm2959_vm5, %v6025_v56  ;;  %v8631_v10 = vpop.f32.mrf.mxu1 }
 0xf4b   :  { %v6026_v16 = vmul.f32 %v11103_v0, %v5953_v51 }
 0xf4c   :  { %v8675_v48 = vpop.f32.mrf.mxu0  ;;  %v5662_v37 = vpop.f32.mrf.mxu1 }
 0xf4d   :  { %8703 = vmatprep.mubr.msk.f32.mxu1 %vm2959_vm5, %v6026_v16  ;;  %v6029_v60 = vmul.f32 %v11126_v40, %v8675_v48  ;;  %v7284_v48 = vld [vmem:[%s11671_s19 + $0xf0] sm:$0xff] }
 0xf4e   :  { %v5963_v27 = vpop.f32.mrf.mxu0  ;;  %8704 = vmatmul.mubr.msk.f32.gmra.mxu1 %vm2959_vm5, %v6027_v62  ;;  %v11401_v56 = vpop.f32.mrf.mxu1  ;;  %v7285_v62 = vld [vmem:[%s11671_s19 + $0xf8] sm:$0xff] }
 0xf4f   :  { %v6028_v5 = vmul.f32 %v11119_v39, %v5963_v27 }
 0xf50   :  { %v8678_v7 = vpop.f32.mrf.mxu0  ;;  %v11403_v52 = vpop.f32.mrf.mxu1 }
 0xf51   :  { %8706 = vmatprep.mubr.msk.f32.mxu1 %vm2959_vm5, %v6028_v5  ;;  %v6031_v29 = vmul.f32 %v11140_v34, %v8678_v7  ;;  %v7283_v5 = vld [vmem:[%s11671_s19 + $0xe8] sm:$0xff] }
 0xf52   :  { %v5973_v21 = vpop.f32.mrf.mxu0  ;;  %8707 = vmatmul.mubr.msk.f32.gmra.mxu1 %vm2959_vm5, %v6029_v60  ;;  %v11405_v51 = vpop.f32.mrf.mxu1  ;;  %v7282_v60 = vld [vmem:[%s11671_s19 + $0xe0] sm:$0xff] }
 0xf53   :  { %v6030_v0 = vmul.f32 %v11133_v63, %v5973_v21  ;;  %v7281_v21 = vld [vmem:[%s11671_s19 + $0xd8] sm:$0xff] }
 0xf54   :  { %v8681_v13 = vpop.f32.mrf.mxu0  ;;  %v11407_v16 = vpop.f32.mrf.mxu1 }
 0xf55   :  { %8709 = vmatprep.mubr.msk.f32.mxu1 %vm2959_vm5, %v6030_v0  ;;  %v6033_v40 = vmul.f32 %v11154_v19, %v8681_v13  ;;  %v7280_v0 = vld [vmem:[%s11671_s19 + $0xd0] sm:$0xff]  ;;  %v7279_v13 = vld [vmem:[%s11671_s19 + $0xc8] sm:$0xff] }
 0xf56   :  { %v5983_v1 = vpop.f32.mrf.mxu0  ;;  %8710 = vmatmul.mubr.msk.f32.gmra.mxu1 %vm2959_vm5, %v6031_v29  ;;  %v8640_v27 = vpop.f32.mrf.mxu1 }
 0xf57   :  { %v6032_v39 = vmul.f32 %v11147_v26, %v5983_v1  ;;  %v7278_v1 = vld [vmem:[%s11671_s19 + $0xc0] sm:$0xff] }
 0xf58   :  { %v8684_v3 = vpop.f32.mrf.mxu0  ;;  %v11423_v7 = vpop.f32.mrf.mxu1 }
 0xf59   :  { %8712 = vmatprep.mubr.msk.f32.mxu1 %vm2959_vm5, %v6032_v39  ;;  %v6035_v46 = vmul.f32 %v11168_v6, %v8684_v3  ;;  %v7276_v3 = vld [vmem:[%s11671_s19 + $0xb0] sm:$0xff] }
 0xf5a   :  { %v5993_v57 = vpop.f32.mrf.mxu0  ;;  %8713 = vmatmul.mubr.msk.f32.gmra.mxu1 %vm2959_vm5, %v6033_v40  ;;  %v8643_v29 = vpop.f32.mrf.mxu1  ;;  %v7277_v40 = vld [vmem:[%s11671_s19 + $0xb8] sm:$0xff] }
 0xf5b   :  { %v6034_v63 = vmul.f32 %v11161_v11, %v5993_v57 }
 0xf5c   :  { %v8687_v34 = vpop.f32.mrf.mxu0  ;;  %v5702_v39 = vpop.f32.mrf.mxu1 }
 0xf5d   :  { %8715 = vmatprep.mubr.msk.f32.mxu1 %vm2959_vm5, %v6034_v63  ;;  %v6037_v15 = vmul.f32 %v11182_v20, %v8687_v34  ;;  %v7275_v63 = vld [vmem:[%s11671_s19 + $0xa8] sm:$0xff]  ;;  %v7274_v34 = vld [vmem:[%s11671_s19 + $0xa0] sm:$0xff] }
 0xf5e   :  { %v6003_v50 = vpop.f32.mrf.mxu0  ;;  %8716 = vmatmul.mubr.msk.f32.gmra.mxu1 %vm2959_vm5, %v6035_v46  ;;  %v5741_v46 = vmul.f32 %v5652_v47, %v11209_v44  ;;  %v11450_v57 = vpop.f32.mrf.mxu1  ;;  %v7273_v44 = vld [vmem:[%s11671_s19 + $0x98] sm:$0xff] }
 0xf5f   :  { %v6036_v26 = vmul.f32 %v11175_v58, %v6003_v50 }
 0xf60   :  { %v8690_v19 = vpop.f32.mrf.mxu0  ;;  %v5712_v50 = vpop.f32.mrf.mxu1 }
 0xf61   :  { %8718 = vmatprep.mubr.msk.f32.mxu1 %vm2959_vm5, %v6036_v26  ;;  %v6039_v6 = vmul.f32 %v11196_v33, %v8690_v19  ;;  %v5742_v26 = vmul.f32 %v8628_v25, %v11207_v43  ;;  %v5751_v25 = vmul.f32 %v5702_v39, %v11229_v23  ;;  %v5752_v23 = vmul.f32 %v8643_v29, %v11227_v38 }
 0xf62   :  { %v6013_v45 = vpop.f32.mrf.mxu0  ;;  %8719 = vmatmul.mubr.msk.f32.gmra.mxu1 %vm2959_vm5, %v6037_v15  ;;  %v5759_v15 = vmul.f32 1.442695, %v5741_v46  ;;  %v11466_v19 = vpop.f32.mrf.mxu1 }
 0xf63   :  { %v6038_v11 = vmul.f32 %v11189_v8, %v6013_v45  ;;  %v5743_v45 = vmul.f32 %v5662_v37, %v11213_v14  ;;  %v5779_v37 = vmul.f32 1.442695, %v5751_v25 }
 0xf64   :  { %v6335_v42 = vpop.f32.mrf.mxu0  ;;  %8953 = vpow2.f32 %v5759_v15 }
 0xf65   :  { %7262 = vmatmul.mubr.msk.f32.vlgmr.msra.gmra.mxu0 %vm3633_vm6, %v6335_v42  ;;  %8721 = vmatprep.mubr.msk.f32.mxu1 %vm2959_vm5, %v6038_v11  ;;  %v5744_v11 = vmul.f32 %v8631_v10, %v11211_v55  ;;  %v5722_v42 = vpop.f32.mrf.mxu1  ;;  %v5746_v55 = vmul.f32 %v11401_v56, %v11215_v4  ;;  %v5748_v56 = vmul.f32 %v11405_v51, %v11219_v2 }
 0xf66   :  { %v8758_v20 = vpop.f32.mrf.mxu0  ;;  %6428 = vmatprep.mubr.f32.mxu0 %v9045_v53  ;;  %8722 = vmatmul.mubr.msk.f32.gmra.mxu1 %vm2959_vm5, %v6039_v6  ;;  %v5761_v6 = vmul.f32 1.442695, %v5742_v26  ;;  %v5754_v2 = vmul.f32 %v11450_v57, %v11231_v17 }
 0xf67   :  { %8766 = vmatpush3.msra.mxu0 %v7285_v62  ;;  %v5763_v20 = vmul.f32 1.442695, %v5743_v45  ;;  %v5765_v43 = vmul.f32 1.442695, %v5744_v11  ;;  %v5773_v39 = vmul.f32 1.442695, %v5748_v56 }
 0xf68   :  { %v6340_v58 = vpop.f32.mrf.mxu0  ;;  %8767 = vmatprep.subr.mxu0 %v9045_v53  ;;  %8955 = vpow2.f32 %v5761_v6 }
 0xf69   :  { %7263 = vmatmul.mubr.msk.f32.gmra.mxu0 %vm3633_vm6, %v6340_v58  ;;  %v5750_v58 = vmul.f32 %v8640_v27, %v11223_v36  ;;  %8957 = vpow2.f32 %v5763_v20 }
 0xf6a   :  { %v8761_v54 = vpop.f32.mrf.mxu0  ;;  %6434 = vmatprep.mubr.f32.mxu0 %v9045_v53  ;;  %8768 = vmatpush3.msra.mxu0 %v7284_v48  ;;  %8959 = vpow2.f32 %v5765_v43  ;;  %v5747_v48 = vmul.f32 %v11407_v16, %v11221_v61  ;;  %v5753_v61 = vmul.f32 %v5712_v50, %v11233_v41 }
 0xf6b   :  { %8769 = vmatprep.subr.mxu0 %v9045_v53  ;;  %v11472_v54 = vpop.f32.mrf.mxu1 }
 0xf6c   :  { %v6345_v33 = vpop.f32.mrf.mxu0  ;;  %8770 = vmatpush3.msra.mxu0 %v7283_v5  ;;  %v5783_v46 = vmul.f32 1.442695, %v5753_v61 }
 0xf6d   :  { %7264 = vmatmul.mubr.msk.f32.gmra.mxu0 %vm3633_vm6, %v6345_v33  ;;  %8771 = vmatprep.subr.mxu0 %v9045_v53  ;;  %v5745_v33 = vmul.f32 %v11403_v52, %v11217_v12  ;;  %v11477_v14 = vpop.f32.mrf.mxu1  ;;  %v5769_v12 = vmul.f32 1.442695, %v5746_v55 }
 0xf6e   :  { %v8764_v8 = vpop.f32.mrf.mxu0  ;;  %8797 = vmatprep.mubr.msk.f32.mxu0 %vm9046_vm2, %v9045_v53  ;;  %8772 = vmatpush3.msra.mxu0 %v7282_v60 }
 0xf6f   :  { %8773 = vmatprep.subr.mxu0 %v9045_v53  ;;  %v5777_v8 = vmul.f32 1.442695, %v5750_v58  ;;  %v5767_v10 = vmul.f32 1.442695, %v5745_v33  ;;  %v5756_v58 = vmul.f32 %v11466_v19, %v11235_v32 }
 0xf70   :  { %8774 = vmatpush3.msra.mxu0 %v7281_v21  ;;  %v5771_v21 = vmul.f32 1.442695, %v5747_v48 }
 0xf71   :  { %8775 = vmatprep.subr.mxu0 %v9045_v53  ;;  %v8954_v47 = vpop.eup %8953  ;;  %8961 = vpow2.f32 %v5777_v8  ;;  %v5789_v55 = vmul.f32 1.442695, %v5756_v58 }
 0xf72   :  { %8776 = vmatpush3.msra.mxu0 %v7280_v0  ;;  %v6447_v62 = vmul.f32 0.0, %v8954_v47  ;;  %8963 = vpow2.f32 %v5767_v10 }
 0xf73   :  { %8777 = vmatprep.subr.mxu0 %v9045_v53  ;;  %8965 = vpow2.f32 %v5779_v37  ;;  %v5757_v37 = vmul.f32 %v11477_v14, %v11241_v28 }
 0xf74   :  { %8778 = vmatpush3.msra.mxu0 %v7279_v13  ;;  %8967 = vpow2.f32 %v5769_v12  ;;  %v5781_v13 = vmul.f32 1.442695, %v5752_v23 }
 0xf75   :  { %8779 = vmatprep.subr.mxu0 %v9045_v53  ;;  %v8956_v5 = vpop.eup %8955  ;;  %8969 = vpow2.f32 %v5771_v21 }
 0xf76   :  { %8780 = vmatpush3.msra.mxu0 %v7278_v1  ;;  %v8958_v1 = vpop.eup %8957  ;;  %8971 = vpow2.f32 %v5781_v13 }
 0xf77   :  { %8781 = vmatprep.subr.mxu0 %v9045_v53  ;;  %8973 = vpow2.f32 %v5773_v39 }
 0xf78   :  { %8782 = vmatpush3.msra.mxu0 %v7277_v40  ;;  %v5749_v40 = vmul.f32 %v11423_v7, %v11225_v22  ;;  %8975 = vpow2.f32 %v5783_v46  ;;  %v5755_v22 = vmul.f32 %v5722_v42, %v11237_v35 }
 0xf79   :  { %8783 = vmatprep.subr.mxu0 %v9045_v53 }
 0xf7a   :  { %8784 = vmatpush3.msra.mxu0 %v7276_v3  ;;  %v8960_v3 = vpop.eup %8959  ;;  %v5775_v50 = vmul.f32 1.442695, %v5749_v40  ;;  %v5787_v33 = vmul.f32 1.442695, %v5755_v22 }
 0xf7b   :  { %8785 = vmatprep.subr.mxu0 %v9045_v53 }
 0xf7c   :  { %8786 = vmatpush3.msra.mxu0 %v7275_v63  ;;  %8977 = vpow2.f32 %v5775_v50 }
 0xf7d   :  { %8787 = vmatprep.subr.mxu0 %v9045_v53 }
 0xf7e   :  { %8788 = vmatpush3.msra.mxu0 %v7274_v34  ;;  %v8962_v41 = vpop.eup %8961 }
 0xf7f   :  { %8789 = vmatprep.subr.mxu0 %v9045_v53  ;;  %v6474_v17 = vmul.f32 0.0, %v8962_v41  ;;  %v8964_v57 = vpop.eup %8963 }
 0xf80   :  { %8790 = vmatpush3.msra.mxu0 %v7273_v44  ;;  %v5785_v44 = vmul.f32 1.442695, %v5754_v2  ;;  %v8966_v20 = vpop.eup %8965 }
 0xf81   :  { %8791 = vmatprep.subr.mxu0 %v9045_v53  ;;  %v8968_v42 = vpop.eup %8967 }
 0xf82   :  { %8979 = vpow2.f32 %v5785_v44 }
 0xf83   :  { %8981 = vpow2.f32 %v5787_v33 }
 0xf84   :  { %8983 = vpow2.f32 %v5789_v55 }
0x1006   :  { %v8699_v36 = vpop.f32.mrf.mxu1 }
0x1008   :  { %v6163_v27 = vpop.f32.mrf.mxu1 }
0x1009   :  { %v11484_v52 = vadd.f32 %v6447_v62, %v6163_v27 }
0x100a   :  { %v8702_v60 = vpop.f32.mrf.mxu1 }
0x100b   :  { %v6450_v4 = vmul.f32 %v8956_v5, %v11484_v52  ;;  %v5758_v5 = vmul.f32 %v11472_v54, %v11239_v30  ;;  %v9039_v30 = vld [vmem:[%s11672_s21 + $0x8] sm:$0xff] }
0x100c   :  { %v6173_v0 = vpop.f32.mrf.mxu1 }
0x100d   :  { %v11490_v16 = vadd.f32 %v8699_v36, %v6450_v4  ;;  %v8970_v36 = vpop.eup %8969  ;;  %v5793_v61 = vmul.f32 1.442695, %v5758_v5  ;;  %v6741_v5 = vld [vmem:[%s11674_s24 + $0x20] sm:$0xff] }
0x100e   :  { %v8705_v38 = vpop.f32.mrf.mxu1  ;;  %v8972_v62 = vpop.eup %8971 }
0x100f   :  { %v6453_v29 = vmul.f32 %v8958_v1, %v11490_v16  ;;  %v8974_v23 = vpop.eup %8973 }
0x1010   :  { %v6183_v51 = vpop.f32.mrf.mxu1  ;;  %v8976_v21 = vpop.eup %8975 }
0x1011   :  { %v11497_v63 = vadd.f32 %v6453_v29, %v6173_v0  ;;  %v8978_v14 = vpop.eup %8977 }
0x1012   :  { %v8708_v34 = vpop.f32.mrf.mxu1  ;;  %v8980_v39 = vpop.eup %8979 }
0x1013   :  { %v6456_v15 = vmul.f32 %v8960_v3, %v11497_v63  ;;  %v8982_v41 = vpop.eup %8981 }
0x1014   :  { %v6193_v26 = vpop.f32.mrf.mxu1  ;;  %v8984_v50 = vpop.eup %8983 }
0x1015   :  { %v11501_v7 = vadd.f32 %v8702_v60, %v6456_v15  ;;  %v5791_v60 = vmul.f32 1.442695, %v5757_v37  ;;  %v9044_v37 = vld [vmem:[%s11672_s21 + $0x20] sm:$0x3] }
0x1016   :  { %v8711_v6 = vpop.f32.mrf.mxu1 }
0x1017   :  { %v6459_v45 = vmul.f32 %v8964_v57, %v11501_v7  ;;  %v11504_v11 = vadd.f32 %v8711_v6, %v6474_v17  ;;  %8985 = vpow2.f32 %v5791_v60  ;;  %v6740_v60 = vld [vmem:[%s11674_s24 + $0x18] sm:$0xff] }
0x1018   :  { %v11508_v43 = vpop.f32.mrf.mxu1  ;;  %8987 = vpow2.f32 %v5793_v61 }
0x1019   :  { %v11510_v8 = vadd.f32 %v6459_v45, %v6183_v51  ;;  %v6477_v35 = vmul.f32 %v8966_v20, %v11504_v11 }
0x101a   :  { %v8714_v25 = vpop.f32.mrf.mxu1 }
0x101b   :  { %v6462_v47 = vmul.f32 %v8968_v42, %v11510_v8 }
0x101c   :  { %v6213_v10 = vpop.f32.mrf.mxu1 }
0x101d   :  { %v11516_v32 = vadd.f32 %v8705_v38, %v6462_v47  ;;  %v6478_v19 = vadd.f32 %v6477_v35, %v6213_v10  ;;  %v9043_v10 = vld [vmem:[%s11672_s21 + $0x28] sm:$0x3] }
0x101e   :  { %v8717_v12 = vpop.f32.mrf.mxu1 }
0x101f   :  { %v6465_v48 = vmul.f32 %v8970_v36, %v11516_v32  ;;  %v6480_v27 = vmul.f32 %v8972_v62, %v6478_v19  ;;  %v7271_v62 = vld [vmem:[%s11671_s19 + $0x88] sm:$0xff] }
0x1020   :  { %v6223_v28 = vpop.f32.mrf.mxu1 }
0x1021   :  { %v6466_v4 = vadd.f32 %v6465_v48, %v6193_v26  ;;  %v6481_v56 = vadd.f32 %v8714_v25, %v6480_v27  ;;  %v7270_v48 = vld [vmem:[%s11671_s19 + $0x80] sm:$0xff]  ;;  %v6744_v27 = vld [vmem:[%s11674_s24 + $0x38] sm:$0xff] }
0x1022   :  { %v8720_v3 = vpop.f32.mrf.mxu1 }
0x1023   :  { %v6468_v0 = vmul.f32 %v8974_v23, %v6466_v4  ;;  %v6483_v13 = vmul.f32 %v8976_v21, %v6481_v56  ;;  %v6742_v23 = vld [vmem:[%s11674_s24 + $0x28] sm:$0xff]  ;;  %v6619_v21 = vsub.f32 0.0, %v10753_v31 }
0x1024   :  { %v8986_v57 = vpop.eup %8985 }
0x1025   :  { %v6469_v1 = vadd.f32 %v8708_v34, %v6468_v0  ;;  %v6484_v38 = vadd.f32 %v6483_v13, %v6223_v28  ;;  %v11521_v29 = vpop.f32.mrf.mxu0  ;;  %v6233_v34 = vpop.f32.mrf.mxu1  ;;  %v6622_v0 = vmul.f32 1.442695, %v6619_v21  ;;  %v6620_v13 = vsub.f32 0.0, %v10757_v18 }
0x1026   :  { %v8988_v58 = vpop.eup %8987 }
0x1027   :  { %v6471_v40 = vmul.f32 %v8978_v14, %v6469_v1  ;;  %v6486_v2 = vmul.f32 %v8980_v39, %v6484_v38  ;;  %v6426_v51 = vpop.f32.mrf.mxu0  ;;  %v8723_v26 = vpop.f32.mrf.mxu1  ;;  %8989 = vpow2.f32 %v6622_v0  ;;  %v6624_v28 = vmul.f32 1.442695, %v6620_v13 }
0x1028   :  { %v6442_v54 = vmul.f32 %v9039_v30, %v6426_v51  ;;  %v6621_v14 = vsub.f32 0.0, %v10906_v59  ;;  %v7266_v51 = vld [vmem:[%s11673_s18 + $0x1] ss:$0 sm:$0xff] }
0x1029   :  { %v6487_v46 = vadd.f32 %v8717_v12, %v6486_v2  ;;  %v6243_v6 = vpop.f32.mrf.mxu1  ;;  %v6472_v35 = vadd.f32 %v6471_v40, %v11508_v43  ;;  %v6430_v43 = vpop.f32.mrf.mxu0  ;;  %v6743_v12 = vld [vmem:[%s11674_s24 + $0x30] sm:$0xff]  ;;  %8991 = vpow2.f32 %v6624_v28 }
0x102a   :  { %7267 = vmatprep.mubr.msk.f32.mxu1 %vm269_vm1, %v6442_v54  ;;  %v6626_v61 = vmul.f32 1.442695, %v6621_v14  ;;  %v6527_v54 = vmul.f32 %v7266_v51, %v10922_v9 }
0x102b   :  { %v6489_v15 = vmul.f32 %v8982_v41, %v6487_v46 }
0x102c   :  { %8993 = vpow2.f32 %v6626_v61 }
0x102d   :  { %v6490_v44 = vadd.f32 %v6489_v15, %v6233_v34 }
0x102f   :  { %v6492_v22 = vmul.f32 %v8984_v50, %v6490_v44 }
0x1031   :  { %v6493_v17 = vadd.f32 %v8720_v3, %v6492_v22 }
0x1033   :  { %6540 = vmatpush1.msra.mxu1 %v6493_v17  ;;  %v6495_v45 = vmul.f32 %v8986_v57, %v6493_v17 }
0x1034   :  { %6541 = vmatprep.subr.mxu1 %v9045_v53 }
0x1035   :  { %v6496_v20 = vadd.f32 %v6495_v45, %v6243_v6  ;;  %6542 = vmatpush1.msra.mxu1 %v6490_v44  ;;  %v6528_v44 = vmul.f32 %v7266_v51, %v10927_v24  ;;  %v6529_v45 = vmul.f32 %v7266_v51, %v10932_v49  ;;  %v6737_v24 = vld [vmem:[%s11674_s24] sm:$0xff] }
0x1036   :  { %6543 = vmatprep.subr.mxu1 %v9045_v53 }
0x1037   :  { %v6498_v33 = vmul.f32 %v8988_v58, %v6496_v20  ;;  %6544 = vmatpush1.msra.mxu1 %v6487_v46 }
0x1038   :  { %6545 = vmatprep.subr.mxu1 %v9045_v53 }
0x1039   :  { %6546 = vmatpush1.msra.mxu1 %v6484_v38  ;;  %v6499_v42 = vadd.f32 %v8723_v26, %v6498_v33 }
0x103a   :  { %6547 = vmatprep.subr.mxu1 %v9045_v53 }
0x103b   :  { %6548 = vmatpush1.msra.mxu1 %v6481_v56  ;;  %v6738_v56 = vld [vmem:[%s11674_s24 + $0x8] sm:$0xff] }
0x103c   :  { %6549 = vmatprep.subr.mxu1 %v9045_v53 }
0x103d   :  { %6550 = vmatpush1.msra.mxu1 %v6478_v19  ;;  %v7272_v19 = vld [vmem:[%s11671_s19 + $0x90] sm:$0xff] }
0x103e   :  { %6551 = vmatprep.subr.mxu1 %v9045_v53  ;;  %8792 = vmatpush3.msra.mxu0 %v7272_v19 }
0x103f   :  { %6552 = vmatpush1.msra.mxu1 %v11504_v11  ;;  %v6432_v11 = vpop.f32.mrf.mxu0  ;;  %8793 = vmatprep.subr.mxu0 %v9045_v53 }
0x1040   :  { %6553 = vmatprep.subr.mxu1 %v9045_v53  ;;  %8794 = vmatpush3.msra.mxu0 %v7271_v62 }
0x1041   :  { %6554 = vmatpush1.msra.mxu1 %v6472_v35  ;;  %8795 = vmatprep.subr.mxu0 %v9045_v53 }
0x1042   :  { %6555 = vmatprep.subr.mxu1 %v9045_v53  ;;  %8796 = vmatpush3.msra.mxu0 %v7270_v48 }
0x1043   :  { %6556 = vmatpush1.msra.mxu1 %v6469_v1  ;;  %v8990_v1 = vpop.eup %8989 }
0x1044   :  { %6557 = vmatprep.subr.mxu1 %v9045_v53  ;;  %v6628_v38 = vadd.f32 1.0, %v8990_v1 }
0x1045   :  { %6558 = vmatpush1.msra.mxu1 %v6466_v4  ;;  %v6739_v4 = vld [vmem:[%s11674_s24 + $0x10] sm:$0xff] }
0x1046   :  { %6559 = vmatprep.subr.mxu1 %v9045_v53  ;;  %8995 = vrcp.f32 %v6628_v38 }
0x1047   :  { %6560 = vmatpush1.msra.mxu1 %v11516_v32 }
0x1048   :  { %6561 = vmatprep.subr.mxu1 %v9045_v53 }
0x1049   :  { %6562 = vmatpush1.msra.mxu1 %v11510_v8  ;;  %v6436_v8 = vpop.f32.mrf.mxu0 }
0x104a   :  { %6563 = vmatprep.subr.mxu1 %v9045_v53  ;;  %v6445_v32 = vmul.f32 %v9044_v37, %v6436_v8  ;;  %v7286_v8 = vld [vmem:[%s11675_s25] ss:$0 sm:$0xff] }
0x104b   :  { %6564 = vmatpush1.msra.mxu1 %v11501_v7  ;;  %v9040_v7 = vld [vmem:[%s11672_s21] sm:$0xff]  ;;  %v6438_v47 = vpop.f32.mrf.mxu0 }
0x104c   :  { %6565 = vmatprep.subr.mxu1 %v9045_v53  ;;  %v6446_v36 = vmul.f32 %v9043_v10, %v6438_v47 }
0x104d   :  { %6566 = vmatpush1.msra.mxu1 %v11497_v63  ;;  %v6441_v63 = vmul.f32 %v9040_v7, %v11521_v29  ;;  %v8992_v29 = vpop.eup %8991 }
0x104e   :  { %6567 = vmatprep.subr.mxu1 %v9045_v53  ;;  %v6629_v39 = vadd.f32 1.0, %v8992_v29  ;;  %v8994_v40 = vpop.eup %8993 }
0x104f   :  { %6568 = vmatpush1.msra.mxu1 %v11490_v16  ;;  %v9041_v16 = vld [vmem:[%s11672_s21 + $0x18] sm:$0xff]  ;;  %v6630_v2 = vadd.f32 1.0, %v8994_v40 }
0x1050   :  { %6569 = vmatprep.subr.mxu1 %v9045_v53  ;;  %v6444_v25 = vmul.f32 %v9041_v16, %v6432_v11  ;;  %8997 = vrcp.f32 %v6629_v39 }
0x1051   :  { %6570 = vmatpush1.msra.mxu1 %v11484_v52  ;;  %v9042_v52 = vld [vmem:[%s11672_s21 + $0x10] sm:$0xff]  ;;  %8999 = vrcp.f32 %v6630_v2 }
0x1052   :  { %6599 = vmatprep.subr.mxu1 %v9045_v53  ;;  %v6443_v55 = vmul.f32 %v9042_v52, %v6430_v43 }
0x1053   :  { %6600 = vmatpush2.msra.mxu1 %v6499_v42  ;;  %v8996_v30 = vpop.eup %8995 }
0x1054   :  { %6601 = vmatprep.subr.mxu1 %v9045_v53  ;;  %v6634_v46 = vmul.f32 %v8996_v30, %v10753_v31 }
0x1055   :  { %6602 = vmatpush2.msra.mxu1 %v6496_v20 }
0x1056   :  { %6604 = vmatmul.mubr.f32.vlgmr.msra.gmra.mxu1 %v6441_v63  ;;  %8806 = vmatprep.subr.mxu1 %v9045_v53 }
0x1057   :  { %7268 = vmatprep.mubr.msk.f32.mxu1 %vm269_vm1, %v6444_v25  ;;  %8807 = vmatpush3.msra.mxu1 %v6744_v27 }
0x1058   :  { %8808 = vmatprep.subr.mxu1 %v9045_v53 }
0x1059   :  { %8809 = vmatpush3.msra.mxu1 %v6743_v12 }
0x105a   :  { %6609 = vmatmul.mubr.f32.gmra.mxu1 %v6443_v55  ;;  %8810 = vmatprep.subr.mxu1 %v9045_v53 }
0x105b   :  { %7269 = vmatprep.mubr.msk.f32.mxu1 %vm269_vm1, %v6446_v36  ;;  %8811 = vmatpush3.msra.mxu1 %v6742_v23 }
0x105c   :  { %8812 = vmatprep.subr.mxu1 %v9045_v53 }
0x105d   :  { %8813 = vmatpush3.msra.mxu1 %v6741_v5  ;;  %v8998_v15 = vpop.eup %8997 }
0x105e   :  { %6614 = vmatmul.mubr.f32.gmra.mxu1 %v6445_v32  ;;  %8814 = vmatprep.subr.mxu1 %v9045_v53  ;;  %v6635_v22 = vmul.f32 %v8998_v15, %v10757_v18  ;;  %v9000_v57 = vpop.eup %8999 }
0x105f   :  { %8822 = vmatprep.mubr.msk.f32.mxu1 %vm9046_vm2, %v9045_v53  ;;  %8815 = vmatpush3.msra.mxu1 %v6740_v60  ;;  %v6636_v20 = vmul.f32 %v9000_v57, %v10906_v59 }
0x1060   :  { %8816 = vmatprep.subr.mxu1 %v9045_v53 }
0x1061   :  { %8817 = vmatpush3.msra.mxu1 %v6739_v4 }
0x1062   :  { %8818 = vmatprep.subr.mxu1 %v9045_v53 }
0x1063   :  { %8819 = vmatpush3.msra.mxu1 %v6738_v56 }
0x1064   :  { %8820 = vmatprep.subr.mxu1 %v9045_v53 }
0x1065   :  { %8821 = vmatpush3.msra.mxu1 %v6737_v24 }
0x1116   :  { %v6605_v3 = vpop.f32.mrf.mxu1 }
0x1117   :  { %v6606_v41 = vadd.f32 %v6605_v3, %v6527_v54 }
0x1118   :  { %v6607_v34 = vpop.f32.mrf.mxu1 }
0x1119   :  { %v6637_v50 = vmul.f32 %v6634_v46, %v6606_v41 }
0x111a   :  { %v6610_v26 = vpop.f32.mrf.mxu1 }
0x111b   :  { %v6611_v17 = vadd.f32 %v6610_v26, %v6528_v44  ;;  %8798 = vmatmul.mubr.f32.vlgmr.msra.gmra.mxu0 %v6637_v50 }
0x111c   :  { %v6612_v6 = vpop.f32.mrf.mxu1  ;;  %8800 = vmatprep.mubr.msk.f32.mxu0 %vm9046_vm2, %v9045_v53 }
0x111d   :  { %v6638_v9 = vmul.f32 %v6635_v22, %v6611_v17 }
0x111e   :  { %v6615_v31 = vpop.f32.mrf.mxu1 }
0x111f   :  { %v6616_v58 = vadd.f32 %v6615_v31, %v6529_v45  ;;  %8801 = vmatmul.mubr.f32.gmra.mxu0 %v6638_v9 }
0x1120   :  { %v6617_v33 = vpop.f32.mrf.mxu1  ;;  %8803 = vmatprep.mubr.msk.f32.mxu0 %vm9046_vm2, %v9045_v53 }
0x1121   :  { %v6639_v18 = vmul.f32 %v6636_v20, %v6616_v58 }
0x1123   :  { %8804 = vmatmul.mubr.f32.gmra.mxu0 %v6639_v18 }
0x11db   :  { %v6723_v35 = vpop.f32.mrf.mxu0 }
0x11dc   :  { %8823 = vmatmul.mubr.msk.f32.vlgmr.msra.gmra.mxu1 %vm2845_vm3, %v6723_v35 }
0x11dd   :  { %v8799_v49 = vpop.f32.mrf.mxu0  ;;  %8825 = vmatprep.mubr.msk.f32.mxu1 %vm9046_vm2, %v9045_v53 }
0x11df   :  { %v6728_v59 = vpop.f32.mrf.mxu0 }
0x11e0   :  { %8826 = vmatmul.mubr.msk.f32.gmra.mxu1 %vm2845_vm3, %v6728_v59 }
0x11e1   :  { %v8802_v43 = vpop.f32.mrf.mxu0  ;;  %8828 = vmatprep.mubr.msk.f32.mxu1 %vm9046_vm2, %v9045_v53 }
0x11e3   :  { %v6733_v11 = vpop.f32.mrf.mxu0 }
0x11e4   :  { %8829 = vmatmul.mubr.msk.f32.gmra.mxu1 %vm2845_vm3, %v6733_v11 }
0x11e5   :  { %v8805_v42 = vpop.f32.mrf.mxu0 }
0x129c   :  { %v6827_v7 = vpop.f32.mrf.mxu1 }
0x129d   :  { %v6828_v63 = vadd.f32 %v7286_v8, %v6827_v7 }
0x129e   :  { %v8824_v16 = vpop.f32.mrf.mxu1 }
0x129f   :  { %6841 = vst [vmem:[%s11676_s26] sm:$0xff] %v6828_v63 }
0x12a0   :  { %v6832_v25 = vpop.f32.mrf.mxu1 }
0x12a1   :  { %v6833_v47 = vadd.f32 %v7286_v8, %v6832_v25 }
0x12a2   :  { %v8827_v52 = vpop.f32.mrf.mxu1 }
0x12a3   :  { %6842 = vst [vmem:[%s11676_s26 + $0x8] sm:$0xff] %v6833_v47 }
0x12a4   :  { %v6837_v53 = vpop.f32.mrf.mxu1 }
0x12a5   :  { %v6838_v55 = vadd.f32 %v7286_v8, %v6837_v53 }
0x12a6   :  { %v8830_v10 = vpop.f32.mrf.mxu1 }
0x12a7   :  { %6843 = vst [vmem:[%s11676_s26 + $0x10] sm:$0x3] %v6838_v55 }

</bundles_post_ra>
